<compile_context>
chip_gen: v7x
topology: tpu7x:2x2x1
jax: 0.10.0
libtpu: 0.0.40
codegen_flags: <defaults>
</compile_context>

<pallas_src>
import math

import jax
import jax.numpy as jnp
from jax.experimental import pallas as pl
from jax.experimental.pallas import tpu as pltpu

HIDDEN = 1024      # hard-coded hidden width of AdversarialNetwork.main
OUT_PAD = 128      # final Linear has 1 output; lane-padded to a full vreg width


def _round_up(x, m):
    return (x + m - 1) // m * m


# ------------------------------- Pallas kernel -------------------------------
def _adv_mlp_kernel(x_ref, w1_ref, b1_ref, w2_ref, b2_ref, w3_ref, b3_ref,
                    o_ref):
    """Fused sigmoid(relu(relu(x@W1+b1)@W2+b2)@w3+b3) for one batch tile."""
    x = x_ref[...]                                   # already bf16 (wrapper cast)

    # Linear(in_feature, 1024) + ReLU     (Dropout(0.5): identity at inference)
    h1 = jnp.dot(x, w1_ref[...], preferred_element_type=jnp.float32)
    h1 = jnp.maximum(h1 + b1_ref[...], 0.0)

    # Linear(1024, 1024) + ReLU           (Dropout(0.5): identity at inference)
    h2 = jnp.dot(h1.astype(jnp.bfloat16), w2_ref[...],
                 preferred_element_type=jnp.float32)
    h2 = jnp.maximum(h2 + b2_ref[...], 0.0)

    # Linear(1024, 1): VPU multiply + XLU cross-lane reduce (MXU would be 127/128
    # padding work).  Broadcast across the 128-wide lane-dense output slab.
    z = jnp.sum(h2 * w3_ref[...], axis=-1, keepdims=True) + b3_ref[...]  # (tm,128)

    # Exact sigmoid via a single EUP tanh; math in f32, store in bf16.
    o_ref[...] = (0.5 * (jnp.tanh(0.5 * z) + 1.0)).astype(o_ref.dtype)


# ------------------------------ parameter build ------------------------------
def build_params(in_feature, seed=0):
    """Deterministic synthetic weights, pre-packed for the kernel (hoisted)."""
    # TODO(synk): no checkpoint loading; weights follow nn.Linear's default
    # U(-1/sqrt(fan_in), 1/sqrt(fan_in)) init with a fixed PRNG key.
    ks = jax.random.split(jax.random.PRNGKey(seed), 6)

    def linear(kw, kb, fan_in, fan_out):
        bound = 1.0 / math.sqrt(fan_in)
        w = jax.random.uniform(kw, (fan_in, fan_out), jnp.float32, -bound, bound)
        b = jax.random.uniform(kb, (fan_out,), jnp.float32, -bound, bound)
        return w, b

    w1, b1 = linear(ks[0], ks[1], in_feature, HIDDEN)
    w2, b2 = linear(ks[2], ks[3], HIDDEN, HIDDEN)
    w3, b3 = linear(ks[4], ks[5], HIDDEN, 1)

    # One-time packing: (in,out) layout, zero-pad K to a lane multiple, cast
    # matmul weights to bf16.  Layer-3 weight stays a single f32 row and its
    # scalar bias is replicated across the 128 output lanes.
    kp = _round_up(in_feature, 128)
    w1p = jnp.zeros((kp, HIDDEN), jnp.float32).at[:in_feature].set(w1)

    return dict(
        in_feature=in_feature,
        w1=w1p.astype(jnp.bfloat16), b1=b1.reshape(1, HIDDEN),
        w2=w2.astype(jnp.bfloat16),  b2=b2.reshape(1, HIDDEN),
        w3=w3.reshape(1, HIDDEN),                       # f32 row for the VPU path
        b3=jnp.full((1, OUT_PAD), b3[0], jnp.float32),  # scalar, lane-replicated
    )


# -------------------------------- forward pass --------------------------------
def adversarial_network_forward(params, x):
    """x: (N, in_feature) f32 -> (N, 1) f32 sigmoid output."""
    # GRL forward is identity; TODO(synk): the gradient-reversal backward
    # (training-only) has no forward-pass equivalent and is not implemented.
    n, f = x.shape
    kp = params["w1"].shape[0]

    # Batch tile: tiny/serving batches -> one minimally padded step; otherwise
    # multiples of 256 (v6e/v7x MXU M) sized so the grid has >=2 steps (v7x).
    if n <= 256:
        tm = _round_up(max(n, 8), 8)
    else:
        tm = min(512, _round_up((n + 1) // 2, 256))
    np_ = _round_up(n, tm)

    # bf16 cast fused with the pad; skip the pad entirely when already aligned.
    xb = x.astype(jnp.bfloat16)
    if n != np_ or f != kp:
        xb = jnp.pad(xb, ((0, np_ - n), (0, kp - f)))

    flops = 2 * np_ * (kp * HIDDEN + HIDDEN * HIDDEN + HIDDEN)
    bytes_accessed = (
        np_ * kp * 2                                           # x (bf16)
        + (params["w1"].size + params["w2"].size) * 2          # W1, W2 (bf16)
        + (params["w3"].size + params["b1"].size
           + params["b2"].size + params["b3"].size) * 4        # w3 row + biases
        + np_ * OUT_PAD * 2)                                   # output (bf16)

    out = pl.pallas_call(
        _adv_mlp_kernel,
        out_shape=jax.ShapeDtypeStruct((np_, OUT_PAD), jnp.bfloat16),
        grid=(np_ // tm,),
        in_specs=[
            pl.BlockSpec((tm, kp), lambda i: (i, 0)),           # x tile (bf16)
            pl.BlockSpec((kp, HIDDEN), lambda i: (0, 0)),       # W1 (resident)
            pl.BlockSpec((1, HIDDEN), lambda i: (0, 0)),        # b1
            pl.BlockSpec((HIDDEN, HIDDEN), lambda i: (0, 0)),   # W2 (resident)
            pl.BlockSpec((1, HIDDEN), lambda i: (0, 0)),        # b2
            pl.BlockSpec((1, HIDDEN), lambda i: (0, 0)),        # w3 row (f32)
            pl.BlockSpec((1, OUT_PAD), lambda i: (0, 0)),       # b3 (replicated)
        ],
        out_specs=pl.BlockSpec((tm, OUT_PAD), lambda i: (i, 0)),
        compiler_params=pltpu.CompilerParams(
            dimension_semantics=("parallel",),
            vmem_limit_bytes=32 << 20),
        cost_estimate=pl.CostEstimate(
            flops=flops,
            transcendentals=np_ * OUT_PAD,
            bytes_accessed=bytes_accessed),
    )(xb, params["w1"], params["b1"], params["w2"], params["b2"],
      params["w3"], params["b3"])

    return out[:n, :1].astype(jnp.float32)


# ---------------------------- pure-JAX reference ------------------------------
def _reference_forward(params, x):
    kp = params["w1"].shape[0]
    xp = jnp.pad(x, ((0, 0), (0, kp - x.shape[1]))).astype(jnp.bfloat16)
    h1 = jnp.maximum(jnp.dot(xp, params["w1"],
                             preferred_element_type=jnp.float32)
                     + params["b1"], 0.0)
    h2 = jnp.maximum(jnp.dot(h1.astype(jnp.bfloat16), params["w2"],
                             preferred_element_type=jnp.float32)
                     + params["b2"], 0.0)
    z = jnp.sum(h2 * params["w3"], axis=-1, keepdims=True) + params["b3"][:, :1]
    return jax.nn.sigmoid(z)


# ----------------------------------- main -------------------------------------
if __name__ == "__main__":
    IN_FEATURE = 256
    params = build_params(IN_FEATURE, seed=0)
    x = jax.random.normal(jax.random.PRNGKey(0), (8, IN_FEATURE), jnp.float32)

    y = adversarial_network_forward(params, x)
    y = jax.block_until_ready(y)

    assert y.shape == (8, 1), y.shape
    assert bool(jnp.isfinite(y).all())
    assert bool(((y > 0.0) & (y < 1.0)).all())          # sigmoid range
    y_ref = _reference_forward(params, x)
    assert bool(jnp.allclose(y, y_ref, atol=2e-2)), float(
        jnp.max(jnp.abs(y - y_ref)))
    print("KERNEL_OK")
</pallas_src>

<mosaic_0001>
module attributes {stable_mosaic.version = 11 : i64} {
  func.func @_adv_mlp_kernel(%arg0: i32, %arg1: memref<8x256xbf16, #tpu.memory_space<vmem>>, %arg2: memref<256x1024xbf16, #tpu.memory_space<vmem>>, %arg3: memref<1x1024xf32, #tpu.memory_space<vmem>>, %arg4: memref<1024x1024xbf16, #tpu.memory_space<vmem>>, %arg5: memref<1x1024xf32, #tpu.memory_space<vmem>>, %arg6: memref<1x1024xf32, #tpu.memory_space<vmem>>, %arg7: memref<1x128xf32, #tpu.memory_space<vmem>>, %arg8: memref<8x128xbf16, #tpu.memory_space<vmem>>) attributes {dimension_semantics = [#tpu.dimension_semantics<parallel>], iteration_bounds = array<i64: 1>, scalar_prefetch = 0 : i64, scratch_operands = 0 : i64, tpu.core_type = #tpu.core_type<tc>, window_params = [{transform_indices = @transform_0, window_bounds = array<i64: 8, 256>}, {pipeline_mode = #tpu.pipeline_mode<synchronous>, transform_indices = @transform_1, window_bounds = array<i64: 256, 1024>}, {pipeline_mode = #tpu.pipeline_mode<synchronous>, transform_indices = @transform_2, window_bounds = array<i64: 1, 1024>}, {pipeline_mode = #tpu.pipeline_mode<synchronous>, transform_indices = @transform_3, window_bounds = array<i64: 1024, 1024>}, {pipeline_mode = #tpu.pipeline_mode<synchronous>, transform_indices = @transform_4, window_bounds = array<i64: 1, 1024>}, {pipeline_mode = #tpu.pipeline_mode<synchronous>, transform_indices = @transform_5, window_bounds = array<i64: 1, 1024>}, {pipeline_mode = #tpu.pipeline_mode<synchronous>, transform_indices = @transform_6, window_bounds = array<i64: 1, 128>}, {transform_indices = @transform_7, window_bounds = array<i64: 8, 128>}]} {
    %c0 = arith.constant 0 : index
    %c0_0 = arith.constant 0 : index
    %0 = vector.load %arg1[%c0, %c0_0] : memref<8x256xbf16, #tpu.memory_space<vmem>>, vector<8x256xbf16>
    %c0_1 = arith.constant 0 : index
    %c0_2 = arith.constant 0 : index
    %1 = vector.load %arg2[%c0_1, %c0_2] : memref<256x1024xbf16, #tpu.memory_space<vmem>>, vector<256x1024xbf16>
    %cst = arith.constant dense<0.000000e+00> : vector<8x1024xf32>
    %2 = tpu.matmul %0, %1, %cst {dimension_numbers = #tpu.dot_dimension_numbers<[1], [0], [0], [1], [0, 0, 1, 1], [], []>} : vector<8x256xbf16>, vector<256x1024xbf16>, vector<8x1024xf32> -> vector<8x1024xf32>
    %c0_3 = arith.constant 0 : index
    %c0_4 = arith.constant 0 : index
    %3 = vector.load %arg3[%c0_3, %c0_4] : memref<1x1024xf32, #tpu.memory_space<vmem>>, vector<1x1024xf32>
    %4 = vector.broadcast %3 : vector<1x1024xf32> to vector<8x1024xf32>
    %5 = arith.addf %2, %4 : vector<8x1024xf32>
    %cst_5 = arith.constant 0.000000e+00 : f32
    %6 = vector.broadcast %cst_5 : f32 to vector<8x1024xf32>
    %7 = arith.maximumf %5, %6 : vector<8x1024xf32>
    %8 = arith.truncf %7 : vector<8x1024xf32> to vector<8x1024xbf16>
    %c0_6 = arith.constant 0 : index
    %c0_7 = arith.constant 0 : index
    %9 = vector.load %arg4[%c0_6, %c0_7] : memref<1024x1024xbf16, #tpu.memory_space<vmem>>, vector<1024x1024xbf16>
    %cst_8 = arith.constant dense<0.000000e+00> : vector<8x1024xf32>
    %10 = tpu.matmul %8, %9, %cst_8 {dimension_numbers = #tpu.dot_dimension_numbers<[1], [0], [0], [1], [0, 0, 1, 1], [], []>} : vector<8x1024xbf16>, vector<1024x1024xbf16>, vector<8x1024xf32> -> vector<8x1024xf32>
    %c0_9 = arith.constant 0 : index
    %c0_10 = arith.constant 0 : index
    %11 = vector.load %arg5[%c0_9, %c0_10] : memref<1x1024xf32, #tpu.memory_space<vmem>>, vector<1x1024xf32>
    %12 = vector.broadcast %11 : vector<1x1024xf32> to vector<8x1024xf32>
    %13 = arith.addf %10, %12 : vector<8x1024xf32>
    %cst_11 = arith.constant 0.000000e+00 : f32
    %14 = vector.broadcast %cst_11 : f32 to vector<8x1024xf32>
    %15 = arith.maximumf %13, %14 : vector<8x1024xf32>
    %c0_12 = arith.constant 0 : index
    %c0_13 = arith.constant 0 : index
    %16 = vector.load %arg6[%c0_12, %c0_13] : memref<1x1024xf32, #tpu.memory_space<vmem>>, vector<1x1024xf32>
    %17 = vector.broadcast %16 : vector<1x1024xf32> to vector<8x1024xf32>
    %18 = arith.mulf %15, %17 : vector<8x1024xf32>
    %cst_14 = arith.constant dense<0.000000e+00> : vector<8xf32>
    %19 = vector.multi_reduction <add>, %18, %cst_14 [1] : vector<8x1024xf32> to vector<8xf32>
    %20 = vector.shape_cast %19 : vector<8xf32> to vector<8x1xf32>
    %c0_15 = arith.constant 0 : index
    %c0_16 = arith.constant 0 : index
    %21 = vector.load %arg7[%c0_15, %c0_16] : memref<1x128xf32, #tpu.memory_space<vmem>>, vector<1x128xf32>
    %22 = vector.broadcast %20 : vector<8x1xf32> to vector<8x128xf32>
    %23 = vector.broadcast %21 : vector<1x128xf32> to vector<8x128xf32>
    %24 = arith.addf %22, %23 : vector<8x128xf32>
    %cst_17 = arith.constant 5.000000e-01 : f32
    %25 = vector.broadcast %cst_17 : f32 to vector<8x128xf32>
    %26 = arith.mulf %25, %24 : vector<8x128xf32>
    %27 = math.tanh %26 : vector<8x128xf32>
    %cst_18 = arith.constant 1.000000e+00 : f32
    %28 = vector.broadcast %cst_18 : f32 to vector<8x128xf32>
    %29 = arith.addf %27, %28 : vector<8x128xf32>
    %cst_19 = arith.constant 5.000000e-01 : f32
    %30 = vector.broadcast %cst_19 : f32 to vector<8x128xf32>
    %31 = arith.mulf %30, %29 : vector<8x128xf32>
    %32 = arith.truncf %31 : vector<8x128xf32> to vector<8x128xbf16>
    %c0_20 = arith.constant 0 : index
    %c0_21 = arith.constant 0 : index
    %33 = vector.load %arg8[%c0_20, %c0_21] : memref<8x128xbf16, #tpu.memory_space<vmem>>, vector<8x128xbf16>
    tpu.vector_store %arg8[%c0_20, %c0_21], %32 {strides = array<i32>} : memref<8x128xbf16, #tpu.memory_space<vmem>>, vector<8x128xbf16>,
    return
  }
  func.func @transform_0(%arg0: i32) -> (i32, i32) {
    %c0_i32 = arith.constant 0 : i32
    %c0_i32_0 = arith.constant 0 : i32
    return %arg0, %c0_i32 : i32, i32
  }
  func.func @transform_1(%arg0: i32) -> (i32, i32) {
    %c0_i32 = arith.constant 0 : i32
    %c0_i32_0 = arith.constant 0 : i32
    %c0_i32_1 = arith.constant 0 : i32
    return %c0_i32, %c0_i32_0 : i32, i32
  }
  func.func @transform_2(%arg0: i32) -> (i32, i32) {
    %c0_i32 = arith.constant 0 : i32
    %c0_i32_0 = arith.constant 0 : i32
    %c0_i32_1 = arith.constant 0 : i32
    return %c0_i32, %c0_i32_0 : i32, i32
  }
  func.func @transform_3(%arg0: i32) -> (i32, i32) {
    %c0_i32 = arith.constant 0 : i32
    %c0_i32_0 = arith.constant 0 : i32
    %c0_i32_1 = arith.constant 0 : i32
    return %c0_i32, %c0_i32_0 : i32, i32
  }
  func.func @transform_4(%arg0: i32) -> (i32, i32) {
    %c0_i32 = arith.constant 0 : i32
    %c0_i32_0 = arith.constant 0 : i32
    %c0_i32_1 = arith.constant 0 : i32
    return %c0_i32, %c0_i32_0 : i32, i32
  }
  func.func @transform_5(%arg0: i32) -> (i32, i32) {
    %c0_i32 = arith.constant 0 : i32
    %c0_i32_0 = arith.constant 0 : i32
    %c0_i32_1 = arith.constant 0 : i32
    return %c0_i32, %c0_i32_0 : i32, i32
  }
  func.func @transform_6(%arg0: i32) -> (i32, i32) {
    %c0_i32 = arith.constant 0 : i32
    %c0_i32_0 = arith.constant 0 : i32
    %c0_i32_1 = arith.constant 0 : i32
    return %c0_i32, %c0_i32_0 : i32, i32
  }
  func.func @transform_7(%arg0: i32) -> (i32, i32) {
    %c0_i32 = arith.constant 0 : i32
    %c0_i32_0 = arith.constant 0 : i32
    return %arg0, %c0_i32 : i32, i32
  }
}

</mosaic_0001>

<bundles_post_ra>
// kernel: tpu_custom_call.1
= control target key start
LH: loop header
LB: loop body
LE: loop exit
PB: predicated region body
PF: predicated region fallthrough
CT: control target
= control target key end

     0   :  { %12 = vsyncpa [#allocation3], 0  ;;  %s6207_s0 = inlined_call_operand.hbm [shape: bf16[8,256], index: 0, kind: input, shape index: {}]   ;;  %s6208_s1 = inlined_call_operand.hbm [shape: bf16[256,1024], index: 1, kind: input, shape index: {}]   ;;  %s6209_s2 = inlined_call_operand.hbm [shape: f32[1,1024], index: 2, kind: input, shape index: {}]   ;;  %s6210_s3 = inlined_call_operand.hbm [shape: bf16[1024,1024], index: 3, kind: input, shape index: {}]   ;;  %s6211_s4 = inlined_call_operand.hbm [shape: f32[1,1024], index: 4, kind: input, shape index: {}]   ;;  %s6212_s5 = inlined_call_operand.hbm [shape: f32[1,1024], index: 5, kind: input, shape index: {}]   ;;  %s6213_s6 = inlined_call_operand.hbm [shape: f32[1,128], index: 6, kind: input, shape index: {}]   ;;  %s6214_s7 = inlined_call_operand.hbm [shape: bf16[8,128], index: 7, kind: output, shape index: {}]  }
   0x1   :  { %13 = vsyncpa [#allocation6], 0 }
   0x2   :  { %14 = vsyncpa [#allocation9], 0 }
   0x3   :  { %15 = vsyncpa [#allocation12], 0 }
   0x4   :  { %16 = vsyncpa [#allocation4], 0  ;;  %s5879_s24 = smov [#allocation5]   ;;  %s5693_s28 = scalar_lea.hbm %s6208_s1, 16384 }
   0x5   :  { %s32_s25 = sshll.u32 %s5879_s24, 4  ;;  %p5694_p0 = scmp.ne.s32.totalorder %s6208_s1, %s5693_s28  ;;  %s33_s25 = int_to_ptr.vmem [resolvable:$true] %s32_s25 }
   0x6   :  { %p5697_p1 = scmp.lt.u32.totalorder %s5693_s28, %s6208_s1 }
   0x8   :  { %p5699_p2 = pnand %p5697_p1, %p5694_p0 }
   0xa   :  { %5702 = shalt.err (!%p5699_p2)
}
   0xb   :  { %s5703_s10 = scalar_lea.vmem %s33_s25, 16384  ;;  %p5708_p4 = scmp.lt.s32.totalorder %s33_s25, %s33_s25 }
   0xc   :  { %p5704_p3 = scmp.ne.s32.totalorder %s33_s25, %s5703_s10  ;;  %p5709_p5 = scmp.lt.s32.totalorder %s5703_s10, %s5703_s10 }
   0xe   :  { %p5710_p6 = por %p5709_p5, %p5708_p4 }
  0x10   :  { %p5711_p7 = pnand %p5710_p6, %p5704_p3 }
  0x12   :  { %5714 = shalt.err (!%p5711_p7)
}
  0x13   :  { %s5880_s11 = smov 512   ;;  %s5881_s12 = smov 32  }
  0x14   :  { %38 = dma.hbm_to_vmem [thread:$0]  %s6208_s1, 16384, %s33_s25, [#allocation6], %s5880_s11, %s5880_s11, %s5881_s12  }
  0x15   :  { %s5882_s15 = smov [#allocation8]   ;;  %s5883_s17 = smov [#allocation11]  }
  0x16   :  { %s54_s16 = sshll.u32 %s5882_s15, 4  ;;  %s77_s18 = sshll.u32 %s5883_s17, 4  ;;  %s55_s16 = int_to_ptr.vmem [resolvable:$true] %s54_s16  ;;  %s78_s18 = int_to_ptr.vmem [resolvable:$true] %s77_s18 }
  0x17   :  { %s5715_s21 = scalar_lea.hbm %s6210_s3, 65536 }
  0x18   :  { %p5716_p8 = scmp.ne.s32.totalorder %s6210_s3, %s5715_s21  ;;  %p5719_p9 = scmp.lt.u32.totalorder %s5715_s21, %s6210_s3 }
  0x1a   :  { %p5721_p10 = pnand %p5719_p9, %p5716_p8 }
  0x1c   :  { %5724 = shalt.err (!%p5721_p10)
}
  0x1d   :  { %s5725_s1 = scalar_lea.vmem %s55_s16, 65536  ;;  %p5730_p12 = scmp.lt.s32.totalorder %s55_s16, %s55_s16 }
  0x1e   :  { %p5726_p11 = scmp.ne.s32.totalorder %s55_s16, %s5725_s1  ;;  %p5731_p13 = scmp.lt.s32.totalorder %s5725_s1, %s5725_s1 }
  0x20   :  { %p5732_p0 = por %p5731_p13, %p5730_p12 }
  0x22   :  { %p5733_p1 = pnand %p5732_p0, %p5726_p11 }
  0x24   :  { %5736 = shalt.err (!%p5733_p1)
}
  0x25   :  { %60 = dma.hbm_to_vmem [thread:$0]  %s6210_s3, 65536, %s55_s16, [#allocation9], %s5880_s11, %s5880_s11, %s5881_s12  }
  0x26   :  { %s5737_s30 = scalar_lea.hbm %s6212_s5, 128 }
  0x27   :  { %p5738_p2 = scmp.ne.s32.totalorder %s6212_s5, %s5737_s30  ;;  %p5741_p3 = scmp.lt.u32.totalorder %s5737_s30, %s6212_s5 }
  0x29   :  { %p5743_p4 = pnand %p5741_p3, %p5738_p2 }
  0x2b   :  { %5746 = shalt.err (!%p5743_p4)
}
  0x2c   :  { %s5747_s14 = scalar_lea.vmem %s78_s18, 128  ;;  %p5752_p6 = scmp.lt.s32.totalorder %s78_s18, %s78_s18 }
  0x2d   :  { %p5748_p5 = scmp.ne.s32.totalorder %s78_s18, %s5747_s14  ;;  %p5753_p7 = scmp.lt.s32.totalorder %s5747_s14, %s5747_s14 }
  0x2f   :  { %p5754_p8 = por %p5753_p7, %p5752_p6 }
  0x31   :  { %p5755_p9 = pnand %p5754_p8, %p5748_p5 }
  0x33   :  { %5758 = shalt.err (!%p5755_p9)
}
  0x34   :  { %80 = dma.hbm_to_vmem [thread:$0]  %s6212_s5, 128, %s78_s18, [#allocation12]  }
  0x35   :  { %s5884_s12 = smov [#allocation2]   ;;  %s5885_s16 = smov [#allocation7]  }
  0x36   :  { %s23_s15 = sshll.u32 %s5884_s12, 4  ;;  %s45_s17 = sshll.u32 %s5885_s16, 4  ;;  %s24_s15 = int_to_ptr.vmem [resolvable:$true] %s23_s15  ;;  %s46_s17 = int_to_ptr.vmem [resolvable:$true] %s45_s17 }
  0x37   :  { %s5759_s21 = scalar_lea.hbm %s6207_s0, 128 }
  0x38   :  { %p5760_p10 = scmp.ne.s32.totalorder %s6207_s0, %s5759_s21  ;;  %p5763_p11 = scmp.lt.u32.totalorder %s5759_s21, %s6207_s0 }
  0x3a   :  { %p5765_p12 = pnand %p5763_p11, %p5760_p10 }
  0x3c   :  { %5768 = shalt.err (!%p5765_p12)
}
  0x3d   :  { %s5769_s5 = scalar_lea.vmem %s24_s15, 128  ;;  %p5774_p0 = scmp.lt.s32.totalorder %s24_s15, %s24_s15 }
  0x3e   :  { %p5770_p13 = scmp.ne.s32.totalorder %s24_s15, %s5769_s5  ;;  %p5775_p1 = scmp.lt.s32.totalorder %s5769_s5, %s5769_s5 }
  0x40   :  { %p5776_p2 = por %p5775_p1, %p5774_p0 }
  0x42   :  { %p5777_p3 = pnand %p5776_p2, %p5770_p13 }
  0x44   :  { %5780 = shalt.err (!%p5777_p3)
}
  0x45   :  { %26 = dma.hbm_to_vmem [thread:$0]  %s6207_s0, 128, %s24_s15, [#allocation3]  }
  0x46   :  { %s5781_s28 = scalar_lea.hbm %s6209_s2, 128 }
  0x47   :  { %p5782_p4 = scmp.ne.s32.totalorder %s6209_s2, %s5781_s28  ;;  %p5785_p5 = scmp.lt.u32.totalorder %s5781_s28, %s6209_s2 }
  0x49   :  { %p5787_p6 = pnand %p5785_p5, %p5782_p4 }
  0x4b   :  { %5790 = shalt.err (!%p5787_p6)
}
  0x4c   :  { %s5791_s10 = scalar_lea.vmem %s46_s17, 128  ;;  %p5796_p8 = scmp.lt.s32.totalorder %s46_s17, %s46_s17 }
  0x4d   :  { %p5792_p7 = scmp.ne.s32.totalorder %s46_s17, %s5791_s10  ;;  %p5797_p9 = scmp.lt.s32.totalorder %s5791_s10, %s5791_s10 }
  0x4f   :  { %p5798_p10 = por %p5797_p9, %p5796_p8 }
  0x51   :  { %p5799_p11 = pnand %p5798_p10, %p5792_p7 }
  0x53   :  { %5802 = shalt.err (!%p5799_p11)
}
  0x54   :  { %48 = dma.hbm_to_vmem [thread:$0]  %s6209_s2, 128, %s46_s17, [#allocation6]  }
  0x55   :  { %s5886_s14 = smov [#allocation10]   ;;  %s5887_s11 = smov [#allocation13]  }
  0x56   :  { %s67_s3 = sshll.u32 %s5886_s14, 4  ;;  %s87_s12 = sshll.u32 %s5887_s11, 4  ;;  %s68_s3 = int_to_ptr.vmem [resolvable:$true] %s67_s3  ;;  %s88_s12 = int_to_ptr.vmem [resolvable:$true] %s87_s12 }
  0x57   :  { %s5803_s19 = scalar_lea.hbm %s6211_s4, 128 }
  0x58   :  { %p5804_p12 = scmp.ne.s32.totalorder %s6211_s4, %s5803_s19  ;;  %p5807_p13 = scmp.lt.u32.totalorder %s5803_s19, %s6211_s4 }
  0x5a   :  { %p5809_p0 = pnand %p5807_p13, %p5804_p12 }
  0x5c   :  { %5812 = shalt.err (!%p5809_p0)
}
  0x5d   :  { %s5813_s2 = scalar_lea.vmem %s68_s3, 128  ;;  %p5818_p2 = scmp.lt.s32.totalorder %s68_s3, %s68_s3 }
  0x5e   :  { %p5814_p1 = scmp.ne.s32.totalorder %s68_s3, %s5813_s2  ;;  %p5819_p3 = scmp.lt.s32.totalorder %s5813_s2, %s5813_s2 }
  0x60   :  { %p5820_p4 = por %p5819_p3, %p5818_p2 }
  0x62   :  { %p5821_p5 = pnand %p5820_p4, %p5814_p1 }
  0x64   :  { %5824 = shalt.err (!%p5821_p5)
}
  0x65   :  { %70 = dma.hbm_to_vmem [thread:$0]  %s6211_s4, 128, %s68_s3, [#allocation9]  }
  0x66   :  { %s5825_s18 = scalar_lea.hbm %s6213_s6, 16 }
  0x67   :  { %p5826_p6 = scmp.ne.s32.totalorder %s6213_s6, %s5825_s18  ;;  %p5829_p7 = scmp.lt.u32.totalorder %s5825_s18, %s6213_s6 }
  0x69   :  { %p5831_p8 = pnand %p5829_p7, %p5826_p6 }
  0x6b   :  { %5834 = shalt.err (!%p5831_p8)
}
  0x6c   :  { %s5835_s29 = scalar_lea.vmem %s88_s12, 16  ;;  %s5839_s30 = scalar_lea.vmem %s88_s12, 32 }
  0x6d   :  { %p5836_p9 = scmp.ne.s32.totalorder %s88_s12, %s5835_s29  ;;  %p5840_p10 = scmp.lt.s32.totalorder %s88_s12, %s88_s12 }
  0x6e   :  { %p5841_p11 = scmp.lt.s32.totalorder %s5839_s30, %s5835_s29 }
  0x70   :  { %p5842_p12 = por %p5841_p11, %p5840_p10 }
  0x72   :  { %p5843_p13 = pnand %p5842_p12, %p5836_p9 }
  0x74   :  { %5846 = shalt.err (!%p5843_p13)
}
  0x75   :  { %90 = dma.hbm_to_vmem [thread:$0]  %s6213_s6, 16, %s88_s12, [#allocation12]  }
  0x76   :  { %5869 = dma.done.wait [#allocation3], 128  }
  0x77   :  { %5870 = vsyncadd [#allocation3], 4294967168 }
  0x78   :  { %5871 = dma.done.wait [#allocation6], 16512  }
  0x79   :  { %5872 = vsyncadd [#allocation6], 4294950784 }
  0x7a   :  { %5873 = dma.done.wait [#allocation9], 65664  }
  0x7b   :  { %5874 = vsyncadd [#allocation9], 4294901632 }
  0x7c   :  { %5875 = dma.done.wait [#allocation12], 144  }
  0x7d   :  { %5876 = vsyncadd [#allocation12], 4294967152  ;;  %v113_v0 = vld [vmem:[#allocation5] sm:$0xff]  ;;  %v114_v17 = vld [vmem:[#allocation5 + $0x8] sm:$0xff]  ;;  %s5888_s6 = smov [#allocation14]  }
  0x7e   :  { %v117_v1 = vld [vmem:[#allocation5 + $0x20] sm:$0xff]  ;;  %v118_v18 = vld [vmem:[#allocation5 + $0x28] sm:$0xff]  ;;  %v6013_v19 = vld [vmem:[#allocation2] sm:$0xff]  ;;  %s4967_s9 = sshll.u32 %s5888_s6, 4  ;;  %s4968_s9 = int_to_ptr.vmem [resolvable:$true] %s4967_s9 }
  0x7f   :  { %v121_v2 = vld [vmem:[#allocation5 + $0x40] sm:$0xff]  ;;  %v4982_v3 = vcombine.high %v113_v0, %v117_v1  ;;  %v4981_v4 = vcombine.low %v113_v0, %v117_v1  ;;  %v122_v20 = vld [vmem:[#allocation5 + $0x48] sm:$0xff]  ;;  %v4984_v22 = vcombine.high %v114_v17, %v118_v18  ;;  %v4983_v23 = vcombine.low %v114_v17, %v118_v18  ;;  %s5847_s10 = scalar_lea.vmem %s4968_s9, 64  ;;  %p5852_p1 = scmp.lt.s32.totalorder %s4968_s9, %s4968_s9 }
  0x80   :  { %v125_v5 = vld [vmem:[#allocation5 + $0x60] sm:$0xff]  ;;  %v6017_v24 = vcombine.high %v6013_v19, %v6013_v19  ;;  %v126_v25 = vld [vmem:[#allocation5 + $0x68] sm:$0xff]  ;;  %p5848_p0 = scmp.ne.s32.totalorder %s4968_s9, %s5847_s10  ;;  %p5853_p2 = scmp.lt.s32.totalorder %s5847_s10, %s5847_s10 }
  0x81   :  { %v4990_v6 = vcombine.high %v121_v2, %v125_v5  ;;  %v129_v7 = vld [vmem:[#allocation5 + $0x80] sm:$0xff]  ;;  %930 = vmatprep.subr.bf16.mxu0 %v4982_v3  ;;  %v4989_v9 = vcombine.low %v121_v2, %v125_v5  ;;  %v4992_v27 = vcombine.high %v122_v20, %v126_v25  ;;  %v130_v28 = vld [vmem:[#allocation5 + $0x88] sm:$0xff]  ;;  %971 = vmatprep.subr.bf16.mxu1 %v4984_v22 }
  0x82   :  { %v133_v8 = vld [vmem:[#allocation5 + $0xa0] sm:$0xff]  ;;  %931 = vmatpush1.bf16.msra.mxu0 %v4981_v4  ;;  %v134_v29 = vld [vmem:[#allocation5 + $0xa8] sm:$0xff]  ;;  %962 = vmatprep.mubr.bf16.mxu0 %v6017_v24  ;;  %v4991_v32 = vcombine.low %v122_v20, %v126_v25  ;;  %p5854_p3 = por %p5853_p2, %p5852_p1 }
  0x83   :  { %932 = vmatprep.subr.bf16.mxu0 %v4990_v6  ;;  %v4998_v10 = vcombine.high %v129_v7, %v133_v8  ;;  %v137_v11 = vld [vmem:[#allocation5 + $0xc0] sm:$0xff]  ;;  %v4997_v13 = vcombine.low %v129_v7, %v133_v8  ;;  %972 = vmatpush1.bf16.msra.mxu1 %v4983_v23  ;;  %v5000_v34 = vcombine.high %v130_v28, %v134_v29  ;;  %v138_v36 = vld [vmem:[#allocation5 + $0xc8] sm:$0xff] }
  0x84   :  { %v141_v12 = vld [vmem:[#allocation5 + $0xe0] sm:$0xff]  ;;  %973 = vmatprep.subr.bf16.mxu1 %v4992_v27  ;;  %v142_v37 = vld [vmem:[#allocation5 + $0xe8] sm:$0xff]  ;;  %1003 = vmatprep.mubr.bf16.mxu1 %v6017_v24  ;;  %v4999_v40 = vcombine.low %v130_v28, %v134_v29  ;;  %p5855_p4 = pnand %p5854_p3, %p5848_p0 }
  0x85   :  { %v5006_v14 = vcombine.high %v137_v11, %v141_v12  ;;  %v145_v15 = vld [vmem:[#allocation5 + $0x100] sm:$0xff]  ;;  %v5005_v21 = vcombine.low %v137_v11, %v141_v12  ;;  %v5008_v42 = vcombine.high %v138_v36, %v142_v37  ;;  %v146_v44 = vld [vmem:[#allocation5 + $0x108] sm:$0xff]  ;;  %v5007_v48 = vcombine.low %v138_v36, %v142_v37 }
  0x86   :  { %933 = vmatpush1.bf16.msra.mxu0 %v4989_v9  ;;  %v149_v16 = vld [vmem:[#allocation5 + $0x120] sm:$0xff]  ;;  %v150_v45 = vld [vmem:[#allocation5 + $0x128] sm:$0xff] }
  0x87   :  { %934 = vmatprep.subr.bf16.mxu0 %v4998_v10  ;;  %v5014_v26 = vcombine.high %v145_v15, %v149_v16  ;;  %v153_v30 = vld [vmem:[#allocation5 + $0x140] sm:$0xff]  ;;  %v5013_v33 = vcombine.low %v145_v15, %v149_v16  ;;  %974 = vmatpush1.bf16.msra.mxu1 %v4991_v32  ;;  %v5016_v50 = vcombine.high %v146_v44, %v150_v45  ;;  %v154_v52 = vld [vmem:[#allocation5 + $0x148] sm:$0xff] }
  0x88   :  { %v157_v31 = vld [vmem:[#allocation5 + $0x160] sm:$0xff]  ;;  %975 = vmatprep.subr.bf16.mxu1 %v5000_v34  ;;  %v158_v53 = vld [vmem:[#allocation5 + $0x168] sm:$0xff]  ;;  %v5015_v56 = vcombine.low %v146_v44, %v150_v45 }
  0x89   :  { %v5022_v35 = vcombine.high %v153_v30, %v157_v31  ;;  %v161_v38 = vld [vmem:[#allocation5 + $0x180] sm:$0xff]  ;;  %v5021_v41 = vcombine.low %v153_v30, %v157_v31  ;;  %v5024_v58 = vcombine.high %v154_v52, %v158_v53  ;;  %v162_v60 = vld [vmem:[#allocation5 + $0x188] sm:$0xff]  ;;  %v5023_v0 = vcombine.low %v154_v52, %v158_v53 }
  0x8a   :  { %935 = vmatpush1.bf16.msra.mxu0 %v4997_v13  ;;  %v165_v39 = vld [vmem:[#allocation5 + $0x1a0] sm:$0xff]  ;;  %v166_v61 = vld [vmem:[#allocation5 + $0x1a8] sm:$0xff] }
  0x8b   :  { %936 = vmatprep.subr.bf16.mxu0 %v5006_v14  ;;  %v5030_v43 = vcombine.high %v161_v38, %v165_v39  ;;  %v169_v46 = vld [vmem:[#allocation5 + $0x1c0] sm:$0xff]  ;;  %976 = vmatpush1.bf16.msra.mxu1 %v4999_v40  ;;  %v5029_v49 = vcombine.low %v161_v38, %v165_v39  ;;  %v5032_v2 = vcombine.high %v162_v60, %v166_v61  ;;  %v170_v4 = vld [vmem:[#allocation5 + $0x1c8] sm:$0xff] }
  0x8c   :  { %v173_v47 = vld [vmem:[#allocation5 + $0x1e0] sm:$0xff]  ;;  %977 = vmatprep.subr.bf16.mxu1 %v5008_v42  ;;  %v174_v5 = vld [vmem:[#allocation5 + $0x1e8] sm:$0xff]  ;;  %v5031_v8 = vcombine.low %v162_v60, %v166_v61 }
  0x8d   :  { %v5038_v51 = vcombine.high %v169_v46, %v173_v47  ;;  %v177_v54 = vld [vmem:[#allocation5 + $0x200] sm:$0xff]  ;;  %v5037_v57 = vcombine.low %v169_v46, %v173_v47  ;;  %v5040_v10 = vcombine.high %v170_v4, %v174_v5  ;;  %v178_v12 = vld [vmem:[#allocation5 + $0x208] sm:$0xff]  ;;  %v5039_v16 = vcombine.low %v170_v4, %v174_v5 }
  0x8e   :  { %937 = vmatpush1.bf16.msra.mxu0 %v5005_v21  ;;  %v181_v55 = vld [vmem:[#allocation5 + $0x220] sm:$0xff]  ;;  %v182_v13 = vld [vmem:[#allocation5 + $0x228] sm:$0xff] }
  0x8f   :  { %938 = vmatprep.subr.bf16.mxu0 %v5014_v26  ;;  %978 = vmatpush1.bf16.msra.mxu1 %v5007_v48  ;;  %v5046_v59 = vcombine.high %v177_v54, %v181_v55  ;;  %v185_v62 = vld [vmem:[#allocation5 + $0x240] sm:$0xff]  ;;  %v5045_v1 = vcombine.low %v177_v54, %v181_v55  ;;  %v5048_v18 = vcombine.high %v178_v12, %v182_v13  ;;  %v186_v21 = vld [vmem:[#allocation5 + $0x248] sm:$0xff] }
  0x90   :  { %979 = vmatprep.subr.bf16.mxu1 %v5016_v50  ;;  %v189_v63 = vld [vmem:[#allocation5 + $0x260] sm:$0xff]  ;;  %v190_v22 = vld [vmem:[#allocation5 + $0x268] sm:$0xff]  ;;  %v5047_v26 = vcombine.low %v178_v12, %v182_v13 }
  0x91   :  { %v5054_v3 = vcombine.high %v185_v62, %v189_v63  ;;  %v193_v6 = vld [vmem:[#allocation5 + $0x280] sm:$0xff]  ;;  %v5053_v9 = vcombine.low %v185_v62, %v189_v63  ;;  %v5056_v28 = vcombine.high %v186_v21, %v190_v22  ;;  %v194_v30 = vld [vmem:[#allocation5 + $0x288] sm:$0xff]  ;;  %v5055_v34 = vcombine.low %v186_v21, %v190_v22 }
  0x92   :  { %939 = vmatpush1.bf16.msra.mxu0 %v5013_v33  ;;  %v197_v7 = vld [vmem:[#allocation5 + $0x2a0] sm:$0xff]  ;;  %v198_v31 = vld [vmem:[#allocation5 + $0x2a8] sm:$0xff] }
  0x93   :  { %940 = vmatprep.subr.bf16.mxu0 %v5022_v35  ;;  %980 = vmatpush1.bf16.msra.mxu1 %v5015_v56  ;;  %v5062_v11 = vcombine.high %v193_v6, %v197_v7  ;;  %v201_v14 = vld [vmem:[#allocation5 + $0x2c0] sm:$0xff]  ;;  %v5061_v17 = vcombine.low %v193_v6, %v197_v7  ;;  %v5064_v36 = vcombine.high %v194_v30, %v198_v31  ;;  %v202_v38 = vld [vmem:[#allocation5 + $0x2c8] sm:$0xff]  ;;  %v115_v56 = vld [vmem:[#allocation5 + $0x10] sm:$0xff] }
  0x94   :  { %981 = vmatprep.subr.bf16.mxu1 %v5024_v58  ;;  %v205_v15 = vld [vmem:[#allocation5 + $0x2e0] sm:$0xff]  ;;  %v206_v39 = vld [vmem:[#allocation5 + $0x2e8] sm:$0xff]  ;;  %v5063_v42 = vcombine.low %v194_v30, %v198_v31 }
  0x95   :  { %v5070_v20 = vcombine.high %v201_v14, %v205_v15  ;;  %v209_v23 = vld [vmem:[#allocation5 + $0x300] sm:$0xff]  ;;  %v5069_v27 = vcombine.low %v201_v14, %v205_v15  ;;  %v5072_v44 = vcombine.high %v202_v38, %v206_v39  ;;  %v210_v46 = vld [vmem:[#allocation5 + $0x308] sm:$0xff]  ;;  %v5071_v50 = vcombine.low %v202_v38, %v206_v39  ;;  %v116_v14 = vld [vmem:[#allocation5 + $0x18] sm:$0xff] }
  0x96   :  { %941 = vmatpush1.bf16.msra.mxu0 %v5021_v41  ;;  %v213_v25 = vld [vmem:[#allocation5 + $0x320] sm:$0xff]  ;;  %v214_v47 = vld [vmem:[#allocation5 + $0x328] sm:$0xff]  ;;  %v120_v15 = vld [vmem:[#allocation5 + $0x38] sm:$0xff] }
  0x97   :  { %942 = vmatprep.subr.bf16.mxu0 %v5030_v43  ;;  %982 = vmatpush1.bf16.msra.mxu1 %v5023_v0  ;;  %v5078_v29 = vcombine.high %v209_v23, %v213_v25  ;;  %v217_v32 = vld [vmem:[#allocation5 + $0x340] sm:$0xff]  ;;  %v5077_v35 = vcombine.low %v209_v23, %v213_v25  ;;  %v5080_v52 = vcombine.high %v210_v46, %v214_v47  ;;  %v218_v54 = vld [vmem:[#allocation5 + $0x348] sm:$0xff]  ;;  %v123_v0 = vld [vmem:[#allocation5 + $0x50] sm:$0xff] }
  0x98   :  { %983 = vmatprep.subr.bf16.mxu1 %v5032_v2  ;;  %v221_v33 = vld [vmem:[#allocation5 + $0x360] sm:$0xff]  ;;  %v222_v55 = vld [vmem:[#allocation5 + $0x368] sm:$0xff]  ;;  %v5079_v58 = vcombine.low %v210_v46, %v214_v47  ;;  %v6023_v2 = vcombine.low %v6013_v19, %v6013_v19  ;;  %v4988_v21 = vcombine.high %v116_v14, %v120_v15  ;;  %v124_v23 = vld [vmem:[#allocation5 + $0x58] sm:$0xff] }
  0x99   :  { %v5086_v37 = vcombine.high %v217_v32, %v221_v33  ;;  %v225_v40 = vld [vmem:[#allocation5 + $0x380] sm:$0xff]  ;;  %v5085_v43 = vcombine.low %v217_v32, %v221_v33  ;;  %v5088_v60 = vcombine.high %v218_v54, %v222_v55  ;;  %v226_v61 = vld [vmem:[#allocation5 + $0x388] sm:$0xff]  ;;  %v128_v25 = vld [vmem:[#allocation5 + $0x78] sm:$0xff] }
  0x9a   :  { %943 = vmatpush1.bf16.msra.mxu0 %v5029_v49  ;;  %v229_v41 = vld [vmem:[#allocation5 + $0x3a0] sm:$0xff]  ;;  %v230_v62 = vld [vmem:[#allocation5 + $0x3a8] sm:$0xff]  ;;  %v4996_v30 = vcombine.high %v124_v23, %v128_v25  ;;  %v132_v32 = vld [vmem:[#allocation5 + $0x98] sm:$0xff] }
  0x9b   :  { %944 = vmatprep.subr.bf16.mxu0 %v5038_v51  ;;  %984 = vmatpush1.bf16.msra.mxu1 %v5031_v8  ;;  %v5094_v45 = vcombine.high %v225_v40, %v229_v41  ;;  %v233_v48 = vld [vmem:[#allocation5 + $0x3c0] sm:$0xff]  ;;  %v5093_v51 = vcombine.low %v225_v40, %v229_v41  ;;  %v5096_v4 = vcombine.high %v226_v61, %v230_v62  ;;  %v234_v6 = vld [vmem:[#allocation5 + $0x3c8] sm:$0xff]  ;;  %v136_v33 = vld [vmem:[#allocation5 + $0xb8] sm:$0xff] }
  0x9c   :  { %985 = vmatprep.subr.bf16.mxu1 %v5040_v10  ;;  %v237_v49 = vld [vmem:[#allocation5 + $0x3e0] sm:$0xff]  ;;  %v238_v7 = vld [vmem:[#allocation5 + $0x3e8] sm:$0xff]  ;;  %v135_v10 = vld [vmem:[#allocation5 + $0xb0] sm:$0xff]  ;;  %v5004_v38 = vcombine.high %v132_v32, %v136_v33 }
  0x9d   :  { %v5102_v53 = vcombine.high %v233_v48, %v237_v49  ;;  %v5104_v12 = vcombine.high %v234_v6, %v238_v7  ;;  %v140_v40 = vld [vmem:[#allocation5 + $0xd8] sm:$0xff] }
  0x9e   :  { %945 = vmatpush1.bf16.msra.mxu0 %v5037_v57  ;;  %v119_v57 = vld [vmem:[#allocation5 + $0x30] sm:$0xff]  ;;  %v144_v41 = vld [vmem:[#allocation5 + $0xf8] sm:$0xff] }
  0x9f   :  { %946 = vmatprep.subr.bf16.mxu0 %v5046_v59  ;;  %986 = vmatpush1.bf16.msra.mxu1 %v5039_v16  ;;  %v5101_v59 = vcombine.low %v233_v48, %v237_v49  ;;  %v4986_v63 = vcombine.high %v115_v56, %v119_v57  ;;  %v4985_v5 = vcombine.low %v115_v56, %v119_v57  ;;  %v139_v16 = vld [vmem:[#allocation5 + $0xd0] sm:$0xff]  ;;  %v148_v48 = vld [vmem:[#allocation5 + $0x118] sm:$0xff] }
  0xa0   :  { %987 = vmatprep.subr.bf16.mxu1 %v5048_v18  ;;  %v5103_v18 = vcombine.low %v234_v6, %v238_v7  ;;  %v5012_v46 = vcombine.high %v140_v40, %v144_v41  ;;  %v171_v49 = vld [vmem:[#allocation5 + $0x1d0] sm:$0xff]  ;;  %v160_v56 = vld [vmem:[#allocation5 + $0x178] sm:$0xff] }
  0xa1   :  { %v179_v57 = vld [vmem:[#allocation5 + $0x210] sm:$0xff] }
  0xa2   :  { %947 = vmatpush1.bf16.msra.mxu0 %v5045_v1  ;;  %v127_v1 = vld [vmem:[#allocation5 + $0x70] sm:$0xff] }
  0xa3   :  { %948 = vmatprep.subr.bf16.mxu0 %v5054_v3  ;;  %988 = vmatpush1.bf16.msra.mxu1 %v5047_v26  ;;  %v5087_v3 = vcombine.low %v218_v54, %v222_v55  ;;  %v4994_v8 = vcombine.high %v123_v0, %v127_v1  ;;  %v4993_v19 = vcombine.low %v123_v0, %v127_v1  ;;  %v147_v26 = vld [vmem:[#allocation5 + $0x110] sm:$0xff]  ;;  %v156_v55 = vld [vmem:[#allocation5 + $0x158] sm:$0xff] }
  0xa4   :  { %989 = vmatprep.subr.bf16.mxu1 %v5056_v28  ;;  %v4987_v28 = vcombine.low %v116_v14, %v120_v15  ;;  %v168_v0 = vld [vmem:[#allocation5 + $0x1b8] sm:$0xff]  ;;  %v187_v1 = vld [vmem:[#allocation5 + $0x250] sm:$0xff] }
  0xa5   :  { %v180_v15 = vld [vmem:[#allocation5 + $0x218] sm:$0xff] }
  0xa6   :  { %949 = vmatpush1.bf16.msra.mxu0 %v5053_v9  ;;  %v131_v9 = vld [vmem:[#allocation5 + $0x90] sm:$0xff] }
  0xa7   :  { %950 = vmatprep.subr.bf16.mxu0 %v5062_v11  ;;  %990 = vmatpush1.bf16.msra.mxu1 %v5055_v34  ;;  %v5095_v11 = vcombine.low %v226_v61, %v230_v62  ;;  %v5002_v13 = vcombine.high %v131_v9, %v135_v10  ;;  %v155_v34 = vld [vmem:[#allocation5 + $0x150] sm:$0xff]  ;;  %v5028_v61 = vcombine.high %v156_v55, %v160_v56 }
  0xa8   :  { %991 = vmatprep.subr.bf16.mxu1 %v5064_v36  ;;  %v4995_v36 = vcombine.low %v124_v23, %v128_v25  ;;  %v188_v25 = vld [vmem:[#allocation5 + $0x258] sm:$0xff] }
  0xaa   :  { %951 = vmatpush1.bf16.msra.mxu0 %v5061_v17  ;;  %v143_v17 = vld [vmem:[#allocation5 + $0xf0] sm:$0xff] }
  0xab   :  { %952 = vmatprep.subr.bf16.mxu0 %v5070_v20  ;;  %992 = vmatpush1.bf16.msra.mxu1 %v5063_v42  ;;  %v5001_v20 = vcombine.low %v131_v9, %v135_v10  ;;  %v5010_v22 = vcombine.high %v139_v16, %v143_v17  ;;  %v163_v42 = vld [vmem:[#allocation5 + $0x190] sm:$0xff]  ;;  %v176_v9 = vld [vmem:[#allocation5 + $0x1f8] sm:$0xff] }
  0xac   :  { %993 = vmatprep.subr.bf16.mxu1 %v5072_v44  ;;  %v5003_v44 = vcombine.low %v132_v32, %v136_v33  ;;  %v195_v10 = vld [vmem:[#allocation5 + $0x290] sm:$0xff]  ;;  %v196_v33 = vld [vmem:[#allocation5 + $0x298] sm:$0xff] }
  0xae   :  { %953 = vmatpush1.bf16.msra.mxu0 %v5069_v27  ;;  %v151_v27 = vld [vmem:[#allocation5 + $0x130] sm:$0xff] }
  0xaf   :  { %954 = vmatprep.subr.bf16.mxu0 %v5078_v29  ;;  %994 = vmatpush1.bf16.msra.mxu1 %v5071_v50  ;;  %v5009_v29 = vcombine.low %v139_v16, %v143_v17  ;;  %v5018_v31 = vcombine.high %v147_v26, %v151_v27  ;;  %v175_v50 = vld [vmem:[#allocation5 + $0x1f0] sm:$0xff]  ;;  %v184_v16 = vld [vmem:[#allocation5 + $0x238] sm:$0xff] }
  0xb0   :  { %995 = vmatprep.subr.bf16.mxu1 %v5080_v52  ;;  %v5042_v54 = vcombine.high %v171_v49, %v175_v50  ;;  %v203_v17 = vld [vmem:[#allocation5 + $0x2d0] sm:$0xff] }
  0xb2   :  { %955 = vmatpush1.bf16.msra.mxu0 %v5077_v35  ;;  %v159_v35 = vld [vmem:[#allocation5 + $0x170] sm:$0xff] }
  0xb3   :  { %956 = vmatprep.subr.bf16.mxu0 %v5086_v37  ;;  %996 = vmatpush1.bf16.msra.mxu1 %v5079_v58  ;;  %v5017_v37 = vcombine.low %v147_v26, %v151_v27  ;;  %v5026_v39 = vcombine.high %v155_v34, %v159_v35  ;;  %v183_v58 = vld [vmem:[#allocation5 + $0x230] sm:$0xff]  ;;  %v192_v26 = vld [vmem:[#allocation5 + $0x278] sm:$0xff] }
  0xb4   :  { %997 = vmatprep.subr.bf16.mxu1 %v5088_v60  ;;  %v5041_v60 = vcombine.low %v171_v49, %v175_v50  ;;  %v5050_v62 = vcombine.high %v179_v57, %v183_v58  ;;  %v211_v27 = vld [vmem:[#allocation5 + $0x310] sm:$0xff]  ;;  %v216_v49 = vld [vmem:[#allocation5 + $0x338] sm:$0xff] }
  0xb5   :  { %v235_v50 = vld [vmem:[#allocation5 + $0x3d0] sm:$0xff] }
  0xb6   :  { %957 = vmatpush1.bf16.msra.mxu0 %v5085_v43  ;;  %v167_v43 = vld [vmem:[#allocation5 + $0x1b0] sm:$0xff] }
  0xb7   :  { %958 = vmatprep.subr.bf16.mxu0 %v5094_v45  ;;  %998 = vmatpush1.bf16.msra.mxu1 %v5087_v3  ;;  %v5025_v45 = vcombine.low %v155_v34, %v159_v35  ;;  %v5034_v47 = vcombine.high %v163_v42, %v167_v43  ;;  %v5033_v52 = vcombine.low %v163_v42, %v167_v43  ;;  %v191_v3 = vld [vmem:[#allocation5 + $0x270] sm:$0xff]  ;;  %v200_v34 = vld [vmem:[#allocation5 + $0x2b8] sm:$0xff] }
  0xb8   :  { %999 = vmatprep.subr.bf16.mxu1 %v5096_v4  ;;  %v5027_v4 = vcombine.low %v156_v55, %v160_v56  ;;  %v5058_v7 = vcombine.high %v187_v1, %v191_v3  ;;  %v219_v35 = vld [vmem:[#allocation5 + $0x350] sm:$0xff]  ;;  %v208_v42 = vld [vmem:[#allocation5 + $0x2f8] sm:$0xff] }
  0xb9   :  { %v227_v43 = vld [vmem:[#allocation5 + $0x390] sm:$0xff]  ;;  %v220_v56 = vld [vmem:[#allocation5 + $0x358] sm:$0xff] }
  0xba   :  { %959 = vmatpush1.bf16.msra.mxu0 %v5093_v51  ;;  %v5011_v51 = vcombine.low %v140_v40, %v144_v41  ;;  %v204_v41 = vld [vmem:[#allocation5 + $0x2d8] sm:$0xff] }
  0xbb   :  { %960 = vmatprep.subr.bf16.mxu0 %v5102_v53  ;;  %1000 = vmatpush1.bf16.msra.mxu1 %v5095_v11  ;;  %v199_v11 = vld [vmem:[#allocation5 + $0x2b0] sm:$0xff] }
  0xbc   :  { %1001 = vmatprep.subr.bf16.mxu1 %v5104_v12  ;;  %v5066_v14 = vcombine.high %v195_v10, %v199_v11 }
  0xbe   :  { %961 = vmatpush1.bf16.msra.mxu0 %v5101_v59 }
  0xbf   :  { %1012 = vmatprep.subr.bf16.mxu0 %v4986_v63  ;;  %1002 = vmatpush1.bf16.msra.mxu1 %v5103_v18  ;;  %v164_v63 = vld [vmem:[#allocation5 + $0x198] sm:$0xff]  ;;  %v207_v18 = vld [vmem:[#allocation5 + $0x2f0] sm:$0xff] }
  0xc0   :  { %1053 = vmatprep.subr.bf16.mxu1 %v4988_v21  ;;  %v5036_v6 = vcombine.high %v164_v63, %v168_v0  ;;  %v5035_v12 = vcombine.low %v164_v63, %v168_v0  ;;  %v5065_v21 = vcombine.low %v195_v10, %v199_v11  ;;  %v5074_v23 = vcombine.high %v203_v17, %v207_v18  ;;  %v228_v63 = vld [vmem:[#allocation5 + $0x398] sm:$0xff]  ;;  %v1126_v11 = vld [vmem:[#allocation8 + $0x80] sm:$0xff] }
  0xc1   :  { %963 = vmatmul.mubr.bf16.vlgmr.msra.gmra.mrb[0].mxu0 %v6023_v2  ;;  %v232_v0 = vld [vmem:[#allocation5 + $0x3b8] sm:$0xff] }
  0xc2   :  { %1013 = vmatpush1.bf16.msra.mxu0 %v4985_v5  ;;  %1044 = vmatprep.mubr.bf16.mxu0 %v6017_v24  ;;  %v5049_v5 = vcombine.low %v179_v57, %v183_v58  ;;  %v224_v57 = vld [vmem:[#allocation5 + $0x378] sm:$0xff]  ;;  %v1110_v58 = vld [vmem:[#allocation8] sm:$0xff] }
  0xc3   :  { %1014 = vmatprep.subr.bf16.mxu0 %v4994_v8  ;;  %1004 = vmatmul.mubr.bf16.vlgmr.msra.gmra.mrb[0].mxu1 %v6023_v2  ;;  %v172_v8 = vld [vmem:[#allocation5 + $0x1d8] sm:$0xff] }
  0xc4   :  { %1054 = vmatpush1.bf16.msra.mxu1 %v4987_v28  ;;  %1085 = vmatprep.mubr.bf16.mxu1 %v6017_v24  ;;  %v152_v24 = vld [vmem:[#allocation5 + $0x138] sm:$0xff]  ;;  %v215_v28 = vld [vmem:[#allocation5 + $0x330] sm:$0xff] }
  0xc5   :  { %1055 = vmatprep.subr.bf16.mxu1 %v4996_v30  ;;  %v5020_v53 = vcombine.high %v148_v48, %v152_v24  ;;  %v5019_v59 = vcombine.low %v148_v48, %v152_v24  ;;  %v5073_v30 = vcombine.low %v203_v17, %v207_v18  ;;  %v5082_v32 = vcombine.high %v211_v27, %v215_v28  ;;  %v212_v24 = vld [vmem:[#allocation5 + $0x318] sm:$0xff]  ;;  %v1134_v18 = vld [vmem:[#allocation8 + $0xc0] sm:$0xff] }
  0xc6   :  { %1015 = vmatpush1.bf16.msra.mxu0 %v4993_v19  ;;  %v5057_v19 = vcombine.low %v187_v1, %v191_v3  ;;  %v1118_v3 = vld [vmem:[#allocation8 + $0x40] sm:$0xff] }
  0xc7   :  { %1016 = vmatprep.subr.bf16.mxu0 %v5002_v13  ;;  %v5044_v13 = vcombine.high %v172_v8, %v176_v9 }
  0xc8   :  { %1056 = vmatpush1.bf16.msra.mxu1 %v4995_v36  ;;  %v223_v36 = vld [vmem:[#allocation5 + $0x370] sm:$0xff] }
  0xc9   :  { %1057 = vmatprep.subr.bf16.mxu1 %v5004_v38  ;;  %v5081_v38 = vcombine.low %v211_v27, %v215_v28  ;;  %v5090_v40 = vcombine.high %v219_v35, %v223_v36  ;;  %v1142_v28 = vld [vmem:[#allocation8 + $0x100] sm:$0xff] }
  0xca   :  { %1017 = vmatpush1.bf16.msra.mxu0 %v5001_v20  ;;  %v5043_v20 = vcombine.low %v172_v8, %v176_v9  ;;  %v236_v8 = vld [vmem:[#allocation5 + $0x3d8] sm:$0xff] }
  0xcb   :  { %1018 = vmatprep.subr.bf16.mxu0 %v5010_v22  ;;  %v5052_v22 = vcombine.high %v180_v15, %v184_v16  ;;  %v240_v9 = vld [vmem:[#allocation5 + $0x3f8] sm:$0xff] }
  0xcc   :  { %1058 = vmatpush1.bf16.msra.mxu1 %v5003_v44  ;;  %v231_v44 = vld [vmem:[#allocation5 + $0x3b0] sm:$0xff] }
  0xcd   :  { %1059 = vmatprep.subr.bf16.mxu1 %v5012_v46  ;;  %v5089_v46 = vcombine.low %v219_v35, %v223_v36  ;;  %v5098_v48 = vcombine.high %v227_v43, %v231_v44  ;;  %v1150_v36 = vld [vmem:[#allocation8 + $0x140] sm:$0xff] }
  0xce   :  { %1019 = vmatpush1.bf16.msra.mxu0 %v5009_v29  ;;  %v5051_v29 = vcombine.low %v180_v15, %v184_v16  ;;  %v1111_v15 = vld [vmem:[#allocation8 + $0x8] sm:$0xff] }
  0xcf   :  { %1020 = vmatprep.subr.bf16.mxu0 %v5018_v31  ;;  %v5060_v31 = vcombine.high %v188_v25, %v192_v26  ;;  %v1115_v16 = vld [vmem:[#allocation8 + $0x28] sm:$0xff] }
  0xd0   :  { %1060 = vmatpush1.bf16.msra.mxu1 %v5011_v51  ;;  %v239_v51 = vld [vmem:[#allocation5 + $0x3f0] sm:$0xff] }
  0xd1   :  { %1061 = vmatprep.subr.bf16.mxu1 %v5020_v53  ;;  %v5097_v53 = vcombine.low %v227_v43, %v231_v44  ;;  %v5106_v55 = vcombine.high %v235_v50, %v239_v51  ;;  %v1158_v44 = vld [vmem:[#allocation8 + $0x180] sm:$0xff] }
  0xd2   :  { %1021 = vmatpush1.bf16.msra.mxu0 %v5017_v37  ;;  %v5059_v37 = vcombine.low %v188_v25, %v192_v26  ;;  %v1119_v25 = vld [vmem:[#allocation8 + $0x48] sm:$0xff] }
  0xd3   :  { %1022 = vmatprep.subr.bf16.mxu0 %v5026_v39  ;;  %v5068_v39 = vcombine.high %v196_v33, %v200_v34  ;;  %v1123_v26 = vld [vmem:[#allocation8 + $0x68] sm:$0xff] }
  0xd4   :  { %1062 = vmatpush1.bf16.msra.mxu1 %v5019_v59  ;;  %v1114_v59 = vld [vmem:[#allocation8 + $0x20] sm:$0xff] }
  0xd5   :  { %1063 = vmatprep.subr.bf16.mxu1 %v5028_v61  ;;  %v5105_v61 = vcombine.low %v235_v50, %v239_v51  ;;  %v5110_v1 = vcombine.high %v1110_v58, %v1114_v59  ;;  %v1166_v50 = vld [vmem:[#allocation8 + $0x1c0] sm:$0xff] }
  0xd6   :  { %1023 = vmatpush1.bf16.msra.mxu0 %v5025_v45  ;;  %v5067_v45 = vcombine.low %v196_v33, %v200_v34  ;;  %v1127_v33 = vld [vmem:[#allocation8 + $0x88] sm:$0xff]  ;;  %v1170_v51 = vld [vmem:[#allocation8 + $0x1e0] sm:$0xff] }
  0xd7   :  { %1024 = vmatprep.subr.bf16.mxu0 %v5034_v47  ;;  %v5076_v47 = vcombine.high %v204_v41, %v208_v42  ;;  %v1131_v34 = vld [vmem:[#allocation8 + $0xa8] sm:$0xff] }
  0xd8   :  { %1064 = vmatpush1.bf16.msra.mxu1 %v5027_v4  ;;  %v1122_v4 = vld [vmem:[#allocation8 + $0x60] sm:$0xff] }
  0xd9   :  { %1065 = vmatprep.subr.bf16.mxu1 %v5036_v6  ;;  %v5100_v6 = vcombine.high %v228_v63, %v232_v0  ;;  %v5118_v10 = vcombine.high %v1118_v3, %v1122_v4 }
  0xda   :  { %1025 = vmatpush1.bf16.msra.mxu0 %v5033_v52  ;;  %v5075_v52 = vcombine.low %v204_v41, %v208_v42  ;;  %v1135_v41 = vld [vmem:[#allocation8 + $0xc8] sm:$0xff] }
  0xdb   :  { %1026 = vmatprep.subr.bf16.mxu0 %v5042_v54  ;;  %v5084_v54 = vcombine.high %v212_v24, %v216_v49  ;;  %v1139_v42 = vld [vmem:[#allocation8 + $0xe8] sm:$0xff] }
  0xdc   :  { %1066 = vmatpush1.bf16.msra.mxu1 %v5035_v12  ;;  %v1130_v12 = vld [vmem:[#allocation8 + $0xa0] sm:$0xff] }
  0xdd   :  { %1067 = vmatprep.subr.bf16.mxu1 %v5044_v13  ;;  %v5108_v13 = vcombine.high %v236_v8, %v240_v9  ;;  %v5126_v17 = vcombine.high %v1126_v11, %v1130_v12 }
  0xde   :  { %1027 = vmatpush1.bf16.msra.mxu0 %v5041_v60  ;;  %v5083_v60 = vcombine.low %v212_v24, %v216_v49  ;;  %v1147_v24 = vld [vmem:[#allocation8 + $0x128] sm:$0xff] }
  0xdf   :  { %1028 = vmatprep.subr.bf16.mxu0 %v5050_v62  ;;  %v5092_v62 = vcombine.high %v220_v56, %v224_v57 }
  0xe0   :  { %1068 = vmatpush1.bf16.msra.mxu1 %v5043_v20  ;;  %v1138_v20 = vld [vmem:[#allocation8 + $0xe0] sm:$0xff] }
  0xe1   :  { %1069 = vmatprep.subr.bf16.mxu1 %v5052_v22  ;;  %v5112_v22 = vcombine.high %v1111_v15, %v1115_v16  ;;  %v5134_v27 = vcombine.high %v1134_v18, %v1138_v20 }
  0xe2   :  { %1029 = vmatpush1.bf16.msra.mxu0 %v5049_v5  ;;  %v5091_v5 = vcombine.low %v220_v56, %v224_v57  ;;  %v1155_v56 = vld [vmem:[#allocation8 + $0x168] sm:$0xff]  ;;  %v5166_v57 = vcombine.high %v1166_v50, %v1170_v51 }
  0xe3   :  { %1030 = vmatprep.subr.bf16.mxu0 %v5058_v7  ;;  %v5109_v7 = vcombine.low %v1110_v58, %v1114_v59  ;;  %v1174_v58 = vld [vmem:[#allocation8 + $0x200] sm:$0xff] }
  0xe4   :  { %1070 = vmatpush1.bf16.msra.mxu1 %v5051_v29  ;;  %v1146_v29 = vld [vmem:[#allocation8 + $0x120] sm:$0xff] }
  0xe5   :  { %1071 = vmatprep.subr.bf16.mxu1 %v5060_v31  ;;  %v5120_v31 = vcombine.high %v1119_v25, %v1123_v26  ;;  %v5142_v35 = vcombine.high %v1142_v28, %v1146_v29  ;;  %v1178_v59 = vld [vmem:[#allocation8 + $0x220] sm:$0xff] }
  0xe6   :  { %1031 = vmatpush1.bf16.msra.mxu0 %v5057_v19  ;;  %v5099_v19 = vcombine.low %v228_v63, %v232_v0  ;;  %v6035_v63 = vld [vmem:[#allocation8 + $0x408] sm:$0xff] }
  0xe7   :  { %1032 = vmatprep.subr.bf16.mxu0 %v5066_v14  ;;  %v5117_v14 = vcombine.low %v1118_v3, %v1122_v4  ;;  %v6037_v3 = vld [vmem:[#allocation8 + $0x428] sm:$0xff] }
  0xe8   :  { %1072 = vmatpush1.bf16.msra.mxu1 %v5059_v37  ;;  %v1154_v37 = vld [vmem:[#allocation8 + $0x160] sm:$0xff]  ;;  %v1159_v4 = vld [vmem:[#allocation8 + $0x188] sm:$0xff] }
  0xe9   :  { %1073 = vmatprep.subr.bf16.mxu1 %v5068_v39  ;;  %v5128_v39 = vcombine.high %v1127_v33, %v1131_v34  ;;  %v5150_v43 = vcombine.high %v1150_v36, %v1154_v37 }
  0xea   :  { %1033 = vmatpush1.bf16.msra.mxu0 %v5065_v21  ;;  %v5107_v21 = vcombine.low %v236_v8, %v240_v9  ;;  %v5239_v8 = vcombine.low %v6035_v63, %v6037_v3  ;;  %v1182_v9 = vld [vmem:[#allocation8 + $0x240] sm:$0xff] }
  0xeb   :  { %1034 = vmatprep.subr.bf16.mxu0 %v5074_v23  ;;  %v5125_v23 = vcombine.low %v1126_v11, %v1130_v12 }
  0xec   :  { %1074 = vmatpush1.bf16.msra.mxu1 %v5067_v45  ;;  %v1162_v45 = vld [vmem:[#allocation8 + $0x1a0] sm:$0xff] }
  0xed   :  { %1075 = vmatprep.subr.bf16.mxu1 %v5076_v47  ;;  %v5136_v47 = vcombine.high %v1135_v41, %v1139_v42  ;;  %v5158_v49 = vcombine.high %v1158_v44, %v1162_v45 }
  0xee   :  { %1035 = vmatpush1.bf16.msra.mxu0 %v5073_v30  ;;  %v5111_v30 = vcombine.low %v1111_v15, %v1115_v16  ;;  %v1190_v16 = vld [vmem:[#allocation8 + $0x280] sm:$0xff] }
  0xef   :  { %1036 = vmatprep.subr.bf16.mxu0 %v5082_v32  ;;  %v5133_v32 = vcombine.low %v1134_v18, %v1138_v20 }
  0xf0   :  { %1076 = vmatpush1.bf16.msra.mxu1 %v5075_v52  ;;  %v5135_v52 = vcombine.low %v1135_v41, %v1139_v42  ;;  %v1214_v42 = vld [vmem:[#allocation8 + $0x340] sm:$0xff] }
  0xf1   :  { %1077 = vmatprep.subr.bf16.mxu1 %v5084_v54  ;;  %v5157_v54 = vcombine.low %v1158_v44, %v1162_v45 }
  0xf2   :  { %1037 = vmatpush1.bf16.msra.mxu0 %v5081_v38  ;;  %v5119_v38 = vcombine.low %v1119_v25, %v1123_v26  ;;  %v1198_v26 = vld [vmem:[#allocation8 + $0x2c0] sm:$0xff] }
  0xf3   :  { %1038 = vmatprep.subr.bf16.mxu0 %v5090_v40  ;;  %v5141_v40 = vcombine.low %v1142_v28, %v1146_v29 }
  0xf4   :  { %1078 = vmatpush1.bf16.msra.mxu1 %v5083_v60 }
  0xf5   :  { %1079 = vmatprep.subr.bf16.mxu1 %v5092_v62  ;;  %v6033_v62 = vld [vmem:[#allocation8 + $0x420] sm:$0xff] }
  0xf6   :  { %1039 = vmatpush1.bf16.msra.mxu0 %v5089_v46  ;;  %v5127_v46 = vcombine.low %v1127_v33, %v1131_v34  ;;  %v1206_v34 = vld [vmem:[#allocation8 + $0x300] sm:$0xff] }
  0xf7   :  { %1040 = vmatprep.subr.bf16.mxu0 %v5098_v48  ;;  %v1143_v48 = vld [vmem:[#allocation8 + $0x108] sm:$0xff] }
  0xf8   :  { %1080 = vmatpush1.bf16.msra.mxu1 %v5091_v5  ;;  %v5143_v60 = vcombine.low %v1143_v48, %v1147_v24  ;;  %v1163_v5 = vld [vmem:[#allocation8 + $0x1a8] sm:$0xff] }
  0xf9   :  { %1081 = vmatprep.subr.bf16.mxu1 %v5100_v6  ;;  %v5174_v6 = vcombine.high %v1174_v58, %v1178_v59  ;;  %v5160_v12 = vcombine.high %v1159_v4, %v1163_v5  ;;  %v5159_v18 = vcombine.low %v1159_v4, %v1163_v5 }
  0xfa   :  { %1041 = vmatpush1.bf16.msra.mxu0 %v5097_v53  ;;  %v5144_v53 = vcombine.high %v1143_v48, %v1147_v24  ;;  %v1222_v24 = vld [vmem:[#allocation8 + $0x380] sm:$0xff] }
  0xfb   :  { %1042 = vmatprep.subr.bf16.mxu0 %v5106_v55  ;;  %v1151_v55 = vld [vmem:[#allocation8 + $0x148] sm:$0xff] }
  0xfc   :  { %1082 = vmatpush1.bf16.msra.mxu1 %v5099_v19  ;;  %v5152_v0 = vcombine.high %v1151_v55, %v1155_v56  ;;  %v5151_v11 = vcombine.low %v1151_v55, %v1155_v56  ;;  %v5173_v19 = vcombine.low %v1174_v58, %v1178_v59  ;;  %v1230_v56 = vld [vmem:[#allocation8 + $0x3c0] sm:$0xff] }
  0xfd   :  { %1083 = vmatprep.subr.bf16.mxu1 %v5108_v13  ;;  %v1167_v13 = vld [vmem:[#allocation8 + $0x1c8] sm:$0xff] }
  0xfe   :  { %1043 = vmatpush1.bf16.msra.mxu0 %v5105_v61  ;;  %v6031_v61 = vld [vmem:[#allocation8 + $0x400] sm:$0xff] }
  0xff   :  { %4224 = vmatprep.subr.bf16.mxu0 %v5110_v1  ;;  %v5165_v1 = vcombine.low %v1166_v50, %v1170_v51 }
 0x100   :  { %1084 = vmatpush1.bf16.msra.mxu1 %v5107_v21 }
 0x101   :  { %1045 = vmatmul.mubr.bf16.vlgmr.msra.gmra.mrb[4].mxu0 %v6023_v2  ;;  %4388 = vmatprep.subr.bf16.mxu1 %v5112_v22  ;;  %v1175_v22 = vld [vmem:[#allocation8 + $0x208] sm:$0xff] }
 0x102   :  { %4225 = vmatpush1.bf16.msra.mxu0 %v5109_v7  ;;  %v5237_v7 = vcombine.low %v6031_v61, %v6033_v62 }
 0x103   :  { %4226 = vmatprep.subr.bf16.mxu0 %v5118_v10  ;;  %1086 = vmatmul.mubr.bf16.vlgmr.msra.gmra.mrb[4].mxu1 %v6023_v2  ;;  %v5149_v2 = vcombine.low %v1150_v36, %v1154_v37  ;;  %v1186_v10 = vld [vmem:[#allocation8 + $0x260] sm:$0xff] }
 0x104   :  { %4389 = vmatpush1.bf16.msra.mxu1 %v5111_v30  ;;  %v5182_v15 = vcombine.high %v1182_v9, %v1186_v10  ;;  %v5181_v21 = vcombine.low %v1182_v9, %v1186_v10  ;;  %v1223_v10 = vld [vmem:[#allocation8 + $0x388] sm:$0xff] }
 0x105   :  { %4390 = vmatprep.subr.bf16.mxu1 %v5120_v31  ;;  %v1183_v31 = vld [vmem:[#allocation8 + $0x248] sm:$0xff] }
 0x106   :  { %4227 = vmatpush1.bf16.msra.mxu0 %v5117_v14  ;;  %v1171_v14 = vld [vmem:[#allocation8 + $0x1e8] sm:$0xff] }
 0x107   :  { %4228 = vmatprep.subr.bf16.mxu0 %v5126_v17  ;;  %v1194_v17 = vld [vmem:[#allocation8 + $0x2a0] sm:$0xff]  ;;  %v5168_v20 = vcombine.high %v1167_v13, %v1171_v14  ;;  %v5167_v28 = vcombine.low %v1167_v13, %v1171_v14  ;;  %v1231_v14 = vld [vmem:[#allocation8 + $0x3c8] sm:$0xff] }
 0x108   :  { %4391 = vmatpush1.bf16.msra.mxu1 %v5119_v38  ;;  %v5190_v25 = vcombine.high %v1190_v16, %v1194_v17  ;;  %v5189_v30 = vcombine.low %v1190_v16, %v1194_v17 }
 0x109   :  { %4392 = vmatprep.subr.bf16.mxu1 %v5128_v39  ;;  %v1191_v39 = vld [vmem:[#allocation8 + $0x288] sm:$0xff] }
 0x10a   :  { %4229 = vmatpush1.bf16.msra.mxu0 %v5125_v23  ;;  %v1179_v23 = vld [vmem:[#allocation8 + $0x228] sm:$0xff] }
 0x10b   :  { %4230 = vmatprep.subr.bf16.mxu0 %v5134_v27  ;;  %v1202_v27 = vld [vmem:[#allocation8 + $0x2e0] sm:$0xff]  ;;  %v5176_v29 = vcombine.high %v1175_v22, %v1179_v23  ;;  %v5175_v36 = vcombine.low %v1175_v22, %v1179_v23 }
 0x10c   :  { %4393 = vmatpush1.bf16.msra.mxu1 %v5127_v46  ;;  %v5198_v33 = vcombine.high %v1198_v26, %v1202_v27  ;;  %v5197_v38 = vcombine.low %v1198_v26, %v1202_v27 }
 0x10d   :  { %4394 = vmatprep.subr.bf16.mxu1 %v5136_v47  ;;  %v1199_v47 = vld [vmem:[#allocation8 + $0x2c8] sm:$0xff] }
 0x10e   :  { %4231 = vmatpush1.bf16.msra.mxu0 %v5133_v32  ;;  %v1187_v32 = vld [vmem:[#allocation8 + $0x268] sm:$0xff] }
 0x10f   :  { %4232 = vmatprep.subr.bf16.mxu0 %v5142_v35  ;;  %v1210_v35 = vld [vmem:[#allocation8 + $0x320] sm:$0xff]  ;;  %v5184_v37 = vcombine.high %v1183_v31, %v1187_v32  ;;  %v5183_v44 = vcombine.low %v1183_v31, %v1187_v32 }
 0x110   :  { %4395 = vmatpush1.bf16.msra.mxu1 %v5135_v52  ;;  %v5206_v41 = vcombine.high %v1206_v34, %v1210_v35  ;;  %v5205_v46 = vcombine.low %v1206_v34, %v1210_v35 }
 0x111   :  { %4396 = vmatprep.subr.bf16.mxu1 %v5144_v53  ;;  %v1207_v53 = vld [vmem:[#allocation8 + $0x308] sm:$0xff] }
 0x112   :  { %4233 = vmatpush1.bf16.msra.mxu0 %v5141_v40  ;;  %v1195_v40 = vld [vmem:[#allocation8 + $0x2a8] sm:$0xff] }
 0x113   :  { %4234 = vmatprep.subr.bf16.mxu0 %v5150_v43  ;;  %v1218_v43 = vld [vmem:[#allocation8 + $0x360] sm:$0xff]  ;;  %v5192_v45 = vcombine.high %v1191_v39, %v1195_v40  ;;  %v5191_v50 = vcombine.low %v1191_v39, %v1195_v40  ;;  %v1247_v39 = vld [vmem:[#allocation8 + $0x448] sm:$0xff] }
 0x114   :  { %4397 = vmatpush1.bf16.msra.mxu1 %v5143_v60  ;;  %v5214_v48 = vcombine.high %v1214_v42, %v1218_v43  ;;  %v5213_v52 = vcombine.low %v1214_v42, %v1218_v43  ;;  %v1251_v40 = vld [vmem:[#allocation8 + $0x468] sm:$0xff] }
 0x115   :  { %4398 = vmatprep.subr.bf16.mxu1 %v5152_v0  ;;  %v1215_v0 = vld [vmem:[#allocation8 + $0x348] sm:$0xff] }
 0x116   :  { %4235 = vmatpush1.bf16.msra.mxu0 %v5149_v2  ;;  %v1203_v2 = vld [vmem:[#allocation8 + $0x2e8] sm:$0xff] }
 0x117   :  { %4236 = vmatprep.subr.bf16.mxu0 %v5158_v49  ;;  %v1226_v49 = vld [vmem:[#allocation8 + $0x3a0] sm:$0xff]  ;;  %v5200_v51 = vcombine.high %v1199_v47, %v1203_v2  ;;  %v5199_v58 = vcombine.low %v1199_v47, %v1203_v2  ;;  %v1255_v2 = vld [vmem:[#allocation8 + $0x488] sm:$0xff] }
 0x118   :  { %4399 = vmatpush1.bf16.msra.mxu1 %v5151_v11  ;;  %v5222_v55 = vcombine.high %v1222_v24, %v1226_v49  ;;  %v5221_v60 = vcombine.low %v1222_v24, %v1226_v49  ;;  %v1227_v11 = vld [vmem:[#allocation8 + $0x3a8] sm:$0xff]  ;;  %v1258_v47 = vld [vmem:[#allocation8 + $0x4a0] sm:$0xff] }
 0x119   :  { %4400 = vmatprep.subr.bf16.mxu1 %v5160_v12  ;;  %v5238_v12 = vcombine.high %v6031_v61, %v6033_v62  ;;  %v5224_v13 = vcombine.high %v1223_v10, %v1227_v11  ;;  %v5223_v16 = vcombine.low %v1223_v10, %v1227_v11 }
 0x11a   :  { %4237 = vmatpush1.bf16.msra.mxu0 %v5157_v54  ;;  %v1211_v54 = vld [vmem:[#allocation8 + $0x328] sm:$0xff] }
 0x11b   :  { %4238 = vmatprep.subr.bf16.mxu0 %v5166_v57  ;;  %v1234_v57 = vld [vmem:[#allocation8 + $0x3e0] sm:$0xff]  ;;  %v5208_v59 = vcombine.high %v1207_v53, %v1211_v54  ;;  %v5207_v5 = vcombine.low %v1207_v53, %v1211_v54 }
 0x11c   :  { %4401 = vmatpush1.bf16.msra.mxu1 %v5159_v18  ;;  %v5230_v4 = vcombine.high %v1230_v56, %v1234_v57  ;;  %v5229_v9 = vcombine.low %v1230_v56, %v1234_v57  ;;  %v1262_v53 = vld [vmem:[#allocation8 + $0x4c0] sm:$0xff]  ;;  %v1263_v56 = vld [vmem:[#allocation8 + $0x4c8] sm:$0xff] }
 0x11d   :  { %4402 = vmatprep.subr.bf16.mxu1 %v5168_v20  ;;  %v5240_v20 = vcombine.high %v6035_v63, %v6037_v3  ;;  %v1267_v57 = vld [vmem:[#allocation8 + $0x4e8] sm:$0xff] }
 0x11e   :  { %4239 = vmatpush1.bf16.msra.mxu0 %v5165_v1  ;;  %v1219_v1 = vld [vmem:[#allocation8 + $0x368] sm:$0xff]  ;;  %v5263_v10 = vcombine.low %v1263_v56, %v1267_v57 }
 0x11f   :  { %4240 = vmatprep.subr.bf16.mxu0 %v5174_v6  ;;  %v5216_v6 = vcombine.high %v1215_v0, %v1219_v1 }
 0x120   :  { %4403 = vmatpush1.bf16.msra.mxu1 %v5167_v28 }
 0x121   :  { %4404 = vmatprep.subr.bf16.mxu1 %v5176_v29 }
 0x122   :  { %4241 = vmatpush1.bf16.msra.mxu0 %v5173_v19  ;;  %v5215_v19 = vcombine.low %v1215_v0, %v1219_v1  ;;  %v1274_v1 = vld [vmem:[#allocation8 + $0x520] sm:$0xff] }
 0x123   :  { %4242 = vmatprep.subr.bf16.mxu0 %v5182_v15  ;;  %v1235_v15 = vld [vmem:[#allocation8 + $0x3e8] sm:$0xff] }
 0x124   :  { %4405 = vmatpush1.bf16.msra.mxu1 %v5175_v36  ;;  %v5232_v17 = vcombine.high %v1231_v14, %v1235_v15  ;;  %v5231_v18 = vcombine.low %v1231_v14, %v1235_v15  ;;  %v1246_v36 = vld [vmem:[#allocation8 + $0x440] sm:$0xff]  ;;  %v1279_v14 = vld [vmem:[#allocation8 + $0x548] sm:$0xff] }
 0x125   :  { %4406 = vmatprep.subr.bf16.mxu1 %v5184_v37  ;;  %v1283_v15 = vld [vmem:[#allocation8 + $0x568] sm:$0xff] }
 0x126   :  { %4243 = vmatpush1.bf16.msra.mxu0 %v5181_v21  ;;  %v243_v21 = vlaneseq }
 0x127   :  { %4244 = vmatprep.subr.bf16.mxu0 %v5190_v25  ;;  %v6052_v25 = vld [vmem:[#allocation7] sm:$0xff] }
 0x128   :  { %4407 = vmatpush1.bf16.msra.mxu1 %v5183_v44  ;;  %v6047_v22 = vshrl.u32 %v243_v21, 7  ;;  %v1286_v21 = vld [vmem:[#allocation8 + $0x580] sm:$0xff] }
 0x129   :  { %4408 = vmatprep.subr.bf16.mxu1 %v5192_v45  ;;  %v5248_v45 = vcombine.high %v1247_v39, %v1251_v40 }
 0x12a   :  { %4245 = vmatpush1.bf16.msra.mxu0 %v5189_v30  ;;  %v6050_v23 = vsub.s32 0, %v6047_v22  ;;  %v6055_v26 = vsub.s32 1, %v6047_v22 }
 0x12b   :  { %4246 = vmatprep.subr.bf16.mxu0 %v5198_v33 }
 0x12c   :  { %4409 = vmatpush1.bf16.msra.mxu1 %v5191_v50  ;;  %v246_v27 = vrot.slane %v6052_v25, %v6050_v23  ;;  %v250_v28 = vrot.slane %v6052_v25, %v6055_v26  ;;  %v5247_v50 = vcombine.low %v1247_v39, %v1251_v40 }
 0x12d   :  { %4410 = vmatprep.subr.bf16.mxu1 %v5200_v51 }
 0x12e   :  { %4247 = vmatpush1.bf16.msra.mxu0 %v5197_v38  ;;  %v1250_v38 = vld [vmem:[#allocation8 + $0x460] sm:$0xff] }
 0x12f   :  { %4248 = vmatprep.subr.bf16.mxu0 %v5206_v41  ;;  %v6062_v41 = vsub.s32 3, %v6047_v22  ;;  %v5246_v44 = vcombine.high %v1246_v36, %v1250_v38  ;;  %v5245_v49 = vcombine.low %v1246_v36, %v1250_v38  ;;  %v1295_v36 = vld [vmem:[#allocation8 + $0x5c8] sm:$0xff] }
 0x130   :  { %4411 = vmatpush1.bf16.msra.mxu1 %v5199_v58 }
 0x131   :  { %4412 = vmatprep.subr.bf16.mxu1 %v5208_v59  ;;  %v258_v24 = vrot.slane %v6052_v25, %v6062_v41 }
 0x132   :  { %4249 = vmatpush1.bf16.msra.mxu0 %v5205_v46  ;;  %v1254_v46 = vld [vmem:[#allocation8 + $0x480] sm:$0xff] }
 0x133   :  { %4250 = vmatprep.subr.bf16.mxu0 %v5214_v48  ;;  %v1259_v48 = vld [vmem:[#allocation8 + $0x4a8] sm:$0xff]  ;;  %v5254_v51 = vcombine.high %v1254_v46, %v1258_v47  ;;  %v5253_v62 = vcombine.low %v1254_v46, %v1258_v47  ;;  %v1306_v46 = vld [vmem:[#allocation8 + $0x620] sm:$0xff] }
 0x134   :  { %4413 = vmatpush1.bf16.msra.mxu1 %v5207_v5  ;;  %v5255_v63 = vcombine.low %v1255_v2, %v1259_v48  ;;  %v1275_v5 = vld [vmem:[#allocation8 + $0x528] sm:$0xff] }
 0x135   :  { %4414 = vmatprep.subr.bf16.mxu1 %v5216_v6  ;;  %v1303_v47 = vld [vmem:[#allocation8 + $0x608] sm:$0xff] }
 0x136   :  { %4251 = vmatpush1.bf16.msra.mxu0 %v5213_v52  ;;  %v5256_v52 = vcombine.high %v1255_v2, %v1259_v48  ;;  %v1307_v2 = vld [vmem:[#allocation8 + $0x628] sm:$0xff] }
 0x137   :  { %4252 = vmatprep.subr.bf16.mxu0 %v5222_v55  ;;  %v1266_v55 = vld [vmem:[#allocation8 + $0x4e0] sm:$0xff] }
 0x138   :  { %4415 = vmatpush1.bf16.msra.mxu1 %v5215_v19  ;;  %v1278_v19 = vld [vmem:[#allocation8 + $0x540] sm:$0xff] }
 0x139   :  { %4416 = vmatprep.subr.bf16.mxu1 %v5224_v13  ;;  %v1282_v13 = vld [vmem:[#allocation8 + $0x560] sm:$0xff] }
 0x13a   :  { %4253 = vmatpush1.bf16.msra.mxu0 %v5221_v60  ;;  %v1270_v60 = vld [vmem:[#allocation8 + $0x500] sm:$0xff] }
 0x13b   :  { %4254 = vmatprep.subr.bf16.mxu0 %v5230_v4  ;;  %v1271_v4 = vld [vmem:[#allocation8 + $0x508] sm:$0xff]  ;;  %v5270_v11 = vcombine.high %v1270_v60, %v1274_v1 }
 0x13c   :  { %4417 = vmatpush1.bf16.msra.mxu1 %v5223_v16  ;;  %v5269_v16 = vcombine.low %v1270_v60, %v1274_v1  ;;  %v1326_v1 = vld [vmem:[#allocation8 + $0x6c0] sm:$0xff] }
 0x13d   :  { %4418 = vmatprep.subr.bf16.mxu1 %v5232_v17  ;;  %v5271_v17 = vcombine.low %v1271_v4, %v1275_v5 }
 0x13e   :  { %4255 = vmatpush1.bf16.msra.mxu0 %v5229_v9  ;;  %v5261_v9 = vcombine.low %v1262_v53, %v1266_v55 }
 0x13f   :  { %4265 = vmatprep.subr.bf16.mxu0 %v5238_v12  ;;  %v5272_v12 = vcombine.high %v1271_v4, %v1275_v5  ;;  %v1330_v4 = vld [vmem:[#allocation8 + $0x6e0] sm:$0xff]  ;;  %v1327_v5 = vld [vmem:[#allocation8 + $0x6c8] sm:$0xff] }
 0x140   :  { %4419 = vmatpush1.bf16.msra.mxu1 %v5231_v18  ;;  %v5278_v18 = vcombine.high %v1278_v19, %v1282_v13 }
 0x141   :  { %4429 = vmatprep.subr.bf16.mxu1 %v5240_v20  ;;  %v5280_v20 = vcombine.high %v1279_v14, %v1283_v15 }
 0x194   :  { %v964_v29 = vpop.f32.mrb[0].mxu0 }
 0x195   :  { %v965_v30 = vadd.f32 %v964_v29, %v246_v27  ;;  %v966_v31 = vpop.f32.mrb[1].mxu0  ;;  %v1290_v27 = vld [vmem:[#allocation8 + $0x5a0] sm:$0xff]  ;;  %v1291_v29 = vld [vmem:[#allocation8 + $0x5a8] sm:$0xff] }
 0x196   :  { %v967_v32 = vadd.f32 %v966_v31, %v250_v28  ;;  %v968_v33 = vpop.f32.mrb[2].mxu0  ;;  %v6080_v54 = vpop.f32.mrb[0].mxu1  ;;  %v1287_v28 = vld [vmem:[#allocation8 + $0x588] sm:$0xff]  ;;  %v5279_v31 = vcombine.low %v1279_v14, %v1283_v15  ;;  %v5285_v38 = vcombine.low %v1286_v21, %v1290_v27  ;;  %v1338_v14 = vld [vmem:[#allocation8 + $0x720] sm:$0xff] }
 0x197   :  { %v1094_v34 = vmax.f32 %v965_v30, 0.0  ;;  %v969_v35 = vpop.f32.mrb[3].mxu0  ;;  %v1007_v58 = vpop.f32.mrb[1].mxu1  ;;  %v5277_v30 = vcombine.low %v1278_v19, %v1282_v13  ;;  %v5288_v33 = vcombine.high %v1287_v28, %v1291_v29  ;;  %v5287_v39 = vcombine.low %v1287_v28, %v1291_v29  ;;  %v1334_v13 = vld [vmem:[#allocation8 + $0x700] sm:$0xff]  ;;  %v1335_v15 = vld [vmem:[#allocation8 + $0x708] sm:$0xff] }
 0x198   :  { %v1095_v37 = vmax.f32 %v967_v32, 0.0  ;;  %v1008_v59 = vadd.f32 %v1007_v58, %v258_v24  ;;  %v1009_v61 = vpop.f32.mrb[2].mxu1  ;;  %v5286_v32 = vcombine.high %v1286_v21, %v1290_v27  ;;  %v1298_v35 = vld [vmem:[#allocation8 + $0x5e0] sm:$0xff]  ;;  %v1343_v29 = vld [vmem:[#allocation8 + $0x748] sm:$0xff] }
 0x199   :  { %v6066_v43 = vpack.c.bf16 %v1094_v34, %v1094_v34  ;;  %v1010_v3 = vpop.f32.mrb[3].mxu1  ;;  %v1294_v34 = vld [vmem:[#allocation8 + $0x5c0] sm:$0xff] }
 0x19a   :  { %v6064_v42 = vpack.c.bf16 %v1095_v37, %v1095_v37  ;;  %v1097_v0 = vmax.f32 %v1008_v59, 0.0  ;;  %v1299_v37 = vld [vmem:[#allocation8 + $0x5e8] sm:$0xff]  ;;  %v5294_v40 = vcombine.high %v1294_v34, %v1298_v35  ;;  %v5293_v48 = vcombine.low %v1294_v34, %v1298_v35  ;;  %v1318_v61 = vld [vmem:[#allocation8 + $0x680] sm:$0xff] }
 0x19b   :  { %v5295_v24 = vcombine.low %v1295_v36, %v1299_v37  ;;  %v1323_v3 = vld [vmem:[#allocation8 + $0x6a8] sm:$0xff]  ;;  %v1342_v27 = vld [vmem:[#allocation8 + $0x740] sm:$0xff] }
 0x19c   :  { %4256 = vmatprep.mubr.bf16.mxu0 %v6064_v42  ;;  %4420 = vmatprep.mubr.bf16.mxu1 %v6064_v42  ;;  %v6082_v6 = vpack.c.bf16 %v1097_v0, %v1097_v0  ;;  %v1346_v28 = vld [vmem:[#allocation8 + $0x760] sm:$0xff] }
 0x19d   :  { %4257 = vmatmul.mubr.bf16.vlgmr.msra.gmra.mrb[8].mxu0 %v6066_v43  ;;  %4421 = vmatmul.mubr.bf16.vlgmr.msra.gmra.mrb[8].mxu1 %v6066_v43  ;;  %v5342_v34 = vcombine.high %v1342_v27, %v1346_v28 }
 0x19e   :  { %4266 = vmatpush1.bf16.msra.mxu0 %v5237_v7  ;;  %4430 = vmatpush1.bf16.msra.mxu1 %v5239_v8  ;;  %v5262_v7 = vcombine.high %v1262_v53, %v1266_v55  ;;  %v5264_v8 = vcombine.high %v1263_v56, %v1267_v57  ;;  %v1311_v53 = vld [vmem:[#allocation8 + $0x648] sm:$0xff]  ;;  %v5303_v57 = vcombine.low %v1303_v47, %v1307_v2 }
 0x19f   :  { %4267 = vmatprep.subr.bf16.mxu0 %v5246_v44  ;;  %4431 = vmatprep.subr.bf16.mxu1 %v5248_v45  ;;  %v5296_v44 = vcombine.high %v1295_v36, %v1299_v37  ;;  %v1302_v45 = vld [vmem:[#allocation8 + $0x600] sm:$0xff]  ;;  %v1315_v55 = vld [vmem:[#allocation8 + $0x668] sm:$0xff] }
 0x1a0   :  { %4297 = vmatprep.mubr.bf16.mxu0 %v6082_v6  ;;  %4461 = vmatprep.mubr.bf16.mxu1 %v6082_v6  ;;  %v5301_v56 = vcombine.low %v1302_v45, %v1306_v46  ;;  %v5312_v59 = vcombine.high %v1311_v53, %v1315_v55  ;;  %v1350_v36 = vld [vmem:[#allocation8 + $0x780] sm:$0xff] }
 0x1a1   :  { %v1354_v37 = vld [vmem:[#allocation8 + $0x7a0] sm:$0xff] }
 0x1a2   :  { %4268 = vmatpush1.bf16.msra.mxu0 %v5245_v49  ;;  %4432 = vmatpush1.bf16.msra.mxu1 %v5247_v50  ;;  %v5302_v49 = vcombine.high %v1302_v45, %v1306_v46  ;;  %v5304_v50 = vcombine.high %v1303_v47, %v1307_v2  ;;  %v6092_v46 = vsub.s32 5, %v6047_v22  ;;  %v5350_v47 = vcombine.high %v1350_v36, %v1354_v37 }
 0x1a3   :  { %4269 = vmatprep.subr.bf16.mxu0 %v5254_v51  ;;  %4433 = vmatprep.subr.bf16.mxu1 %v5256_v52  ;;  %v1310_v51 = vld [vmem:[#allocation8 + $0x640] sm:$0xff] }
 0x1a4   :  { %v1314_v52 = vld [vmem:[#allocation8 + $0x660] sm:$0xff] }
 0x1a5   :  { %v5310_v58 = vcombine.high %v1310_v51, %v1314_v52 }
 0x1a6   :  { %4270 = vmatpush1.bf16.msra.mxu0 %v5253_v62  ;;  %4434 = vmatpush1.bf16.msra.mxu1 %v5255_v63  ;;  %v1322_v62 = vld [vmem:[#allocation8 + $0x6a0] sm:$0xff]  ;;  %v1319_v63 = vld [vmem:[#allocation8 + $0x688] sm:$0xff] }
 0x1a7   :  { %4271 = vmatprep.subr.bf16.mxu0 %v5262_v7  ;;  %4435 = vmatprep.subr.bf16.mxu1 %v5264_v8  ;;  %v5309_v7 = vcombine.low %v1310_v51, %v1314_v52  ;;  %v5311_v8 = vcombine.low %v1311_v53, %v1315_v55  ;;  %v5318_v60 = vcombine.high %v1318_v61, %v1322_v62 }
 0x1a8   :  { %v5320_v0 = vcombine.high %v1319_v63, %v1323_v3  ;;  %v5349_v52 = vcombine.low %v1350_v36, %v1354_v37  ;;  %v266_v55 = vrot.slane %v6052_v25, %v6092_v46  ;;  %v1394_v36 = vld [vmem:[#allocation8 + $0x8e0] sm:$0xff]  ;;  %v1391_v37 = vld [vmem:[#allocation8 + $0x8c8] sm:$0xff] }
 0x1aa   :  { %4272 = vmatpush1.bf16.msra.mxu0 %v5261_v9  ;;  %4436 = vmatpush1.bf16.msra.mxu1 %v5263_v10  ;;  %v1331_v9 = vld [vmem:[#allocation8 + $0x6e8] sm:$0xff]  ;;  %v5317_v10 = vcombine.low %v1318_v61, %v1322_v62 }
 0x1ab   :  { %4273 = vmatprep.subr.bf16.mxu0 %v5270_v11  ;;  %4437 = vmatprep.subr.bf16.mxu1 %v5272_v12  ;;  %v5319_v11 = vcombine.low %v1319_v63, %v1323_v3  ;;  %v5326_v12 = vcombine.high %v1326_v1, %v1330_v4  ;;  %v5328_v19 = vcombine.high %v1327_v5, %v1331_v9  ;;  %v1367_v61 = vld [vmem:[#allocation8 + $0x808] sm:$0xff] }
 0x1ac   :  { %v1371_v62 = vld [vmem:[#allocation8 + $0x828] sm:$0xff] }
 0x1ae   :  { %4274 = vmatpush1.bf16.msra.mxu0 %v5269_v16  ;;  %4438 = vmatpush1.bf16.msra.mxu1 %v5271_v17  ;;  %v1339_v16 = vld [vmem:[#allocation8 + $0x728] sm:$0xff]  ;;  %v5325_v17 = vcombine.low %v1326_v1, %v1330_v4  ;;  %v5368_v4 = vcombine.high %v1367_v61, %v1371_v62 }
 0x1af   :  { %4275 = vmatprep.subr.bf16.mxu0 %v5278_v18  ;;  %4439 = vmatprep.subr.bf16.mxu1 %v5280_v20  ;;  %v5327_v18 = vcombine.low %v1327_v5, %v1331_v9  ;;  %v5334_v20 = vcombine.high %v1334_v13, %v1338_v14  ;;  %v5336_v21 = vcombine.high %v1335_v15, %v1339_v16  ;;  %v1374_v5 = vld [vmem:[#allocation8 + $0x840] sm:$0xff] }
 0x1b2   :  { %4276 = vmatpush1.bf16.msra.mxu0 %v5277_v30  ;;  %4440 = vmatpush1.bf16.msra.mxu1 %v5279_v31  ;;  %v1347_v30 = vld [vmem:[#allocation8 + $0x768] sm:$0xff]  ;;  %v6087_v31 = vsub.s32 2, %v6047_v22 }
 0x1b3   :  { %4277 = vmatprep.subr.bf16.mxu0 %v5286_v32  ;;  %4441 = vmatprep.subr.bf16.mxu1 %v5288_v33  ;;  %v5333_v32 = vcombine.low %v1334_v13, %v1338_v14  ;;  %v5335_v33 = vcombine.low %v1335_v15, %v1339_v16  ;;  %v5344_v35 = vcombine.high %v1343_v29, %v1347_v30 }
 0x1b4   :  { %v5343_v45 = vcombine.low %v1343_v29, %v1347_v30  ;;  %v5367_v15 = vcombine.low %v1367_v61, %v1371_v62  ;;  %v1411_v61 = vld [vmem:[#allocation8 + $0x968] sm:$0xff] }
 0x1b6   :  { %4278 = vmatpush1.bf16.msra.mxu0 %v5285_v38  ;;  %4442 = vmatpush1.bf16.msra.mxu1 %v5287_v39  ;;  %v1351_v38 = vld [vmem:[#allocation8 + $0x788] sm:$0xff] }
 0x1b7   :  { %4279 = vmatprep.subr.bf16.mxu0 %v5294_v40  ;;  %4443 = vmatprep.subr.bf16.mxu1 %v5296_v44  ;;  %v1355_v39 = vld [vmem:[#allocation8 + $0x7a8] sm:$0xff]  ;;  %v254_v40 = vrot.slane %v6052_v25, %v6087_v31  ;;  %v5341_v44 = vcombine.low %v1342_v27, %v1346_v28 }
 0x1b8   :  { %v5352_v2 = vcombine.high %v1351_v38, %v1355_v39  ;;  %v5351_v53 = vcombine.low %v1351_v38, %v1355_v39  ;;  %v1387_v27 = vld [vmem:[#allocation8 + $0x8a8] sm:$0xff] }
 0x1b9   :  { %v1006_v51 = vadd.f32 %v6080_v54, %v254_v40  ;;  %v1395_v38 = vld [vmem:[#allocation8 + $0x8e8] sm:$0xff] }
 0x1ba   :  { %4280 = vmatpush1.bf16.msra.mxu0 %v5293_v48  ;;  %4444 = vmatpush1.bf16.msra.mxu1 %v5295_v24  ;;  %v1358_v48 = vld [vmem:[#allocation8 + $0x7c0] sm:$0xff] }
 0x1bb   :  { %4281 = vmatprep.subr.bf16.mxu0 %v5302_v49  ;;  %4445 = vmatprep.subr.bf16.mxu1 %v5304_v50  ;;  %v1362_v24 = vld [vmem:[#allocation8 + $0x7e0] sm:$0xff]  ;;  %v1359_v49 = vld [vmem:[#allocation8 + $0x7c8] sm:$0xff]  ;;  %v1096_v3 = vmax.f32 %v1006_v51, 0.0 }
 0x1bc   :  { %v1363_v50 = vld [vmem:[#allocation8 + $0x7e8] sm:$0xff]  ;;  %v5357_v54 = vcombine.low %v1358_v48, %v1362_v24 }
 0x1bd   :  { %v6099_v13 = vpack.c.bf16 %v1096_v3, %v1096_v3  ;;  %v1403_v51 = vld [vmem:[#allocation8 + $0x928] sm:$0xff] }
 0x1be   :  { %4282 = vmatpush1.bf16.msra.mxu0 %v5301_v56  ;;  %4446 = vmatpush1.bf16.msra.mxu1 %v5303_v57  ;;  %v5358_v56 = vcombine.high %v1358_v48, %v1362_v24  ;;  %v5360_v57 = vcombine.high %v1359_v49, %v1363_v50  ;;  %v5392_v48 = vcombine.high %v1391_v37, %v1395_v38  ;;  %v1398_v24 = vld [vmem:[#allocation8 + $0x900] sm:$0xff] }
 0x1bf   :  { %4283 = vmatprep.subr.bf16.mxu0 %v5310_v58  ;;  %4447 = vmatprep.subr.bf16.mxu1 %v5312_v59  ;;  %v1366_v58 = vld [vmem:[#allocation8 + $0x800] sm:$0xff] }
 0x1c0   :  { %v1370_v59 = vld [vmem:[#allocation8 + $0x820] sm:$0xff] }
 0x1c1   :  { %v5366_v1 = vcombine.high %v1366_v58, %v1370_v59  ;;  %v5365_v14 = vcombine.low %v1366_v58, %v1370_v59  ;;  %v1410_v58 = vld [vmem:[#allocation8 + $0x960] sm:$0xff]  ;;  %v1407_v59 = vld [vmem:[#allocation8 + $0x948] sm:$0xff] }
 0x1c2   :  { %4284 = vmatpush1.bf16.msra.mxu0 %v5309_v7  ;;  %4448 = vmatpush1.bf16.msra.mxu1 %v5311_v8  ;;  %v5359_v8 = vcombine.low %v1359_v49, %v1363_v50  ;;  %v1402_v49 = vld [vmem:[#allocation8 + $0x920] sm:$0xff]  ;;  %v1399_v50 = vld [vmem:[#allocation8 + $0x908] sm:$0xff] }
 0x1c3   :  { %4285 = vmatprep.subr.bf16.mxu0 %v5318_v60  ;;  %4449 = vmatprep.subr.bf16.mxu1 %v5320_v0  ;;  %v5397_v62 = vcombine.low %v1398_v24, %v1402_v49  ;;  %v5399_v3 = vcombine.low %v1399_v50, %v1403_v51 }
 0x1c6   :  { %4286 = vmatpush1.bf16.msra.mxu0 %v5317_v10  ;;  %4450 = vmatpush1.bf16.msra.mxu1 %v5319_v11  ;;  %v1378_v10 = vld [vmem:[#allocation8 + $0x860] sm:$0xff]  ;;  %v1375_v11 = vld [vmem:[#allocation8 + $0x848] sm:$0xff] }
 0x1c7   :  { %4287 = vmatprep.subr.bf16.mxu0 %v5326_v12  ;;  %4451 = vmatprep.subr.bf16.mxu1 %v5328_v19  ;;  %v1379_v12 = vld [vmem:[#allocation8 + $0x868] sm:$0xff]  ;;  %v5374_v16 = vcombine.high %v1374_v5, %v1378_v10  ;;  %v5373_v29 = vcombine.low %v1374_v5, %v1378_v10  ;;  %v5407_v5 = vcombine.low %v1407_v59, %v1411_v61 }
 0x1c8   :  { %v5375_v30 = vcombine.low %v1375_v11, %v1379_v12 }
 0x1ca   :  { %4288 = vmatpush1.bf16.msra.mxu0 %v5325_v17  ;;  %4452 = vmatpush1.bf16.msra.mxu1 %v5327_v18  ;;  %v5376_v17 = vcombine.high %v1375_v11, %v1379_v12  ;;  %v1382_v18 = vld [vmem:[#allocation8 + $0x880] sm:$0xff] }
 0x1cb   :  { %4289 = vmatprep.subr.bf16.mxu0 %v5334_v20  ;;  %4453 = vmatprep.subr.bf16.mxu1 %v5336_v21  ;;  %v1386_v20 = vld [vmem:[#allocation8 + $0x8a0] sm:$0xff]  ;;  %v1383_v21 = vld [vmem:[#allocation8 + $0x888] sm:$0xff] }
 0x1cc   :  { %v1422_v11 = vld [vmem:[#allocation8 + $0x9c0] sm:$0xff] }
 0x1cd   :  { %v1426_v12 = vld [vmem:[#allocation8 + $0x9e0] sm:$0xff] }
 0x1ce   :  { %4290 = vmatpush1.bf16.msra.mxu0 %v5333_v32  ;;  %4454 = vmatpush1.bf16.msra.mxu1 %v5335_v33  ;;  %v5382_v32 = vcombine.high %v1382_v18, %v1386_v20  ;;  %v5384_v33 = vcombine.high %v1383_v21, %v1387_v27 }
 0x1cf   :  { %4291 = vmatprep.subr.bf16.mxu0 %v5342_v34  ;;  %4455 = vmatprep.subr.bf16.mxu1 %v5344_v35  ;;  %v1390_v34 = vld [vmem:[#allocation8 + $0x8c0] sm:$0xff] }
 0x1d2   :  { %4292 = vmatpush1.bf16.msra.mxu0 %v5341_v44  ;;  %4456 = vmatpush1.bf16.msra.mxu1 %v5343_v45  ;;  %v5381_v44 = vcombine.low %v1382_v18, %v1386_v20  ;;  %v5383_v45 = vcombine.low %v1383_v21, %v1387_v27  ;;  %v1430_v20 = vld [vmem:[#allocation8 + $0xa00] sm:$0xff]  ;;  %v1431_v27 = vld [vmem:[#allocation8 + $0xa08] sm:$0xff] }
 0x1d3   :  { %4293 = vmatprep.subr.bf16.mxu0 %v5350_v47  ;;  %4457 = vmatprep.subr.bf16.mxu1 %v5352_v2  ;;  %v5390_v2 = vcombine.high %v1390_v34, %v1394_v36  ;;  %v1434_v21 = vld [vmem:[#allocation8 + $0xa20] sm:$0xff] }
 0x1d4   :  { %v6097_v63 = vpop.f32.mrb[4].mxu0 }
 0x1d5   :  { %v1048_v7 = vpop.f32.mrb[5].mxu0 }
 0x1d6   :  { %4294 = vmatpush1.bf16.msra.mxu0 %v5349_v52  ;;  %4458 = vmatpush1.bf16.msra.mxu1 %v5351_v53  ;;  %v1049_v60 = vadd.f32 %v1048_v7, %v266_v55  ;;  %v1050_v0 = vpop.f32.mrb[6].mxu0  ;;  %v6105_v35 = vpop.f32.mrb[4].mxu1  ;;  %v5389_v52 = vcombine.low %v1390_v34, %v1394_v36  ;;  %v5391_v53 = vcombine.low %v1391_v37, %v1395_v38  ;;  %v1438_v36 = vld [vmem:[#allocation8 + $0xa40] sm:$0xff]  ;;  %v1439_v38 = vld [vmem:[#allocation8 + $0xa48] sm:$0xff] }
 0x1d7   :  { %4295 = vmatprep.subr.bf16.mxu0 %v5358_v56  ;;  %4459 = vmatprep.subr.bf16.mxu1 %v5360_v57  ;;  %v1051_v9 = vpop.f32.mrb[7].mxu0  ;;  %v6109_v39 = vpop.f32.mrb[5].mxu1  ;;  %v5398_v55 = vcombine.high %v1398_v24, %v1402_v49  ;;  %v5400_v56 = vcombine.high %v1399_v50, %v1403_v51  ;;  %v1406_v57 = vld [vmem:[#allocation8 + $0x940] sm:$0xff]  ;;  %v1415_v0 = vld [vmem:[#allocation8 + $0x988] sm:$0xff] }
 0x1d8   :  { %v1099_v19 = vmax.f32 %v1049_v60, 0.0  ;;  %v1091_v40 = vpop.f32.mrb[6].mxu1  ;;  %v5406_v7 = vcombine.high %v1406_v57, %v1410_v58  ;;  %v1418_v60 = vld [vmem:[#allocation8 + $0x9a0] sm:$0xff]  ;;  %v1447_v49 = vld [vmem:[#allocation8 + $0xa88] sm:$0xff] }
 0x1d9   :  { %v1092_v47 = vpop.f32.mrb[7].mxu1  ;;  %v1442_v37 = vld [vmem:[#allocation8 + $0xa60] sm:$0xff]  ;;  %v1443_v40 = vld [vmem:[#allocation8 + $0xa68] sm:$0xff] }
 0x1da   :  { %4296 = vmatpush1.bf16.msra.mxu0 %v5357_v54  ;;  %4460 = vmatpush1.bf16.msra.mxu1 %v5359_v8  ;;  %v6101_v28 = vpack.c.bf16 %v1099_v19, %v1099_v19  ;;  %v5408_v54 = vcombine.high %v1407_v59, %v1411_v61  ;;  %v1414_v8 = vld [vmem:[#allocation8 + $0x980] sm:$0xff]  ;;  %v1423_v19 = vld [vmem:[#allocation8 + $0x9c8] sm:$0xff]  ;;  %v5438_v47 = vcombine.high %v1438_v36, %v1442_v37 }
 0x1db   :  { %4306 = vmatprep.subr.bf16.mxu0 %v5366_v1  ;;  %4470 = vmatprep.subr.bf16.mxu1 %v5368_v4  ;;  %v1419_v1 = vld [vmem:[#allocation8 + $0x9a8] sm:$0xff]  ;;  %v5405_v4 = vcombine.low %v1406_v57, %v1410_v58  ;;  %v5414_v9 = vcombine.high %v1414_v8, %v1418_v60  ;;  %v1450_v24 = vld [vmem:[#allocation8 + $0xaa0] sm:$0xff]  ;;  %v5437_v51 = vcombine.low %v1438_v36, %v1442_v37 }
 0x1dc   :  { %v5416_v10 = vcombine.high %v1415_v0, %v1419_v1  ;;  %v1451_v50 = vld [vmem:[#allocation8 + $0xaa8] sm:$0xff]  ;;  %v1458_v57 = vld [vmem:[#allocation8 + $0xae0] sm:$0xff] }
 0x1dd   :  { %4298 = vmatmul.mubr.bf16.vlgmr.msra.gmra.mrb[8].mxu0 %v6099_v13  ;;  %4462 = vmatmul.mubr.bf16.vlgmr.msra.gmra.mrb[8].mxu1 %v6099_v13  ;;  %v1455_v58 = vld [vmem:[#allocation8 + $0xac8] sm:$0xff] }
 0x1de   :  { %4307 = vmatpush1.bf16.msra.mxu0 %v5365_v14  ;;  %4471 = vmatpush1.bf16.msra.mxu1 %v5367_v15  ;;  %v1427_v14 = vld [vmem:[#allocation8 + $0x9e8] sm:$0xff]  ;;  %v5413_v15 = vcombine.low %v1414_v8, %v1418_v60  ;;  %v1466_v8 = vld [vmem:[#allocation8 + $0xb20] sm:$0xff] }
 0x1df   :  { %4308 = vmatprep.subr.bf16.mxu0 %v5374_v16  ;;  %4472 = vmatprep.subr.bf16.mxu1 %v5376_v17  ;;  %v5415_v16 = vcombine.low %v1415_v0, %v1419_v1  ;;  %v5422_v17 = vcombine.high %v1422_v11, %v1426_v12  ;;  %v5424_v18 = vcombine.high %v1423_v19, %v1427_v14  ;;  %v1459_v59 = vld [vmem:[#allocation8 + $0xae8] sm:$0xff] }
 0x1e0   :  { %4338 = vmatprep.mubr.bf16.mxu0 %v6101_v28  ;;  %4502 = vmatprep.mubr.bf16.mxu1 %v6101_v28  ;;  %v1463_v60 = vld [vmem:[#allocation8 + $0xb08] sm:$0xff] }
 0x1e1   :  { %v1467_v0 = vld [vmem:[#allocation8 + $0xb28] sm:$0xff] }
 0x1e2   :  { %4309 = vmatpush1.bf16.msra.mxu0 %v5373_v29  ;;  %4473 = vmatpush1.bf16.msra.mxu1 %v5375_v30  ;;  %v1435_v29 = vld [vmem:[#allocation8 + $0xa28] sm:$0xff]  ;;  %v5421_v30 = vcombine.low %v1422_v11, %v1426_v12  ;;  %v1474_v11 = vld [vmem:[#allocation8 + $0xb60] sm:$0xff] }
 0x1e3   :  { %4310 = vmatprep.subr.bf16.mxu0 %v5382_v32  ;;  %4474 = vmatprep.subr.bf16.mxu1 %v5384_v33  ;;  %v5423_v32 = vcombine.low %v1423_v19, %v1427_v14  ;;  %v5430_v33 = vcombine.high %v1430_v20, %v1434_v21  ;;  %v5432_v34 = vcombine.high %v1431_v27, %v1435_v29  ;;  %v1471_v12 = vld [vmem:[#allocation8 + $0xb48] sm:$0xff]  ;;  %v6112_v14 = vsub.s32 4, %v6047_v22 }
 0x1e4   :  { %v1475_v19 = vld [vmem:[#allocation8 + $0xb68] sm:$0xff] }
 0x1e6   :  { %4311 = vmatpush1.bf16.msra.mxu0 %v5381_v44  ;;  %4475 = vmatpush1.bf16.msra.mxu1 %v5383_v45  ;;  %v5429_v44 = vcombine.low %v1430_v20, %v1434_v21  ;;  %v5431_v45 = vcombine.low %v1431_v27, %v1435_v29  ;;  %v1478_v20 = vld [vmem:[#allocation8 + $0xb80] sm:$0xff]  ;;  %v1479_v27 = vld [vmem:[#allocation8 + $0xb88] sm:$0xff] }
 0x1e7   :  { %4312 = vmatprep.subr.bf16.mxu0 %v5390_v2  ;;  %4476 = vmatprep.subr.bf16.mxu1 %v5392_v48  ;;  %v5440_v2 = vcombine.high %v1439_v38, %v1443_v40  ;;  %v1446_v48 = vld [vmem:[#allocation8 + $0xa80] sm:$0xff]  ;;  %v1483_v29 = vld [vmem:[#allocation8 + $0xba8] sm:$0xff] }
 0x1e8   :  { %v5445_v61 = vcombine.low %v1446_v48, %v1450_v24  ;;  %v1482_v21 = vld [vmem:[#allocation8 + $0xba0] sm:$0xff]  ;;  %v5480_v37 = vcombine.high %v1479_v27, %v1483_v29 }
 0x1e9   :  { %v5478_v36 = vcombine.high %v1478_v20, %v1482_v21 }
 0x1ea   :  { %4313 = vmatpush1.bf16.msra.mxu0 %v5389_v52  ;;  %4477 = vmatpush1.bf16.msra.mxu1 %v5391_v53  ;;  %v5439_v52 = vcombine.low %v1439_v38, %v1443_v40  ;;  %v5446_v53 = vcombine.high %v1446_v48, %v1450_v24  ;;  %v1486_v38 = vld [vmem:[#allocation8 + $0xbc0] sm:$0xff]  ;;  %v5477_v48 = vcombine.low %v1478_v20, %v1482_v21  ;;  %v1519_v20 = vld [vmem:[#allocation8 + $0xcc8] sm:$0xff] }
 0x1eb   :  { %4314 = vmatprep.subr.bf16.mxu0 %v5398_v55  ;;  %4478 = vmatprep.subr.bf16.mxu1 %v5400_v56  ;;  %v5448_v55 = vcombine.high %v1447_v49, %v1451_v50  ;;  %v1454_v56 = vld [vmem:[#allocation8 + $0xac0] sm:$0xff]  ;;  %v5479_v24 = vcombine.low %v1479_v27, %v1483_v29  ;;  %v1523_v21 = vld [vmem:[#allocation8 + $0xce8] sm:$0xff] }
 0x1ec   :  { %v5453_v1 = vcombine.low %v1454_v56, %v1458_v57  ;;  %v1490_v40 = vld [vmem:[#allocation8 + $0xbe0] sm:$0xff] }
 0x1ee   :  { %4315 = vmatpush1.bf16.msra.mxu0 %v5397_v62  ;;  %4479 = vmatpush1.bf16.msra.mxu1 %v5399_v3  ;;  %v5447_v62 = vcombine.low %v1447_v49, %v1451_v50  ;;  %v5454_v3 = vcombine.high %v1454_v56, %v1458_v57  ;;  %v5486_v49 = vcombine.high %v1486_v38, %v1490_v40 }
 0x1ef   :  { %4316 = vmatprep.subr.bf16.mxu0 %v5406_v7  ;;  %4480 = vmatprep.subr.bf16.mxu1 %v5408_v54  ;;  %v5456_v7 = vcombine.high %v1455_v58, %v1459_v59  ;;  %v1462_v54 = vld [vmem:[#allocation8 + $0xb00] sm:$0xff] }
 0x1f2   :  { %4317 = vmatpush1.bf16.msra.mxu0 %v5405_v4  ;;  %4481 = vmatpush1.bf16.msra.mxu1 %v5407_v5  ;;  %v5455_v4 = vcombine.low %v1455_v58, %v1459_v59  ;;  %v5462_v5 = vcombine.high %v1462_v54, %v1466_v8 }
 0x1f3   :  { %4318 = vmatprep.subr.bf16.mxu0 %v5414_v9  ;;  %4482 = vmatprep.subr.bf16.mxu1 %v5416_v10  ;;  %v5464_v9 = vcombine.high %v1463_v60, %v1467_v0  ;;  %v1470_v10 = vld [vmem:[#allocation8 + $0xb40] sm:$0xff] }
 0x1f6   :  { %4319 = vmatpush1.bf16.msra.mxu0 %v5413_v15  ;;  %4483 = vmatpush1.bf16.msra.mxu1 %v5415_v16  ;;  %v5461_v15 = vcombine.low %v1462_v54, %v1466_v8  ;;  %v5463_v16 = vcombine.low %v1463_v60, %v1467_v0 }
 0x1f7   :  { %4320 = vmatprep.subr.bf16.mxu0 %v5422_v17  ;;  %4484 = vmatprep.subr.bf16.mxu1 %v5424_v18  ;;  %v5470_v17 = vcombine.high %v1470_v10, %v1474_v11  ;;  %v5472_v18 = vcombine.high %v1471_v12, %v1475_v19 }
 0x1fa   :  { %4321 = vmatpush1.bf16.msra.mxu0 %v5421_v30  ;;  %4485 = vmatpush1.bf16.msra.mxu1 %v5423_v32  ;;  %v6115_v30 = vsub.s32 7, %v6047_v22  ;;  %v262_v32 = vrot.slane %v6052_v25, %v6112_v14 }
 0x1fb   :  { %4322 = vmatprep.subr.bf16.mxu0 %v5430_v33  ;;  %4486 = vmatprep.subr.bf16.mxu1 %v5432_v34  ;;  %v5469_v33 = vcombine.low %v1470_v10, %v1474_v11  ;;  %v5471_v34 = vcombine.low %v1471_v12, %v1475_v19  ;;  %v1515_v10 = vld [vmem:[#allocation8 + $0xca8] sm:$0xff] }
 0x1fe   :  { %4323 = vmatpush1.bf16.msra.mxu0 %v5429_v44  ;;  %4487 = vmatpush1.bf16.msra.mxu1 %v5431_v45  ;;  %v1487_v44 = vld [vmem:[#allocation8 + $0xbc8] sm:$0xff] }
 0x1ff   :  { %4324 = vmatprep.subr.bf16.mxu0 %v5438_v47  ;;  %4488 = vmatprep.subr.bf16.mxu1 %v5440_v2  ;;  %v1491_v45 = vld [vmem:[#allocation8 + $0xbe8] sm:$0xff]  ;;  %v274_v47 = vrot.slane %v6052_v25, %v6115_v30  ;;  %v1047_v2 = vadd.f32 %v6097_v63, %v262_v32  ;;  %v5485_v25 = vcombine.low %v1486_v38, %v1490_v40 }
 0x200   :  { %v5488_v50 = vcombine.high %v1487_v44, %v1491_v45  ;;  %v5487_v58 = vcombine.low %v1487_v44, %v1491_v45  ;;  %v1531_v38 = vld [vmem:[#allocation8 + $0xd28] sm:$0xff]  ;;  %v5519_v44 = vcombine.low %v1519_v20, %v1523_v21 }
 0x201   :  { %v1090_v56 = vadd.f32 %v6109_v39, %v274_v47  ;;  %v1098_v57 = vmax.f32 %v1047_v2, 0.0  ;;  %v1534_v2 = vld [vmem:[#allocation8 + $0xd40] sm:$0xff] }
 0x202   :  { %4325 = vmatpush1.bf16.msra.mxu0 %v5437_v51  ;;  %4489 = vmatpush1.bf16.msra.mxu1 %v5439_v52  ;;  %v1494_v51 = vld [vmem:[#allocation8 + $0xc00] sm:$0xff] }
 0x203   :  { %4326 = vmatprep.subr.bf16.mxu0 %v5446_v53  ;;  %4490 = vmatprep.subr.bf16.mxu1 %v5448_v55  ;;  %v1498_v52 = vld [vmem:[#allocation8 + $0xc20] sm:$0xff]  ;;  %v1495_v53 = vld [vmem:[#allocation8 + $0xc08] sm:$0xff]  ;;  %v1101_v54 = vmax.f32 %v1090_v56, 0.0  ;;  %v6123_v8 = vpack.c.bf16 %v1098_v57, %v1098_v57 }
 0x204   :  { %v1499_v55 = vld [vmem:[#allocation8 + $0xc28] sm:$0xff]  ;;  %v5494_v63 = vcombine.high %v1494_v51, %v1498_v52  ;;  %v5493_v60 = vcombine.low %v1494_v51, %v1498_v52  ;;  %v1546_v56 = vld [vmem:[#allocation8 + $0xda0] sm:$0xff] }
 0x205   :  { %v5496_v59 = vcombine.high %v1495_v53, %v1499_v55  ;;  %v5495_v39 = vcombine.low %v1495_v53, %v1499_v55  ;;  %v6125_v11 = vpack.c.bf16 %v1101_v54, %v1101_v54  ;;  %v1542_v55 = vld [vmem:[#allocation8 + $0xd80] sm:$0xff]  ;;  %v1543_v57 = vld [vmem:[#allocation8 + $0xd88] sm:$0xff] }
 0x206   :  { %4327 = vmatpush1.bf16.msra.mxu0 %v5445_v61  ;;  %4491 = vmatpush1.bf16.msra.mxu1 %v5447_v62  ;;  %v1502_v61 = vld [vmem:[#allocation8 + $0xc40] sm:$0xff]  ;;  %v1555_v54 = vld [vmem:[#allocation8 + $0xde8] sm:$0xff] }
 0x207   :  { %4328 = vmatprep.subr.bf16.mxu0 %v5454_v3  ;;  %4492 = vmatprep.subr.bf16.mxu1 %v5456_v7  ;;  %v1506_v62 = vld [vmem:[#allocation8 + $0xc60] sm:$0xff]  ;;  %v1503_v3 = vld [vmem:[#allocation8 + $0xc48] sm:$0xff] }
 0x208   :  { %v1507_v7 = vld [vmem:[#allocation8 + $0xc68] sm:$0xff]  ;;  %v5502_v0 = vcombine.high %v1502_v61, %v1506_v62  ;;  %v5501_v12 = vcombine.low %v1502_v61, %v1506_v62  ;;  %v1550_v62 = vld [vmem:[#allocation8 + $0xdc0] sm:$0xff] }
 0x209   :  { %v5503_v19 = vcombine.low %v1503_v3, %v1507_v7 }
 0x20a   :  { %4329 = vmatpush1.bf16.msra.mxu0 %v5453_v1  ;;  %4493 = vmatpush1.bf16.msra.mxu1 %v5455_v4  ;;  %v5504_v1 = vcombine.high %v1503_v3, %v1507_v7  ;;  %v1510_v4 = vld [vmem:[#allocation8 + $0xc80] sm:$0xff]  ;;  %v1551_v7 = vld [vmem:[#allocation8 + $0xdc8] sm:$0xff] }
 0x20b   :  { %4330 = vmatprep.subr.bf16.mxu0 %v5462_v5  ;;  %4494 = vmatprep.subr.bf16.mxu1 %v5464_v9  ;;  %v1514_v5 = vld [vmem:[#allocation8 + $0xca0] sm:$0xff]  ;;  %v1511_v9 = vld [vmem:[#allocation8 + $0xc88] sm:$0xff] }
 0x20c   :  { %v5509_v27 = vcombine.low %v1510_v4, %v1514_v5  ;;  %v5511_v29 = vcombine.low %v1511_v9, %v1515_v10  ;;  %v1554_v3 = vld [vmem:[#allocation8 + $0xde0] sm:$0xff] }
 0x20e   :  { %4331 = vmatpush1.bf16.msra.mxu0 %v5461_v15  ;;  %4495 = vmatpush1.bf16.msra.mxu1 %v5463_v16  ;;  %v5510_v15 = vcombine.high %v1510_v4, %v1514_v5  ;;  %v5512_v16 = vcombine.high %v1511_v9, %v1515_v10  ;;  %v1558_v4 = vld [vmem:[#allocation8 + $0xe00] sm:$0xff]  ;;  %v1559_v9 = vld [vmem:[#allocation8 + $0xe08] sm:$0xff] }
 0x20f   :  { %4332 = vmatprep.subr.bf16.mxu0 %v5470_v17  ;;  %4496 = vmatprep.subr.bf16.mxu1 %v5472_v18  ;;  %v1518_v17 = vld [vmem:[#allocation8 + $0xcc0] sm:$0xff]  ;;  %v1563_v10 = vld [vmem:[#allocation8 + $0xe28] sm:$0xff] }
 0x210   :  { %v1522_v18 = vld [vmem:[#allocation8 + $0xce0] sm:$0xff] }
 0x211   :  { %v5518_v32 = vcombine.high %v1518_v17, %v1522_v18  ;;  %v5517_v40 = vcombine.low %v1518_v17, %v1522_v18  ;;  %v1562_v5 = vld [vmem:[#allocation8 + $0xe20] sm:$0xff] }
 0x212   :  { %4333 = vmatpush1.bf16.msra.mxu0 %v5469_v33  ;;  %4497 = vmatpush1.bf16.msra.mxu1 %v5471_v34  ;;  %v5520_v33 = vcombine.high %v1519_v20, %v1523_v21  ;;  %v1526_v34 = vld [vmem:[#allocation8 + $0xd00] sm:$0xff]  ;;  %v1567_v20 = vld [vmem:[#allocation8 + $0xe48] sm:$0xff] }
 0x213   :  { %4334 = vmatprep.subr.bf16.mxu0 %v5478_v36  ;;  %4498 = vmatprep.subr.bf16.mxu1 %v5480_v37  ;;  %v1530_v36 = vld [vmem:[#allocation8 + $0xd20] sm:$0xff]  ;;  %v1527_v37 = vld [vmem:[#allocation8 + $0xd08] sm:$0xff] }
 0x214   :  { %v5526_v45 = vcombine.high %v1526_v34, %v1530_v36  ;;  %v5528_v47 = vcombine.high %v1527_v37, %v1531_v38  ;;  %v5527_v51 = vcombine.low %v1527_v37, %v1531_v38  ;;  %v1566_v17 = vld [vmem:[#allocation8 + $0xe40] sm:$0xff]  ;;  %v1571_v21 = vld [vmem:[#allocation8 + $0xe68] sm:$0xff] }
 0x215   :  { %v1570_v18 = vld [vmem:[#allocation8 + $0xe60] sm:$0xff]  ;;  %v1575_v37 = vld [vmem:[#allocation8 + $0xe88] sm:$0xff] }
 0x216   :  { %4335 = vmatpush1.bf16.msra.mxu0 %v5477_v48  ;;  %4499 = vmatpush1.bf16.msra.mxu1 %v5479_v24  ;;  %v1538_v48 = vld [vmem:[#allocation8 + $0xd60] sm:$0xff]  ;;  %v1535_v24 = vld [vmem:[#allocation8 + $0xd48] sm:$0xff] }
 0x217   :  { %4336 = vmatprep.subr.bf16.mxu0 %v5486_v49  ;;  %4500 = vmatprep.subr.bf16.mxu1 %v5488_v50  ;;  %v1539_v49 = vld [vmem:[#allocation8 + $0xd68] sm:$0xff]  ;;  %v5525_v50 = vcombine.low %v1526_v34, %v1530_v36  ;;  %v5534_v52 = vcombine.high %v1534_v2, %v1538_v48  ;;  %v1574_v34 = vld [vmem:[#allocation8 + $0xe80] sm:$0xff] }
 0x218   :  { %v5536_v53 = vcombine.high %v1535_v24, %v1539_v49  ;;  %v1578_v36 = vld [vmem:[#allocation8 + $0xea0] sm:$0xff]  ;;  %v1579_v38 = vld [vmem:[#allocation8 + $0xea8] sm:$0xff] }
 0x21a   :  { %4337 = vmatpush1.bf16.msra.mxu0 %v5485_v25  ;;  %4501 = vmatpush1.bf16.msra.mxu1 %v5487_v58  ;;  %v1547_v25 = vld [vmem:[#allocation8 + $0xda8] sm:$0xff]  ;;  %v5533_v58 = vcombine.low %v1534_v2, %v1538_v48  ;;  %v1582_v2 = vld [vmem:[#allocation8 + $0xec0] sm:$0xff] }
 0x21b   :  { %4347 = vmatprep.subr.bf16.mxu0 %v5494_v63  ;;  %4511 = vmatprep.subr.bf16.mxu1 %v5496_v59  ;;  %v5535_v63 = vcombine.low %v1535_v24, %v1539_v49  ;;  %v5542_v59 = vcombine.high %v1542_v55, %v1546_v56  ;;  %v5544_v61 = vcombine.high %v1543_v57, %v1547_v25  ;;  %v1586_v48 = vld [vmem:[#allocation8 + $0xee0] sm:$0xff]  ;;  %v1583_v24 = vld [vmem:[#allocation8 + $0xec8] sm:$0xff] }
 0x21c   :  { %v1587_v49 = vld [vmem:[#allocation8 + $0xee8] sm:$0xff] }
 0x21d   :  { %4339 = vmatmul.mubr.bf16.vlgmr.msra.gmra.mrb[8].mxu0 %v6123_v8  ;;  %4503 = vmatmul.mubr.bf16.vlgmr.msra.gmra.mrb[8].mxu1 %v6123_v8 }
 0x21e   :  { %4348 = vmatpush1.bf16.msra.mxu0 %v5493_v60  ;;  %4512 = vmatpush1.bf16.msra.mxu1 %v5495_v39  ;;  %v5541_v60 = vcombine.low %v1542_v55, %v1546_v56  ;;  %v5543_v39 = vcombine.low %v1543_v57, %v1547_v25  ;;  %v1590_v55 = vld [vmem:[#allocation8 + $0xf00] sm:$0xff]  ;;  %v1591_v57 = vld [vmem:[#allocation8 + $0xf08] sm:$0xff] }
 0x21f   :  { %4349 = vmatprep.subr.bf16.mxu0 %v5502_v0  ;;  %4513 = vmatprep.subr.bf16.mxu1 %v5504_v1  ;;  %v5550_v0 = vcombine.high %v1550_v62, %v1554_v3  ;;  %v5552_v1 = vcombine.high %v1551_v7, %v1555_v54  ;;  %v1594_v56 = vld [vmem:[#allocation8 + $0xf20] sm:$0xff]  ;;  %v1595_v25 = vld [vmem:[#allocation8 + $0xf28] sm:$0xff] }
 0x220   :  { %4379 = vmatprep.mubr.bf16.mxu0 %v6125_v11  ;;  %4543 = vmatprep.mubr.bf16.mxu1 %v6125_v11 }
 0x222   :  { %4350 = vmatpush1.bf16.msra.mxu0 %v5501_v12  ;;  %4514 = vmatpush1.bf16.msra.mxu1 %v5503_v19  ;;  %v5549_v12 = vcombine.low %v1550_v62, %v1554_v3  ;;  %v5551_v19 = vcombine.low %v1551_v7, %v1555_v54  ;;  %v1598_v62 = vld [vmem:[#allocation8 + $0xf40] sm:$0xff]  ;;  %v1599_v7 = vld [vmem:[#allocation8 + $0xf48] sm:$0xff] }
 0x223   :  { %4351 = vmatprep.subr.bf16.mxu0 %v5510_v15  ;;  %4515 = vmatprep.subr.bf16.mxu1 %v5512_v16  ;;  %v5558_v15 = vcombine.high %v1558_v4, %v1562_v5  ;;  %v5560_v16 = vcombine.high %v1559_v9, %v1563_v10  ;;  %v1602_v3 = vld [vmem:[#allocation8 + $0xf60] sm:$0xff]  ;;  %v1603_v54 = vld [vmem:[#allocation8 + $0xf68] sm:$0xff] }
 0x226   :  { %4352 = vmatpush1.bf16.msra.mxu0 %v5509_v27  ;;  %4516 = vmatpush1.bf16.msra.mxu1 %v5511_v29  ;;  %v5557_v27 = vcombine.low %v1558_v4, %v1562_v5  ;;  %v5559_v29 = vcombine.low %v1559_v9, %v1563_v10  ;;  %v5600_v4 = vcombine.high %v1599_v7, %v1603_v54  ;;  %v1606_v5 = vld [vmem:[#allocation8 + $0xf80] sm:$0xff]  ;;  %v1607_v10 = vld [vmem:[#allocation8 + $0xf88] sm:$0xff] }
 0x227   :  { %4353 = vmatprep.subr.bf16.mxu0 %v5518_v32  ;;  %4517 = vmatprep.subr.bf16.mxu1 %v5520_v33  ;;  %v5566_v32 = vcombine.high %v1566_v17, %v1570_v18  ;;  %v5568_v33 = vcombine.high %v1567_v20, %v1571_v21  ;;  %v1610_v9 = vld [vmem:[#allocation8 + $0xfa0] sm:$0xff] }
 0x22a   :  { %4354 = vmatpush1.bf16.msra.mxu0 %v5517_v40  ;;  %4518 = vmatpush1.bf16.msra.mxu1 %v5519_v44  ;;  %v5565_v40 = vcombine.low %v1566_v17, %v1570_v18  ;;  %v5567_v44 = vcombine.low %v1567_v20, %v1571_v21  ;;  %v5606_v18 = vcombine.high %v1606_v5, %v1610_v9  ;;  %v1614_v20 = vld [vmem:[#allocation8 + $0xfc0] sm:$0xff] }
 0x22b   :  { %4355 = vmatprep.subr.bf16.mxu0 %v5526_v45  ;;  %4519 = vmatprep.subr.bf16.mxu1 %v5528_v47  ;;  %v5574_v45 = vcombine.high %v1574_v34, %v1578_v36  ;;  %v5576_v47 = vcombine.high %v1575_v37, %v1579_v38  ;;  %v1618_v21 = vld [vmem:[#allocation8 + $0xfe0] sm:$0xff] }
 0x22e   :  { %4356 = vmatpush1.bf16.msra.mxu0 %v5525_v50  ;;  %4520 = vmatpush1.bf16.msra.mxu1 %v5527_v51  ;;  %v5573_v50 = vcombine.low %v1574_v34, %v1578_v36  ;;  %v5575_v51 = vcombine.low %v1575_v37, %v1579_v38  ;;  %v5614_v36 = vcombine.high %v1614_v20, %v1618_v21  ;;  %v1112_v38 = vld [vmem:[#allocation8 + $0x10] sm:$0xff] }
 0x22f   :  { %4357 = vmatprep.subr.bf16.mxu0 %v5534_v52  ;;  %4521 = vmatprep.subr.bf16.mxu1 %v5536_v53  ;;  %v5582_v52 = vcombine.high %v1582_v2, %v1586_v48  ;;  %v5584_v53 = vcombine.high %v1583_v24, %v1587_v49 }
 0x232   :  { %4358 = vmatpush1.bf16.msra.mxu0 %v5533_v58  ;;  %4522 = vmatpush1.bf16.msra.mxu1 %v5535_v63  ;;  %v5581_v58 = vcombine.low %v1582_v2, %v1586_v48  ;;  %v5583_v63 = vcombine.low %v1583_v24, %v1587_v49 }
 0x233   :  { %4359 = vmatprep.subr.bf16.mxu0 %v5542_v59  ;;  %4523 = vmatprep.subr.bf16.mxu1 %v5544_v61  ;;  %v5590_v59 = vcombine.high %v1590_v55, %v1594_v56  ;;  %v5592_v61 = vcombine.high %v1591_v57, %v1595_v25 }
 0x236   :  { %4360 = vmatpush1.bf16.msra.mxu0 %v5541_v60  ;;  %4524 = vmatpush1.bf16.msra.mxu1 %v5543_v39  ;;  %v5589_v60 = vcombine.low %v1590_v55, %v1594_v56  ;;  %v5591_v39 = vcombine.low %v1591_v57, %v1595_v25 }
 0x237   :  { %4361 = vmatprep.subr.bf16.mxu0 %v5550_v0  ;;  %4525 = vmatprep.subr.bf16.mxu1 %v5552_v1  ;;  %v6132_v0 = vsub.s32 6, %v6047_v22  ;;  %v5598_v1 = vcombine.high %v1598_v62, %v1602_v3 }
 0x23a   :  { %4362 = vmatpush1.bf16.msra.mxu0 %v5549_v12  ;;  %4526 = vmatpush1.bf16.msra.mxu1 %v5551_v19  ;;  %v1611_v12 = vld [vmem:[#allocation8 + $0xfa8] sm:$0xff]  ;;  %v5597_v19 = vcombine.low %v1598_v62, %v1602_v3 }
 0x23b   :  { %4363 = vmatprep.subr.bf16.mxu0 %v5558_v15  ;;  %4527 = vmatprep.subr.bf16.mxu1 %v5560_v16  ;;  %v5599_v15 = vcombine.low %v1599_v7, %v1603_v54  ;;  %v5692_v16 = vld [vmem:[#allocation7] sm:$0xff]  ;;  %v5608_v22 = vcombine.high %v1607_v10, %v1611_v12 }
 0x23c   :  { %v270_v17 = vrot.slane %v5692_v16, %v6132_v0  ;;  %v1149_v16 = vld [vmem:[#allocation8 + $0x138] sm:$0xff] }
 0x23e   :  { %4364 = vmatpush1.bf16.msra.mxu0 %v5557_v27  ;;  %4528 = vmatpush1.bf16.msra.mxu1 %v5559_v29  ;;  %v1615_v27 = vld [vmem:[#allocation8 + $0xfc8] sm:$0xff]  ;;  %v1088_v34 = vadd.f32 %v6105_v35, %v270_v17  ;;  %v1121_v35 = vld [vmem:[#allocation8 + $0x58] sm:$0xff] }
 0x23f   :  { %4365 = vmatprep.subr.bf16.mxu0 %v5566_v32  ;;  %4529 = vmatprep.subr.bf16.mxu1 %v5568_v33  ;;  %v1619_v29 = vld [vmem:[#allocation8 + $0xfe8] sm:$0xff]  ;;  %v5605_v32 = vcombine.low %v1606_v5, %v1610_v9  ;;  %v5607_v33 = vcombine.low %v1607_v10, %v1611_v12 }
 0x240   :  { %v5616_v37 = vcombine.high %v1615_v27, %v1619_v29  ;;  %v5615_v2 = vcombine.low %v1615_v27, %v1619_v29  ;;  %v1100_v48 = vmax.f32 %v1088_v34, 0.0  ;;  %v1156_v27 = vld [vmem:[#allocation8 + $0x170] sm:$0xff]  ;;  %v1153_v29 = vld [vmem:[#allocation8 + $0x158] sm:$0xff] }
 0x242   :  { %4366 = vmatpush1.bf16.msra.mxu0 %v5565_v40  ;;  %4530 = vmatpush1.bf16.msra.mxu1 %v5567_v44  ;;  %v1116_v40 = vld [vmem:[#allocation8 + $0x30] sm:$0xff]  ;;  %v1113_v44 = vld [vmem:[#allocation8 + $0x18] sm:$0xff]  ;;  %v6136_v55 = vpack.c.bf16 %v1100_v48, %v1100_v48 }
 0x243   :  { %4367 = vmatprep.subr.bf16.mxu0 %v5574_v45  ;;  %4531 = vmatprep.subr.bf16.mxu1 %v5576_v47  ;;  %v1117_v45 = vld [vmem:[#allocation8 + $0x38] sm:$0xff]  ;;  %v5613_v47 = vcombine.low %v1614_v20, %v1618_v21  ;;  %v5114_v24 = vcombine.high %v1112_v38, %v1116_v40  ;;  %v1152_v21 = vld [vmem:[#allocation8 + $0x150] sm:$0xff] }
 0x244   :  { %v5116_v49 = vcombine.high %v1113_v44, %v1117_v45  ;;  %v5115_v56 = vcombine.low %v1113_v44, %v1117_v45  ;;  %v1161_v44 = vld [vmem:[#allocation8 + $0x198] sm:$0xff] }
 0x245   :  { %v1165_v45 = vld [vmem:[#allocation8 + $0x1b8] sm:$0xff] }
 0x246   :  { %4368 = vmatpush1.bf16.msra.mxu0 %v5573_v50  ;;  %4532 = vmatpush1.bf16.msra.mxu1 %v5575_v51  ;;  %v1120_v50 = vld [vmem:[#allocation8 + $0x50] sm:$0xff] }
 0x247   :  { %4369 = vmatprep.subr.bf16.mxu0 %v5582_v52  ;;  %4533 = vmatprep.subr.bf16.mxu1 %v5584_v53  ;;  %v1124_v51 = vld [vmem:[#allocation8 + $0x70] sm:$0xff]  ;;  %v1125_v52 = vld [vmem:[#allocation8 + $0x78] sm:$0xff]  ;;  %v5113_v53 = vcombine.low %v1112_v38, %v1116_v40 }
 0x248   :  { %v5122_v57 = vcombine.high %v1120_v50, %v1124_v51  ;;  %v5124_v25 = vcombine.high %v1121_v35, %v1125_v52  ;;  %v5121_v62 = vcombine.low %v1120_v50, %v1124_v51  ;;  %v5123_v3 = vcombine.low %v1121_v35, %v1125_v52  ;;  %v1160_v38 = vld [vmem:[#allocation8 + $0x190] sm:$0xff]  ;;  %v1169_v51 = vld [vmem:[#allocation8 + $0x1d8] sm:$0xff] }
 0x249   :  { %v1164_v40 = vld [vmem:[#allocation8 + $0x1b0] sm:$0xff]  ;;  %v1173_v35 = vld [vmem:[#allocation8 + $0x1f8] sm:$0xff] }
 0x24a   :  { %4370 = vmatpush1.bf16.msra.mxu0 %v5581_v58  ;;  %4534 = vmatpush1.bf16.msra.mxu1 %v5583_v63  ;;  %v1128_v58 = vld [vmem:[#allocation8 + $0x90] sm:$0xff]  ;;  %v5162_v48 = vcombine.high %v1160_v38, %v1164_v40  ;;  %v5161_v52 = vcombine.low %v1160_v38, %v1164_v40  ;;  %v1209_v40 = vld [vmem:[#allocation8 + $0x318] sm:$0xff] }
 0x24b   :  { %4371 = vmatprep.subr.bf16.mxu0 %v5590_v59  ;;  %4535 = vmatprep.subr.bf16.mxu1 %v5592_v61  ;;  %v1132_v63 = vld [vmem:[#allocation8 + $0xb0] sm:$0xff]  ;;  %v1129_v59 = vld [vmem:[#allocation8 + $0x98] sm:$0xff] }
 0x24c   :  { %v1133_v61 = vld [vmem:[#allocation8 + $0xb8] sm:$0xff]  ;;  %v5130_v7 = vcombine.high %v1128_v58, %v1132_v63  ;;  %v5129_v5 = vcombine.low %v1128_v58, %v1132_v63  ;;  %v1172_v50 = vld [vmem:[#allocation8 + $0x1f0] sm:$0xff] }
 0x24d   :  { %v5132_v54 = vcombine.high %v1129_v59, %v1133_v61  ;;  %v5131_v9 = vcombine.low %v1129_v59, %v1133_v61  ;;  %v1180_v58 = vld [vmem:[#allocation8 + $0x230] sm:$0xff]  ;;  %v1177_v63 = vld [vmem:[#allocation8 + $0x218] sm:$0xff] }
 0x24e   :  { %4372 = vmatpush1.bf16.msra.mxu0 %v5589_v60  ;;  %4536 = vmatpush1.bf16.msra.mxu1 %v5591_v39  ;;  %v1136_v60 = vld [vmem:[#allocation8 + $0xd0] sm:$0xff]  ;;  %v1181_v59 = vld [vmem:[#allocation8 + $0x238] sm:$0xff] }
 0x24f   :  { %4373 = vmatprep.subr.bf16.mxu0 %v5598_v1  ;;  %4537 = vmatprep.subr.bf16.mxu1 %v5600_v4  ;;  %v1140_v39 = vld [vmem:[#allocation8 + $0xf0] sm:$0xff]  ;;  %v1137_v1 = vld [vmem:[#allocation8 + $0xd8] sm:$0xff] }
 0x250   :  { %v1141_v4 = vld [vmem:[#allocation8 + $0xf8] sm:$0xff]  ;;  %v5138_v10 = vcombine.high %v1136_v60, %v1140_v39  ;;  %v5137_v17 = vcombine.low %v1136_v60, %v1140_v39  ;;  %v1188_v60 = vld [vmem:[#allocation8 + $0x270] sm:$0xff] }
 0x251   :  { %v5140_v12 = vcombine.high %v1137_v1, %v1141_v4  ;;  %v1185_v39 = vld [vmem:[#allocation8 + $0x258] sm:$0xff]  ;;  %v1212_v38 = vld [vmem:[#allocation8 + $0x330] sm:$0xff] }
 0x252   :  { %4374 = vmatpush1.bf16.msra.mxu0 %v5597_v19  ;;  %4538 = vmatpush1.bf16.msra.mxu1 %v5599_v15  ;;  %v1144_v19 = vld [vmem:[#allocation8 + $0x110] sm:$0xff] }
 0x253   :  { %4375 = vmatprep.subr.bf16.mxu0 %v5606_v18  ;;  %4539 = vmatprep.subr.bf16.mxu1 %v5608_v22  ;;  %v1148_v15 = vld [vmem:[#allocation8 + $0x130] sm:$0xff]  ;;  %v5139_v18 = vcombine.low %v1137_v1, %v1141_v4  ;;  %v1189_v1 = vld [vmem:[#allocation8 + $0x278] sm:$0xff] }
 0x254   :  { %v5146_v22 = vcombine.high %v1144_v19, %v1148_v15 }
 0x256   :  { %4376 = vmatpush1.bf16.msra.mxu0 %v5605_v32  ;;  %4540 = vmatpush1.bf16.msra.mxu1 %v5607_v33  ;;  %v1157_v32 = vld [vmem:[#allocation8 + $0x178] sm:$0xff]  ;;  %v5145_v33 = vcombine.low %v1144_v19, %v1148_v15  ;;  %v1196_v19 = vld [vmem:[#allocation8 + $0x2b0] sm:$0xff] }
 0x257   :  { %4377 = vmatprep.subr.bf16.mxu0 %v5614_v36  ;;  %4541 = vmatprep.subr.bf16.mxu1 %v5616_v37  ;;  %v5154_v36 = vcombine.high %v1152_v21, %v1156_v27  ;;  %v5156_v37 = vcombine.high %v1153_v29, %v1157_v32  ;;  %v1193_v15 = vld [vmem:[#allocation8 + $0x298] sm:$0xff] }
 0x25a   :  { %4378 = vmatpush1.bf16.msra.mxu0 %v5613_v47  ;;  %4542 = vmatpush1.bf16.msra.mxu1 %v5615_v2  ;;  %v5153_v47 = vcombine.low %v1152_v21, %v1156_v27  ;;  %v5155_v2 = vcombine.low %v1153_v29, %v1157_v32  ;;  %v1204_v21 = vld [vmem:[#allocation8 + $0x2f0] sm:$0xff]  ;;  %v1201_v27 = vld [vmem:[#allocation8 + $0x2d8] sm:$0xff] }
 0x25b   :  { %4552 = vmatprep.subr.bf16.mxu0 %v5114_v24  ;;  %4716 = vmatprep.subr.bf16.mxu1 %v5116_v49  ;;  %v5164_v24 = vcombine.high %v1161_v44, %v1165_v45  ;;  %v1168_v49 = vld [vmem:[#allocation8 + $0x1d0] sm:$0xff]  ;;  %v1205_v29 = vld [vmem:[#allocation8 + $0x2f8] sm:$0xff] }
 0x25c   :  { %v5169_v61 = vcombine.low %v1168_v49, %v1172_v50 }
 0x25d   :  { %4380 = vmatmul.mubr.bf16.vlgmr.msra.gmra.mrb[8].mxu0 %v6136_v55  ;;  %4544 = vmatmul.mubr.bf16.vlgmr.msra.gmra.mrb[8].mxu1 %v6136_v55 }
 0x25e   :  { %4553 = vmatpush1.bf16.msra.mxu0 %v5113_v53  ;;  %4584 = vmatprep.mubr.bf16.mxu0 %v6064_v42  ;;  %v5163_v53 = vcombine.low %v1161_v44, %v1165_v45  ;;  %v1213_v44 = vld [vmem:[#allocation8 + $0x338] sm:$0xff] }
 0x25f   :  { %4717 = vmatpush1.bf16.msra.mxu1 %v5115_v56  ;;  %4748 = vmatprep.mubr.bf16.mxu1 %v6064_v42  ;;  %v1145_v42 = vld [vmem:[#allocation8 + $0x118] sm:$0xff]  ;;  %v5170_v56 = vcombine.high %v1168_v49, %v1172_v50  ;;  %v1220_v49 = vld [vmem:[#allocation8 + $0x370] sm:$0xff] }
 0x260   :  { %4554 = vmatprep.subr.bf16.mxu0 %v5122_v57  ;;  %4718 = vmatprep.subr.bf16.mxu1 %v5124_v25  ;;  %v5148_v20 = vcombine.high %v1145_v42, %v1149_v16  ;;  %v5147_v34 = vcombine.low %v1145_v42, %v1149_v16  ;;  %v5172_v57 = vcombine.high %v1169_v51, %v1173_v35  ;;  %v1176_v25 = vld [vmem:[#allocation8 + $0x210] sm:$0xff]  ;;  %v1197_v42 = vld [vmem:[#allocation8 + $0x2b8] sm:$0xff] }
 0x261   :  { %v5177_v4 = vcombine.low %v1176_v25, %v1180_v58  ;;  %v1217_v50 = vld [vmem:[#allocation8 + $0x358] sm:$0xff] }
 0x262   :  { %4555 = vmatpush1.bf16.msra.mxu0 %v5121_v62  ;;  %v5171_v62 = vcombine.low %v1169_v51, %v1173_v35  ;;  %v1221_v51 = vld [vmem:[#allocation8 + $0x378] sm:$0xff] }
 0x263   :  { %4719 = vmatpush1.bf16.msra.mxu1 %v5123_v3  ;;  %4556 = vmatprep.subr.bf16.mxu0 %v5130_v7  ;;  %v5178_v3 = vcombine.high %v1176_v25, %v1180_v58  ;;  %v5180_v7 = vcombine.high %v1177_v63, %v1181_v59  ;;  %v1228_v25 = vld [vmem:[#allocation8 + $0x3b0] sm:$0xff]  ;;  %v1225_v58 = vld [vmem:[#allocation8 + $0x398] sm:$0xff] }
 0x264   :  { %4720 = vmatprep.subr.bf16.mxu1 %v5132_v54  ;;  %v1184_v54 = vld [vmem:[#allocation8 + $0x250] sm:$0xff] }
 0x265   :  { %v5185_v16 = vcombine.low %v1184_v54, %v1188_v60 }
 0x266   :  { %4557 = vmatpush1.bf16.msra.mxu0 %v5129_v5  ;;  %v5179_v5 = vcombine.low %v1177_v63, %v1181_v59  ;;  %v1229_v63 = vld [vmem:[#allocation8 + $0x3b8] sm:$0xff] }
 0x267   :  { %4721 = vmatpush1.bf16.msra.mxu1 %v5131_v9  ;;  %4558 = vmatprep.subr.bf16.mxu0 %v5138_v10  ;;  %v5186_v9 = vcombine.high %v1184_v54, %v1188_v60  ;;  %v5188_v10 = vcombine.high %v1185_v39, %v1189_v1  ;;  %v1236_v54 = vld [vmem:[#allocation8 + $0x3f0] sm:$0xff]  ;;  %v1233_v60 = vld [vmem:[#allocation8 + $0x3d8] sm:$0xff] }
 0x268   :  { %4722 = vmatprep.subr.bf16.mxu1 %v5140_v12  ;;  %v1192_v12 = vld [vmem:[#allocation8 + $0x290] sm:$0xff] }
 0x269   :  { %v5193_v32 = vcombine.low %v1192_v12, %v1196_v19 }
 0x26a   :  { %4559 = vmatpush1.bf16.msra.mxu0 %v5137_v17  ;;  %v5187_v17 = vcombine.low %v1185_v39, %v1189_v1  ;;  %v1237_v39 = vld [vmem:[#allocation8 + $0x3f8] sm:$0xff] }
 0x26b   :  { %4723 = vmatpush1.bf16.msra.mxu1 %v5139_v18  ;;  %4560 = vmatprep.subr.bf16.mxu0 %v5146_v22  ;;  %v5194_v18 = vcombine.high %v1192_v12, %v1196_v19  ;;  %v5196_v22 = vcombine.high %v1193_v15, %v1197_v42  ;;  %v1244_v12 = vld [vmem:[#allocation8 + $0x430] sm:$0xff]  ;;  %v1241_v19 = vld [vmem:[#allocation8 + $0x418] sm:$0xff] }
 0x26c   :  { %4724 = vmatprep.subr.bf16.mxu1 %v5148_v20  ;;  %v1200_v20 = vld [vmem:[#allocation8 + $0x2d0] sm:$0xff] }
 0x26d   :  { %v5201_v45 = vcombine.low %v1200_v20, %v1204_v21 }
 0x26e   :  { %4561 = vmatpush1.bf16.msra.mxu0 %v5145_v33  ;;  %v5195_v33 = vcombine.low %v1193_v15, %v1197_v42  ;;  %v1245_v15 = vld [vmem:[#allocation8 + $0x438] sm:$0xff] }
 0x26f   :  { %4725 = vmatpush1.bf16.msra.mxu1 %v5147_v34  ;;  %4562 = vmatprep.subr.bf16.mxu0 %v5154_v36  ;;  %v5202_v34 = vcombine.high %v1200_v20, %v1204_v21  ;;  %v5204_v36 = vcombine.high %v1201_v27, %v1205_v29  ;;  %v1252_v20 = vld [vmem:[#allocation8 + $0x470] sm:$0xff] }
 0x270   :  { %4726 = vmatprep.subr.bf16.mxu1 %v5156_v37  ;;  %v1208_v37 = vld [vmem:[#allocation8 + $0x310] sm:$0xff] }
 0x271   :  { %v5209_v35 = vcombine.low %v1208_v37, %v1212_v38 }
 0x272   :  { %4563 = vmatpush1.bf16.msra.mxu0 %v5153_v47  ;;  %v5203_v47 = vcombine.low %v1201_v27, %v1205_v29  ;;  %v1249_v27 = vld [vmem:[#allocation8 + $0x458] sm:$0xff] }
 0x273   :  { %4727 = vmatpush1.bf16.msra.mxu1 %v5155_v2  ;;  %4564 = vmatprep.subr.bf16.mxu0 %v5162_v48  ;;  %v5210_v2 = vcombine.high %v1208_v37, %v1212_v38  ;;  %v5212_v48 = vcombine.high %v1209_v40, %v1213_v44  ;;  %v1253_v29 = vld [vmem:[#allocation8 + $0x478] sm:$0xff] }
 0x274   :  { %4728 = vmatprep.subr.bf16.mxu1 %v5164_v24  ;;  %v1216_v24 = vld [vmem:[#allocation8 + $0x350] sm:$0xff]  ;;  %v5252_v37 = vcombine.high %v1249_v27, %v1253_v29  ;;  %v1257_v38 = vld [vmem:[#allocation8 + $0x498] sm:$0xff] }
 0x275   :  { %v5217_v59 = vcombine.low %v1216_v24, %v1220_v49 }
 0x276   :  { %4565 = vmatpush1.bf16.msra.mxu0 %v5161_v52  ;;  %v5211_v52 = vcombine.low %v1209_v40, %v1213_v44  ;;  %v1261_v40 = vld [vmem:[#allocation8 + $0x4b8] sm:$0xff] }
 0x277   :  { %4729 = vmatpush1.bf16.msra.mxu1 %v5163_v53  ;;  %4566 = vmatprep.subr.bf16.mxu0 %v5170_v56  ;;  %v5218_v53 = vcombine.high %v1216_v24, %v1220_v49  ;;  %v5220_v56 = vcombine.high %v1217_v50, %v1221_v51  ;;  %v1268_v24 = vld [vmem:[#allocation8 + $0x4f0] sm:$0xff]  ;;  %v1265_v49 = vld [vmem:[#allocation8 + $0x4d8] sm:$0xff] }
 0x278   :  { %4730 = vmatprep.subr.bf16.mxu1 %v5172_v57  ;;  %v1224_v57 = vld [vmem:[#allocation8 + $0x390] sm:$0xff] }
 0x279   :  { %v5225_v1 = vcombine.low %v1224_v57, %v1228_v25 }
 0x27a   :  { %4567 = vmatpush1.bf16.msra.mxu0 %v5169_v61  ;;  %v5219_v61 = vcombine.low %v1217_v50, %v1221_v51  ;;  %v1269_v50 = vld [vmem:[#allocation8 + $0x4f8] sm:$0xff] }
 0x27b   :  { %4731 = vmatpush1.bf16.msra.mxu1 %v5171_v62  ;;  %4568 = vmatprep.subr.bf16.mxu0 %v5178_v3  ;;  %v5226_v62 = vcombine.high %v1224_v57, %v1228_v25  ;;  %v5228_v3 = vcombine.high %v1225_v58, %v1229_v63  ;;  %v1273_v57 = vld [vmem:[#allocation8 + $0x518] sm:$0xff] }
 0x27c   :  { %4732 = vmatprep.subr.bf16.mxu1 %v5180_v7  ;;  %v1232_v7 = vld [vmem:[#allocation8 + $0x3d0] sm:$0xff]  ;;  %v1277_v25 = vld [vmem:[#allocation8 + $0x538] sm:$0xff] }
 0x27d   :  { %v5233_v42 = vcombine.low %v1232_v7, %v1236_v54 }
 0x27e   :  { %4569 = vmatpush1.bf16.msra.mxu0 %v5177_v4  ;;  %v5227_v4 = vcombine.low %v1225_v58, %v1229_v63  ;;  %v5267_v58 = vcombine.low %v1265_v49, %v1269_v50 }
 0x27f   :  { %4733 = vmatpush1.bf16.msra.mxu1 %v5179_v5  ;;  %4570 = vmatprep.subr.bf16.mxu0 %v5186_v9  ;;  %v5234_v5 = vcombine.high %v1232_v7, %v1236_v54  ;;  %v5236_v9 = vcombine.high %v1233_v60, %v1237_v39  ;;  %v1285_v7 = vld [vmem:[#allocation8 + $0x578] sm:$0xff] }
 0x280   :  { %4734 = vmatprep.subr.bf16.mxu1 %v5188_v10  ;;  %v1240_v10 = vld [vmem:[#allocation8 + $0x410] sm:$0xff] }
 0x281   :  { %v5241_v21 = vcombine.low %v1240_v10, %v1244_v12 }
 0x282   :  { %4571 = vmatpush1.bf16.msra.mxu0 %v5185_v16  ;;  %v5235_v16 = vcombine.low %v1233_v60, %v1237_v39  ;;  %v5275_v60 = vcombine.low %v1273_v57, %v1277_v25 }
 0x283   :  { %4735 = vmatpush1.bf16.msra.mxu1 %v5187_v17  ;;  %4572 = vmatprep.subr.bf16.mxu0 %v5194_v18  ;;  %v5242_v17 = vcombine.high %v1240_v10, %v1244_v12  ;;  %v5244_v18 = vcombine.high %v1241_v19, %v1245_v15  ;;  %v1293_v10 = vld [vmem:[#allocation8 + $0x5b8] sm:$0xff] }
 0x284   :  { %4736 = vmatprep.subr.bf16.mxu1 %v5196_v22  ;;  %v1248_v22 = vld [vmem:[#allocation8 + $0x450] sm:$0xff] }
 0x285   :  { %v5249_v44 = vcombine.low %v1248_v22, %v1252_v20 }
 0x286   :  { %4573 = vmatpush1.bf16.msra.mxu0 %v5193_v32  ;;  %v5243_v32 = vcombine.low %v1241_v19, %v1245_v15 }
 0x287   :  { %4737 = vmatpush1.bf16.msra.mxu1 %v5195_v33  ;;  %4574 = vmatprep.subr.bf16.mxu0 %v5202_v34  ;;  %v5250_v33 = vcombine.high %v1248_v22, %v1252_v20  ;;  %v1256_v34 = vld [vmem:[#allocation8 + $0x490] sm:$0xff]  ;;  %v1301_v22 = vld [vmem:[#allocation8 + $0x5f8] sm:$0xff] }
 0x288   :  { %4738 = vmatprep.subr.bf16.mxu1 %v5204_v36  ;;  %v1260_v36 = vld [vmem:[#allocation8 + $0x4b0] sm:$0xff] }
 0x289   :  { %v5257_v51 = vcombine.low %v1256_v34, %v1260_v36 }
 0x28a   :  { %4575 = vmatpush1.bf16.msra.mxu0 %v5201_v45  ;;  %v5251_v45 = vcombine.low %v1249_v27, %v1253_v29 }
 0x28b   :  { %4739 = vmatpush1.bf16.msra.mxu1 %v5203_v47  ;;  %4576 = vmatprep.subr.bf16.mxu0 %v5210_v2  ;;  %v5258_v47 = vcombine.high %v1256_v34, %v1260_v36  ;;  %v5260_v2 = vcombine.high %v1257_v38, %v1261_v40  ;;  %v1305_v34 = vld [vmem:[#allocation8 + $0x618] sm:$0xff] }
 0x28c   :  { %4740 = vmatprep.subr.bf16.mxu1 %v5212_v48  ;;  %v1264_v48 = vld [vmem:[#allocation8 + $0x4d0] sm:$0xff]  ;;  %v1309_v36 = vld [vmem:[#allocation8 + $0x638] sm:$0xff] }
 0x28e   :  { %4577 = vmatpush1.bf16.msra.mxu0 %v5209_v35  ;;  %v5266_v35 = vcombine.high %v1264_v48, %v1268_v24 }
 0x28f   :  { %4741 = vmatpush1.bf16.msra.mxu1 %v5211_v52  ;;  %4578 = vmatprep.subr.bf16.mxu0 %v5218_v53  ;;  %v5268_v52 = vcombine.high %v1265_v49, %v1269_v50  ;;  %v1272_v53 = vld [vmem:[#allocation8 + $0x510] sm:$0xff]  ;;  %v5307_v49 = vcombine.low %v1305_v34, %v1309_v36 }
 0x290   :  { %4742 = vmatprep.subr.bf16.mxu1 %v5220_v56  ;;  %v1276_v56 = vld [vmem:[#allocation8 + $0x530] sm:$0xff] }
 0x291   :  { %v5274_v63 = vcombine.high %v1272_v53, %v1276_v56  ;;  %v5273_v54 = vcombine.low %v1272_v53, %v1276_v56  ;;  %v1325_v53 = vld [vmem:[#allocation8 + $0x6b8] sm:$0xff] }
 0x292   :  { %4579 = vmatpush1.bf16.msra.mxu0 %v5217_v59  ;;  %v5276_v59 = vcombine.high %v1273_v57, %v1277_v25 }
 0x293   :  { %4743 = vmatpush1.bf16.msra.mxu1 %v5219_v61  ;;  %4580 = vmatprep.subr.bf16.mxu0 %v5226_v62  ;;  %v1280_v61 = vld [vmem:[#allocation8 + $0x550] sm:$0xff] }
 0x294   :  { %4744 = vmatprep.subr.bf16.mxu1 %v5228_v3  ;;  %v1284_v62 = vld [vmem:[#allocation8 + $0x570] sm:$0xff]  ;;  %v1281_v3 = vld [vmem:[#allocation8 + $0x558] sm:$0xff] }
 0x295   :  { %v5282_v39 = vcombine.high %v1280_v61, %v1284_v62  ;;  %v5281_v12 = vcombine.low %v1280_v61, %v1284_v62  ;;  %v5283_v19 = vcombine.low %v1281_v3, %v1285_v7  ;;  %v1333_v61 = vld [vmem:[#allocation8 + $0x6f8] sm:$0xff] }
 0x296   :  { %4581 = vmatpush1.bf16.msra.mxu0 %v5225_v1  ;;  %v5284_v1 = vcombine.high %v1281_v3, %v1285_v7 }
 0x297   :  { %4745 = vmatpush1.bf16.msra.mxu1 %v5227_v4  ;;  %4582 = vmatprep.subr.bf16.mxu0 %v5234_v5  ;;  %v1288_v4 = vld [vmem:[#allocation8 + $0x590] sm:$0xff] }
 0x298   :  { %4746 = vmatprep.subr.bf16.mxu1 %v5236_v9  ;;  %v1292_v5 = vld [vmem:[#allocation8 + $0x5b0] sm:$0xff]  ;;  %v1289_v9 = vld [vmem:[#allocation8 + $0x598] sm:$0xff] }
 0x299   :  { %v5290_v15 = vcombine.high %v1288_v4, %v1292_v5  ;;  %v5289_v20 = vcombine.low %v1288_v4, %v1292_v5  ;;  %v1341_v4 = vld [vmem:[#allocation8 + $0x738] sm:$0xff] }
 0x29a   :  { %4583 = vmatpush1.bf16.msra.mxu0 %v5233_v42  ;;  %v5292_v42 = vcombine.high %v1289_v9, %v1293_v10 }
 0x29b   :  { %4747 = vmatpush1.bf16.msra.mxu1 %v5235_v16  ;;  %4593 = vmatprep.subr.bf16.mxu0 %v5242_v17  ;;  %v1296_v16 = vld [vmem:[#allocation8 + $0x5d0] sm:$0xff] }
 0x29c   :  { %4757 = vmatprep.subr.bf16.mxu1 %v5244_v18  ;;  %v1300_v17 = vld [vmem:[#allocation8 + $0x5f0] sm:$0xff]  ;;  %v1297_v18 = vld [vmem:[#allocation8 + $0x5d8] sm:$0xff] }
 0x29d   :  { %4585 = vmatmul.mubr.bf16.vlgmr.msra.gmra.mrb[12].mxu0 %v6066_v43  ;;  %v5298_v27 = vcombine.high %v1296_v16, %v1300_v17  ;;  %v5300_v29 = vcombine.high %v1297_v18, %v1301_v22 }
 0x29e   :  { %4749 = vmatmul.mubr.bf16.vlgmr.msra.gmra.mrb[12].mxu1 %v6066_v43  ;;  %4594 = vmatpush1.bf16.msra.mxu0 %v5241_v21  ;;  %v5259_v43 = vcombine.low %v1257_v38, %v1261_v40  ;;  %v5291_v21 = vcombine.low %v1289_v9, %v1293_v10  ;;  %v5299_v38 = vcombine.low %v1297_v18, %v1301_v22 }
 0x29f   :  { %4625 = vmatprep.mubr.bf16.mxu0 %v6082_v6  ;;  %4758 = vmatpush1.bf16.msra.mxu1 %v5243_v32  ;;  %v1304_v32 = vld [vmem:[#allocation8 + $0x610] sm:$0xff] }
 0x2a0   :  { %4789 = vmatprep.mubr.bf16.mxu1 %v6082_v6  ;;  %4595 = vmatprep.subr.bf16.mxu0 %v5250_v33  ;;  %v5265_v6 = vcombine.low %v1264_v48, %v1268_v24  ;;  %v1308_v33 = vld [vmem:[#allocation8 + $0x630] sm:$0xff]  ;;  %v1317_v48 = vld [vmem:[#allocation8 + $0x678] sm:$0xff] }
 0x2a1   :  { %4759 = vmatprep.subr.bf16.mxu1 %v5252_v37  ;;  %v5297_v37 = vcombine.low %v1296_v16, %v1300_v17  ;;  %v5306_v40 = vcombine.high %v1304_v32, %v1308_v33  ;;  %v5305_v24 = vcombine.low %v1304_v32, %v1308_v33  ;;  %v1349_v16 = vld [vmem:[#allocation8 + $0x778] sm:$0xff] }
 0x2a2   :  { %4596 = vmatpush1.bf16.msra.mxu0 %v5249_v44  ;;  %v5308_v44 = vcombine.high %v1305_v34, %v1309_v36  ;;  %v1357_v32 = vld [vmem:[#allocation8 + $0x7b8] sm:$0xff] }
 0x2a3   :  { %4760 = vmatpush1.bf16.msra.mxu1 %v5251_v45  ;;  %4597 = vmatprep.subr.bf16.mxu0 %v5258_v47  ;;  %v1312_v45 = vld [vmem:[#allocation8 + $0x650] sm:$0xff] }
 0x2a4   :  { %4761 = vmatprep.subr.bf16.mxu1 %v5260_v2  ;;  %v1316_v47 = vld [vmem:[#allocation8 + $0x670] sm:$0xff]  ;;  %v1313_v2 = vld [vmem:[#allocation8 + $0x658] sm:$0xff] }
 0x2a5   :  { %v5314_v50 = vcombine.high %v1312_v45, %v1316_v47  ;;  %v5313_v56 = vcombine.low %v1312_v45, %v1316_v47  ;;  %v5315_v57 = vcombine.low %v1313_v2, %v1317_v48  ;;  %v1365_v45 = vld [vmem:[#allocation8 + $0x7f8] sm:$0xff] }
 0x2a6   :  { %4598 = vmatpush1.bf16.msra.mxu0 %v5257_v51  ;;  %v5316_v51 = vcombine.high %v1313_v2, %v1317_v48 }
 0x2a7   :  { %4762 = vmatpush1.bf16.msra.mxu1 %v5259_v43  ;;  %4599 = vmatprep.subr.bf16.mxu0 %v5266_v35  ;;  %v1320_v43 = vld [vmem:[#allocation8 + $0x690] sm:$0xff] }
 0x2a8   :  { %4763 = vmatprep.subr.bf16.mxu1 %v5268_v52  ;;  %v1324_v35 = vld [vmem:[#allocation8 + $0x6b0] sm:$0xff]  ;;  %v1321_v52 = vld [vmem:[#allocation8 + $0x698] sm:$0xff] }
 0x2a9   :  { %v5322_v25 = vcombine.high %v1320_v43, %v1324_v35  ;;  %v5321_v62 = vcombine.low %v1320_v43, %v1324_v35  ;;  %v5323_v3 = vcombine.low %v1321_v52, %v1325_v53  ;;  %v1373_v43 = vld [vmem:[#allocation8 + $0x838] sm:$0xff] }
 0x2aa   :  { %4600 = vmatpush1.bf16.msra.mxu0 %v5265_v6  ;;  %v5324_v6 = vcombine.high %v1321_v52, %v1325_v53 }
 0x2ab   :  { %4764 = vmatpush1.bf16.msra.mxu1 %v5267_v58  ;;  %4601 = vmatprep.subr.bf16.mxu0 %v5274_v63  ;;  %v1328_v58 = vld [vmem:[#allocation8 + $0x6d0] sm:$0xff] }
 0x2ac   :  { %4765 = vmatprep.subr.bf16.mxu1 %v5276_v59  ;;  %v1332_v63 = vld [vmem:[#allocation8 + $0x6f0] sm:$0xff]  ;;  %v1329_v59 = vld [vmem:[#allocation8 + $0x6d8] sm:$0xff] }
 0x2ad   :  { %v5330_v7 = vcombine.high %v1328_v58, %v1332_v63  ;;  %v5329_v5 = vcombine.low %v1328_v58, %v1332_v63  ;;  %v5331_v9 = vcombine.low %v1329_v59, %v1333_v61  ;;  %v1377_v58 = vld [vmem:[#allocation8 + $0x858] sm:$0xff] }
 0x2ae   :  { %4602 = vmatpush1.bf16.msra.mxu0 %v5273_v54  ;;  %v5332_v54 = vcombine.high %v1329_v59, %v1333_v61  ;;  %v1381_v63 = vld [vmem:[#allocation8 + $0x878] sm:$0xff] }
 0x2af   :  { %4766 = vmatpush1.bf16.msra.mxu1 %v5275_v60  ;;  %4603 = vmatprep.subr.bf16.mxu0 %v5282_v39  ;;  %v1336_v60 = vld [vmem:[#allocation8 + $0x710] sm:$0xff] }
 0x2b0   :  { %4767 = vmatprep.subr.bf16.mxu1 %v5284_v1  ;;  %v1340_v39 = vld [vmem:[#allocation8 + $0x730] sm:$0xff]  ;;  %v1337_v1 = vld [vmem:[#allocation8 + $0x718] sm:$0xff] }
 0x2b1   :  { %v5338_v10 = vcombine.high %v1336_v60, %v1340_v39  ;;  %v5337_v17 = vcombine.low %v1336_v60, %v1340_v39  ;;  %v5339_v18 = vcombine.low %v1337_v1, %v1341_v4  ;;  %v1389_v60 = vld [vmem:[#allocation8 + $0x8b8] sm:$0xff] }
 0x2b2   :  { %4604 = vmatpush1.bf16.msra.mxu0 %v5281_v12  ;;  %v5340_v12 = vcombine.high %v1337_v1, %v1341_v4  ;;  %v5379_v1 = vcombine.low %v1377_v58, %v1381_v63 }
 0x2b3   :  { %4768 = vmatpush1.bf16.msra.mxu1 %v5283_v19  ;;  %4605 = vmatprep.subr.bf16.mxu0 %v5290_v15  ;;  %v1344_v19 = vld [vmem:[#allocation8 + $0x750] sm:$0xff] }
 0x2b4   :  { %4769 = vmatprep.subr.bf16.mxu1 %v5292_v42  ;;  %v1348_v15 = vld [vmem:[#allocation8 + $0x770] sm:$0xff]  ;;  %v1345_v42 = vld [vmem:[#allocation8 + $0x758] sm:$0xff] }
 0x2b5   :  { %v5346_v22 = vcombine.high %v1344_v19, %v1348_v15  ;;  %v5345_v33 = vcombine.low %v1344_v19, %v1348_v15  ;;  %v5347_v34 = vcombine.low %v1345_v42, %v1349_v16  ;;  %v1397_v19 = vld [vmem:[#allocation8 + $0x8f8] sm:$0xff] }
 0x2b6   :  { %4606 = vmatpush1.bf16.msra.mxu0 %v5289_v20  ;;  %v5348_v20 = vcombine.high %v1345_v42, %v1349_v16 }
 0x2b7   :  { %4770 = vmatpush1.bf16.msra.mxu1 %v5291_v21  ;;  %4607 = vmatprep.subr.bf16.mxu0 %v5298_v27  ;;  %v1352_v21 = vld [vmem:[#allocation8 + $0x790] sm:$0xff] }
 0x2b8   :  { %4771 = vmatprep.subr.bf16.mxu1 %v5300_v29  ;;  %v1356_v27 = vld [vmem:[#allocation8 + $0x7b0] sm:$0xff]  ;;  %v1353_v29 = vld [vmem:[#allocation8 + $0x798] sm:$0xff] }
 0x2b9   :  { %v5354_v36 = vcombine.high %v1352_v21, %v1356_v27  ;;  %v5353_v47 = vcombine.low %v1352_v21, %v1356_v27  ;;  %v5355_v2 = vcombine.low %v1353_v29, %v1357_v32 }
 0x2ba   :  { %4608 = vmatpush1.bf16.msra.mxu0 %v5297_v37  ;;  %v5356_v37 = vcombine.high %v1353_v29, %v1357_v32  ;;  %v1408_v32 = vld [vmem:[#allocation8 + $0x950] sm:$0xff] }
 0x2bb   :  { %4772 = vmatpush1.bf16.msra.mxu1 %v5299_v38  ;;  %4609 = vmatprep.subr.bf16.mxu0 %v5306_v40  ;;  %v1360_v38 = vld [vmem:[#allocation8 + $0x7d0] sm:$0xff] }
 0x2bc   :  { %4773 = vmatprep.subr.bf16.mxu1 %v5308_v44  ;;  %v1364_v40 = vld [vmem:[#allocation8 + $0x7f0] sm:$0xff]  ;;  %v1361_v44 = vld [vmem:[#allocation8 + $0x7d8] sm:$0xff] }
 0x2bd   :  { %v5362_v48 = vcombine.high %v1360_v38, %v1364_v40  ;;  %v5361_v35 = vcombine.low %v1360_v38, %v1364_v40  ;;  %v5363_v52 = vcombine.low %v1361_v44, %v1365_v45 }
 0x2be   :  { %4610 = vmatpush1.bf16.msra.mxu0 %v5305_v24  ;;  %v5364_v24 = vcombine.high %v1361_v44, %v1365_v45  ;;  %v1416_v45 = vld [vmem:[#allocation8 + $0x990] sm:$0xff] }
 0x2bf   :  { %4774 = vmatpush1.bf16.msra.mxu1 %v5307_v49  ;;  %4611 = vmatprep.subr.bf16.mxu0 %v5314_v50  ;;  %v1368_v49 = vld [vmem:[#allocation8 + $0x810] sm:$0xff] }
 0x2c0   :  { %4775 = vmatprep.subr.bf16.mxu1 %v5316_v51  ;;  %v1372_v50 = vld [vmem:[#allocation8 + $0x830] sm:$0xff]  ;;  %v1369_v51 = vld [vmem:[#allocation8 + $0x818] sm:$0xff] }
 0x2c1   :  { %v5370_v53 = vcombine.high %v1368_v49, %v1372_v50  ;;  %v5371_v59 = vcombine.low %v1369_v51, %v1373_v43 }
 0x2c2   :  { %4612 = vmatpush1.bf16.msra.mxu0 %v5313_v56  ;;  %v5372_v56 = vcombine.high %v1369_v51, %v1373_v43  ;;  %v1424_v43 = vld [vmem:[#allocation8 + $0x9d0] sm:$0xff] }
 0x2c3   :  { %4776 = vmatpush1.bf16.msra.mxu1 %v5315_v57  ;;  %4613 = vmatprep.subr.bf16.mxu0 %v5322_v25  ;;  %v1376_v57 = vld [vmem:[#allocation8 + $0x850] sm:$0xff] }
 0x2c4   :  { %4777 = vmatprep.subr.bf16.mxu1 %v5324_v6  ;;  %v1380_v25 = vld [vmem:[#allocation8 + $0x870] sm:$0xff]  ;;  %v5369_v6 = vcombine.low %v1368_v49, %v1372_v50 }
 0x2c5   :  { %v5378_v61 = vcombine.high %v1376_v57, %v1380_v25  ;;  %v5377_v39 = vcombine.low %v1376_v57, %v1380_v25 }
 0x2c6   :  { %4614 = vmatpush1.bf16.msra.mxu0 %v5321_v62  ;;  %v1384_v62 = vld [vmem:[#allocation8 + $0x890] sm:$0xff] }
 0x2c7   :  { %4778 = vmatpush1.bf16.msra.mxu1 %v5323_v3  ;;  %4615 = vmatprep.subr.bf16.mxu0 %v5330_v7  ;;  %v1388_v3 = vld [vmem:[#allocation8 + $0x8b0] sm:$0xff]  ;;  %v5380_v7 = vcombine.high %v1377_v58, %v1381_v63 }
 0x2c8   :  { %4779 = vmatprep.subr.bf16.mxu1 %v5332_v54  ;;  %v1385_v54 = vld [vmem:[#allocation8 + $0x898] sm:$0xff]  ;;  %v5386_v4 = vcombine.high %v1384_v62, %v1388_v3  ;;  %v5385_v15 = vcombine.low %v1384_v62, %v1388_v3  ;;  %v1432_v58 = vld [vmem:[#allocation8 + $0xa10] sm:$0xff] }
 0x2c9   :  { %v1436_v63 = vld [vmem:[#allocation8 + $0xa30] sm:$0xff] }
 0x2ca   :  { %4616 = vmatpush1.bf16.msra.mxu0 %v5329_v5  ;;  %v5388_v5 = vcombine.high %v1385_v54, %v1389_v60 }
 0x2cb   :  { %4780 = vmatpush1.bf16.msra.mxu1 %v5331_v9  ;;  %4617 = vmatprep.subr.bf16.mxu0 %v5338_v10  ;;  %v1392_v9 = vld [vmem:[#allocation8 + $0x8d0] sm:$0xff] }
 0x2cc   :  { %4781 = vmatprep.subr.bf16.mxu1 %v5340_v12  ;;  %v1396_v10 = vld [vmem:[#allocation8 + $0x8f0] sm:$0xff]  ;;  %v1393_v12 = vld [vmem:[#allocation8 + $0x8d8] sm:$0xff] }
 0x2cd   :  { %v5394_v42 = vcombine.high %v1392_v9, %v1396_v10  ;;  %v5396_v16 = vcombine.high %v1393_v12, %v1397_v19  ;;  %v5395_v21 = vcombine.low %v1393_v12, %v1397_v19  ;;  %v1448_v19 = vld [vmem:[#allocation8 + $0xa90] sm:$0xff] }
 0x2ce   :  { %4618 = vmatpush1.bf16.msra.mxu0 %v5337_v17  ;;  %v1400_v17 = vld [vmem:[#allocation8 + $0x910] sm:$0xff] }
 0x2cf   :  { %4782 = vmatpush1.bf16.msra.mxu1 %v5339_v18  ;;  %4619 = vmatprep.subr.bf16.mxu0 %v5346_v22  ;;  %v1404_v18 = vld [vmem:[#allocation8 + $0x930] sm:$0xff]  ;;  %v1401_v22 = vld [vmem:[#allocation8 + $0x918] sm:$0xff] }
 0x2d0   :  { %4783 = vmatprep.subr.bf16.mxu1 %v5348_v20  ;;  %v1405_v20 = vld [vmem:[#allocation8 + $0x938] sm:$0xff]  ;;  %v5402_v27 = vcombine.high %v1400_v17, %v1404_v18 }
 0x2d1   :  { %v5404_v29 = vcombine.high %v1401_v22, %v1405_v20  ;;  %v5403_v38 = vcombine.low %v1401_v22, %v1405_v20  ;;  %v1456_v20 = vld [vmem:[#allocation8 + $0xad0] sm:$0xff] }
 0x2d2   :  { %4620 = vmatpush1.bf16.msra.mxu0 %v5345_v33  ;;  %v1412_v33 = vld [vmem:[#allocation8 + $0x970] sm:$0xff] }
 0x2d3   :  { %4784 = vmatpush1.bf16.msra.mxu1 %v5347_v34  ;;  %4621 = vmatprep.subr.bf16.mxu0 %v5354_v36  ;;  %v1409_v34 = vld [vmem:[#allocation8 + $0x958] sm:$0xff]  ;;  %v5410_v40 = vcombine.high %v1408_v32, %v1412_v33 }
 0x2d4   :  { %4785 = vmatprep.subr.bf16.mxu1 %v5356_v37  ;;  %v1413_v36 = vld [vmem:[#allocation8 + $0x978] sm:$0xff]  ;;  %v5401_v37 = vcombine.low %v1400_v17, %v1404_v18 }
 0x2d5   :  { %v5412_v44 = vcombine.high %v1409_v34, %v1413_v36  ;;  %v5411_v49 = vcombine.low %v1409_v34, %v1413_v36  ;;  %v1464_v36 = vld [vmem:[#allocation8 + $0xb10] sm:$0xff] }
 0x2d6   :  { %4622 = vmatpush1.bf16.msra.mxu0 %v5353_v47  ;;  %v1420_v47 = vld [vmem:[#allocation8 + $0x9b0] sm:$0xff] }
 0x2d7   :  { %4786 = vmatpush1.bf16.msra.mxu1 %v5355_v2  ;;  %4623 = vmatprep.subr.bf16.mxu0 %v5362_v48  ;;  %v1417_v2 = vld [vmem:[#allocation8 + $0x998] sm:$0xff]  ;;  %v5418_v50 = vcombine.high %v1416_v45, %v1420_v47 }
 0x2d8   :  { %4787 = vmatprep.subr.bf16.mxu1 %v5364_v24  ;;  %v1421_v48 = vld [vmem:[#allocation8 + $0x9b8] sm:$0xff]  ;;  %v5409_v24 = vcombine.low %v1408_v32, %v1412_v33 }
 0x2d9   :  { %v5420_v51 = vcombine.high %v1417_v2, %v1421_v48  ;;  %v5419_v57 = vcombine.low %v1417_v2, %v1421_v48  ;;  %v1472_v48 = vld [vmem:[#allocation8 + $0xb50] sm:$0xff] }
 0x2da   :  { %4624 = vmatpush1.bf16.msra.mxu0 %v5361_v35  ;;  %v1428_v35 = vld [vmem:[#allocation8 + $0x9f0] sm:$0xff] }
 0x2db   :  { %4788 = vmatpush1.bf16.msra.mxu1 %v5363_v52  ;;  %4634 = vmatprep.subr.bf16.mxu0 %v5370_v53  ;;  %v1425_v52 = vld [vmem:[#allocation8 + $0x9d8] sm:$0xff]  ;;  %v5426_v25 = vcombine.high %v1424_v43, %v1428_v35  ;;  %v5425_v62 = vcombine.low %v1424_v43, %v1428_v35 }
 0x2dc   :  { %4798 = vmatprep.subr.bf16.mxu1 %v5372_v56  ;;  %v1429_v53 = vld [vmem:[#allocation8 + $0x9f8] sm:$0xff]  ;;  %v5417_v56 = vcombine.low %v1416_v45, %v1420_v47 }
 0x2dd   :  { %4626 = vmatmul.mubr.bf16.vlgmr.msra.gmra.mrb[12].mxu0 %v6099_v13  ;;  %v5427_v3 = vcombine.low %v1425_v52, %v1429_v53 }
 0x2de   :  { %4790 = vmatmul.mubr.bf16.vlgmr.msra.gmra.mrb[12].mxu1 %v6099_v13  ;;  %4635 = vmatpush1.bf16.msra.mxu0 %v5369_v6  ;;  %v5387_v13 = vcombine.low %v1385_v54, %v1389_v60  ;;  %v5428_v6 = vcombine.high %v1425_v52, %v1429_v53  ;;  %v1440_v60 = vld [vmem:[#allocation8 + $0xa50] sm:$0xff] }
 0x2df   :  { %4666 = vmatprep.mubr.bf16.mxu0 %v6101_v28  ;;  %4799 = vmatpush1.bf16.msra.mxu1 %v5371_v59  ;;  %v1433_v59 = vld [vmem:[#allocation8 + $0xa18] sm:$0xff]  ;;  %v1480_v53 = vld [vmem:[#allocation8 + $0xb90] sm:$0xff] }
 0x2e0   :  { %4830 = vmatprep.mubr.bf16.mxu1 %v6101_v28  ;;  %4636 = vmatprep.subr.bf16.mxu0 %v5378_v61  ;;  %v5393_v28 = vcombine.low %v1392_v9, %v1396_v10  ;;  %v1437_v61 = vld [vmem:[#allocation8 + $0xa38] sm:$0xff] }
 0x2e1   :  { %4800 = vmatprep.subr.bf16.mxu1 %v5380_v7  ;;  %v5434_v7 = vcombine.high %v1432_v58, %v1436_v63  ;;  %v5436_v54 = vcombine.high %v1433_v59, %v1437_v61  ;;  %v5435_v9 = vcombine.low %v1433_v59, %v1437_v61  ;;  %v1488_v61 = vld [vmem:[#allocation8 + $0xbd0] sm:$0xff] }
 0x2e2   :  { %4637 = vmatpush1.bf16.msra.mxu0 %v5377_v39  ;;  %v1444_v39 = vld [vmem:[#allocation8 + $0xa70] sm:$0xff] }
 0x2e3   :  { %4801 = vmatpush1.bf16.msra.mxu1 %v5379_v1  ;;  %4638 = vmatprep.subr.bf16.mxu0 %v5386_v4  ;;  %v1441_v1 = vld [vmem:[#allocation8 + $0xa58] sm:$0xff]  ;;  %v5442_v10 = vcombine.high %v1440_v60, %v1444_v39 }
 0x2e4   :  { %4802 = vmatprep.subr.bf16.mxu1 %v5388_v5  ;;  %v1445_v4 = vld [vmem:[#allocation8 + $0xa78] sm:$0xff]  ;;  %v5433_v5 = vcombine.low %v1432_v58, %v1436_v63 }
 0x2e5   :  { %v5444_v12 = vcombine.high %v1441_v1, %v1445_v4  ;;  %v5443_v17 = vcombine.low %v1441_v1, %v1445_v4  ;;  %v1496_v4 = vld [vmem:[#allocation8 + $0xc10] sm:$0xff] }
 0x2e6   :  { %4639 = vmatpush1.bf16.msra.mxu0 %v5385_v15  ;;  %v1452_v15 = vld [vmem:[#allocation8 + $0xab0] sm:$0xff] }
 0x2e7   :  { %4803 = vmatpush1.bf16.msra.mxu1 %v5387_v13  ;;  %4640 = vmatprep.subr.bf16.mxu0 %v5394_v42  ;;  %v1449_v13 = vld [vmem:[#allocation8 + $0xa98] sm:$0xff]  ;;  %v5450_v18 = vcombine.high %v1448_v19, %v1452_v15 }
 0x2e8   :  { %4804 = vmatprep.subr.bf16.mxu1 %v5396_v16  ;;  %v1453_v42 = vld [vmem:[#allocation8 + $0xab8] sm:$0xff]  ;;  %v5441_v16 = vcombine.low %v1440_v60, %v1444_v39 }
 0x2e9   :  { %v5452_v22 = vcombine.high %v1449_v13, %v1453_v42  ;;  %v5451_v32 = vcombine.low %v1449_v13, %v1453_v42  ;;  %v1504_v42 = vld [vmem:[#allocation8 + $0xc50] sm:$0xff] }
 0x2ea   :  { %4641 = vmatpush1.bf16.msra.mxu0 %v5393_v28  ;;  %v1460_v28 = vld [vmem:[#allocation8 + $0xaf0] sm:$0xff] }
 0x2eb   :  { %4805 = vmatpush1.bf16.msra.mxu1 %v5395_v21  ;;  %4642 = vmatprep.subr.bf16.mxu0 %v5402_v27  ;;  %v1457_v21 = vld [vmem:[#allocation8 + $0xad8] sm:$0xff]  ;;  %v5458_v33 = vcombine.high %v1456_v20, %v1460_v28 }
 0x2ec   :  { %4806 = vmatprep.subr.bf16.mxu1 %v5404_v29  ;;  %v1461_v27 = vld [vmem:[#allocation8 + $0xaf8] sm:$0xff]  ;;  %v5449_v29 = vcombine.low %v1448_v19, %v1452_v15 }
 0x2ed   :  { %v5460_v34 = vcombine.high %v1457_v21, %v1461_v27  ;;  %v5459_v45 = vcombine.low %v1457_v21, %v1461_v27  ;;  %v1512_v21 = vld [vmem:[#allocation8 + $0xc90] sm:$0xff] }
 0x2ee   :  { %4643 = vmatpush1.bf16.msra.mxu0 %v5401_v37  ;;  %v1468_v37 = vld [vmem:[#allocation8 + $0xb30] sm:$0xff] }
 0x2ef   :  { %4807 = vmatpush1.bf16.msra.mxu1 %v5403_v38  ;;  %4644 = vmatprep.subr.bf16.mxu0 %v5410_v40  ;;  %v1465_v38 = vld [vmem:[#allocation8 + $0xb18] sm:$0xff]  ;;  %v5466_v47 = vcombine.high %v1464_v36, %v1468_v37  ;;  %v1516_v27 = vld [vmem:[#allocation8 + $0xcb0] sm:$0xff] }
 0x2f0   :  { %4808 = vmatprep.subr.bf16.mxu1 %v5412_v44  ;;  %v1469_v40 = vld [vmem:[#allocation8 + $0xb38] sm:$0xff]  ;;  %v5457_v44 = vcombine.low %v1456_v20, %v1460_v28 }
 0x2f1   :  { %v5468_v2 = vcombine.high %v1465_v38, %v1469_v40  ;;  %v5467_v43 = vcombine.low %v1465_v38, %v1469_v40  ;;  %v1520_v40 = vld [vmem:[#allocation8 + $0xcd0] sm:$0xff] }
 0x2f2   :  { %4645 = vmatpush1.bf16.msra.mxu0 %v5409_v24  ;;  %v1476_v24 = vld [vmem:[#allocation8 + $0xb70] sm:$0xff] }
 0x2f3   :  { %4809 = vmatpush1.bf16.msra.mxu1 %v5411_v49  ;;  %4646 = vmatprep.subr.bf16.mxu0 %v5418_v50  ;;  %v1473_v49 = vld [vmem:[#allocation8 + $0xb58] sm:$0xff]  ;;  %v5474_v35 = vcombine.high %v1472_v48, %v1476_v24 }
 0x2f4   :  { %4810 = vmatprep.subr.bf16.mxu1 %v5420_v51  ;;  %v1477_v50 = vld [vmem:[#allocation8 + $0xb78] sm:$0xff]  ;;  %v5465_v51 = vcombine.low %v1464_v36, %v1468_v37  ;;  %v5514_v37 = vcombine.high %v1512_v21, %v1516_v27 }
 0x2f5   :  { %v5476_v52 = vcombine.high %v1473_v49, %v1477_v50  ;;  %v5475_v58 = vcombine.low %v1473_v49, %v1477_v50  ;;  %v1528_v49 = vld [vmem:[#allocation8 + $0xd10] sm:$0xff] }
 0x2f6   :  { %4647 = vmatpush1.bf16.msra.mxu0 %v5417_v56  ;;  %v1484_v56 = vld [vmem:[#allocation8 + $0xbb0] sm:$0xff] }
 0x2f7   :  { %4811 = vmatpush1.bf16.msra.mxu1 %v5419_v57  ;;  %4648 = vmatprep.subr.bf16.mxu0 %v5426_v25  ;;  %v1481_v57 = vld [vmem:[#allocation8 + $0xb98] sm:$0xff]  ;;  %v5482_v63 = vcombine.high %v1480_v53, %v1484_v56  ;;  %v1532_v50 = vld [vmem:[#allocation8 + $0xd30] sm:$0xff] }
 0x2f8   :  { %4812 = vmatprep.subr.bf16.mxu1 %v5428_v6  ;;  %v1485_v25 = vld [vmem:[#allocation8 + $0xbb8] sm:$0xff]  ;;  %v5473_v6 = vcombine.low %v1472_v48, %v1476_v24 }
 0x2f9   :  { %v5484_v59 = vcombine.high %v1481_v57, %v1485_v25  ;;  %v5483_v60 = vcombine.low %v1481_v57, %v1485_v25  ;;  %v1540_v57 = vld [vmem:[#allocation8 + $0xd70] sm:$0xff]  ;;  %v1537_v25 = vld [vmem:[#allocation8 + $0xd58] sm:$0xff] }
 0x2fa   :  { %4649 = vmatpush1.bf16.msra.mxu0 %v5425_v62  ;;  %v1492_v62 = vld [vmem:[#allocation8 + $0xbf0] sm:$0xff] }
 0x2fb   :  { %4813 = vmatpush1.bf16.msra.mxu1 %v5427_v3  ;;  %4650 = vmatprep.subr.bf16.mxu0 %v5434_v7  ;;  %v1489_v3 = vld [vmem:[#allocation8 + $0xbd8] sm:$0xff]  ;;  %v5490_v39 = vcombine.high %v1488_v61, %v1492_v62 }
 0x2fc   :  { %4814 = vmatprep.subr.bf16.mxu1 %v5436_v54  ;;  %v1493_v7 = vld [vmem:[#allocation8 + $0xbf8] sm:$0xff]  ;;  %v5481_v54 = vcombine.low %v1480_v53, %v1484_v56  ;;  %v1536_v56 = vld [vmem:[#allocation8 + $0xd50] sm:$0xff] }
 0x2fd   :  { %v5492_v1 = vcombine.high %v1489_v3, %v1493_v7  ;;  %v5491_v19 = vcombine.low %v1489_v3, %v1493_v7  ;;  %v1544_v3 = vld [vmem:[#allocation8 + $0xd90] sm:$0xff] }
 0x2fe   :  { %4651 = vmatpush1.bf16.msra.mxu0 %v5433_v5  ;;  %v1500_v5 = vld [vmem:[#allocation8 + $0xc30] sm:$0xff] }
 0x2ff   :  { %4815 = vmatpush1.bf16.msra.mxu1 %v5435_v9  ;;  %4652 = vmatprep.subr.bf16.mxu0 %v5442_v10  ;;  %v1497_v9 = vld [vmem:[#allocation8 + $0xc18] sm:$0xff]  ;;  %v5498_v15 = vcombine.high %v1496_v4, %v1500_v5  ;;  %v1548_v7 = vld [vmem:[#allocation8 + $0xdb0] sm:$0xff] }
 0x300   :  { %4816 = vmatprep.subr.bf16.mxu1 %v5444_v12  ;;  %v1501_v10 = vld [vmem:[#allocation8 + $0xc38] sm:$0xff]  ;;  %v5489_v12 = vcombine.low %v1488_v61, %v1492_v62  ;;  %v5538_v61 = vcombine.high %v1536_v56, %v1540_v57 }
 0x301   :  { %v5500_v13 = vcombine.high %v1497_v9, %v1501_v10  ;;  %v5499_v20 = vcombine.low %v1497_v9, %v1501_v10  ;;  %v5537_v10 = vcombine.low %v1536_v56, %v1540_v57 }
 0x302   :  { %4653 = vmatpush1.bf16.msra.mxu0 %v5441_v16  ;;  %v1508_v16 = vld [vmem:[#allocation8 + $0xc70] sm:$0xff] }
 0x303   :  { %4817 = vmatpush1.bf16.msra.mxu1 %v5443_v17  ;;  %4654 = vmatprep.subr.bf16.mxu0 %v5450_v18  ;;  %v5497_v17 = vcombine.low %v1496_v4, %v1500_v5  ;;  %v1505_v18 = vld [vmem:[#allocation8 + $0xc58] sm:$0xff]  ;;  %v5506_v28 = vcombine.high %v1504_v42, %v1508_v16  ;;  %v6160_v4 = vld [vmem:[#allocation11] sm:$0xff] }
 0x304   :  { %4818 = vmatprep.subr.bf16.mxu1 %v5452_v22  ;;  %v1509_v22 = vld [vmem:[#allocation8 + $0xc78] sm:$0xff] }
 0x305   :  { %v5507_v36 = vcombine.low %v1505_v18, %v1509_v22 }
 0x306   :  { %4655 = vmatpush1.bf16.msra.mxu0 %v5449_v29  ;;  %v5508_v29 = vcombine.high %v1505_v18, %v1509_v22  ;;  %v4893_v22 = vrot.slane %v6160_v4, %v6050_v23 }
 0x307   :  { %4819 = vmatpush1.bf16.msra.mxu1 %v5451_v32  ;;  %4656 = vmatprep.subr.bf16.mxu0 %v5458_v33  ;;  %v1513_v32 = vld [vmem:[#allocation8 + $0xc98] sm:$0xff] }
 0x308   :  { %4820 = vmatprep.subr.bf16.mxu1 %v5460_v34  ;;  %v1517_v33 = vld [vmem:[#allocation8 + $0xcb8] sm:$0xff]  ;;  %v5505_v34 = vcombine.low %v1504_v42, %v1508_v16  ;;  %v1552_v16 = vld [vmem:[#allocation8 + $0xdd0] sm:$0xff] }
 0x309   :  { %v5516_v38 = vcombine.high %v1513_v32, %v1517_v33 }
 0x30a   :  { %4657 = vmatpush1.bf16.msra.mxu0 %v5457_v44  ;;  %v1524_v44 = vld [vmem:[#allocation8 + $0xcf0] sm:$0xff] }
 0x30b   :  { %4821 = vmatpush1.bf16.msra.mxu1 %v5459_v45  ;;  %4658 = vmatprep.subr.bf16.mxu0 %v5466_v47  ;;  %v1521_v45 = vld [vmem:[#allocation8 + $0xcd8] sm:$0xff]  ;;  %v5522_v48 = vcombine.high %v1520_v40, %v1524_v44 }
 0x30c   :  { %4822 = vmatprep.subr.bf16.mxu1 %v5468_v2  ;;  %v1525_v47 = vld [vmem:[#allocation8 + $0xcf8] sm:$0xff]  ;;  %v5513_v2 = vcombine.low %v1512_v21, %v1516_v27 }
 0x30d   :  { %v5524_v24 = vcombine.high %v1521_v45, %v1525_v47  ;;  %v1553_v27 = vld [vmem:[#allocation8 + $0xdd8] sm:$0xff] }
 0x30e   :  { %4659 = vmatpush1.bf16.msra.mxu0 %v5465_v51  ;;  %v1529_v51 = vld [vmem:[#allocation8 + $0xd18] sm:$0xff] }
 0x30f   :  { %4823 = vmatpush1.bf16.msra.mxu1 %v5467_v43  ;;  %4660 = vmatprep.subr.bf16.mxu0 %v5474_v35  ;;  %v1533_v43 = vld [vmem:[#allocation8 + $0xd38] sm:$0xff]  ;;  %v5523_v35 = vcombine.low %v1521_v45, %v1525_v47 }
 0x310   :  { %4824 = vmatprep.subr.bf16.mxu1 %v5476_v52  ;;  %v5530_v52 = vcombine.high %v1528_v49, %v1532_v50  ;;  %v5532_v53 = vcombine.high %v1529_v51, %v1533_v43 }
 0x312   :  { %4661 = vmatpush1.bf16.msra.mxu0 %v5473_v6  ;;  %v1541_v6 = vld [vmem:[#allocation8 + $0xd78] sm:$0xff] }
 0x313   :  { %4825 = vmatpush1.bf16.msra.mxu1 %v5475_v58  ;;  %4662 = vmatprep.subr.bf16.mxu0 %v5482_v63  ;;  %v5529_v58 = vcombine.low %v1528_v49, %v1532_v50  ;;  %v6154_v63 = vld [vmem:[#allocation10] sm:$0xff]  ;;  %v5540_v62 = vcombine.high %v1537_v25, %v1541_v6  ;;  %v1564_v49 = vld [vmem:[#allocation8 + $0xe30] sm:$0xff] }
 0x314   :  { %4826 = vmatprep.subr.bf16.mxu1 %v5484_v59  ;;  %v5531_v59 = vcombine.low %v1529_v51, %v1533_v43  ;;  %v1631_v5 = vrot.slane %v6154_v63, %v6055_v26  ;;  %v1639_v9 = vrot.slane %v6154_v63, %v6062_v41  ;;  %v1561_v51 = vld [vmem:[#allocation8 + $0xe18] sm:$0xff] }
 0x315   :  { %v1565_v43 = vld [vmem:[#allocation8 + $0xe38] sm:$0xff] }
 0x316   :  { %4663 = vmatpush1.bf16.msra.mxu0 %v5481_v54  ;;  %v1627_v54 = vrot.slane %v6154_v63, %v6050_v23 }
 0x317   :  { %4827 = vmatpush1.bf16.msra.mxu1 %v5483_v60  ;;  %4664 = vmatprep.subr.bf16.mxu0 %v5490_v39  ;;  %v1635_v60 = vrot.slane %v6154_v63, %v6087_v31  ;;  %v1545_v39 = vld [vmem:[#allocation8 + $0xd98] sm:$0xff] }
 0x318   :  { %4828 = vmatprep.subr.bf16.mxu1 %v5492_v1  ;;  %v1549_v1 = vld [vmem:[#allocation8 + $0xdb8] sm:$0xff] }
 0x319   :  { %v5548_v42 = vcombine.high %v1545_v39, %v1549_v1  ;;  %v5547_v23 = vcombine.low %v1545_v39, %v1549_v1 }
 0x31a   :  { %4665 = vmatpush1.bf16.msra.mxu0 %v5489_v12  ;;  %v5539_v12 = vcombine.low %v1537_v25, %v1541_v6  ;;  %v5564_v6 = vcombine.high %v1561_v51, %v1565_v43 }
 0x31b   :  { %4829 = vmatpush1.bf16.msra.mxu1 %v5491_v19  ;;  %4675 = vmatprep.subr.bf16.mxu0 %v5498_v15  ;;  %v5546_v19 = vcombine.high %v1544_v3, %v1548_v7 }
 0x31c   :  { %4839 = vmatprep.subr.bf16.mxu1 %v5500_v13 }
 0x31d   :  { %4667 = vmatmul.mubr.bf16.vlgmr.msra.gmra.mrb[12].mxu0 %v6123_v8 }
 0x31e   :  { %4831 = vmatmul.mubr.bf16.vlgmr.msra.gmra.mrb[12].mxu1 %v6123_v8  ;;  %4676 = vmatpush1.bf16.msra.mxu0 %v5497_v17  ;;  %v5515_v8 = vcombine.low %v1513_v32, %v1517_v33  ;;  %v1556_v17 = vld [vmem:[#allocation8 + $0xdf0] sm:$0xff]  ;;  %v4897_v33 = vrot.slane %v6160_v4, %v6055_v26 }
 0x31f   :  { %4707 = vmatprep.mubr.bf16.mxu0 %v6125_v11  ;;  %4840 = vmatpush1.bf16.msra.mxu1 %v5499_v20  ;;  %v5554_v47 = vcombine.high %v1552_v16, %v1556_v17  ;;  %v1560_v26 = vld [vmem:[#allocation8 + $0xe10] sm:$0xff] }
 0x320   :  { %4871 = vmatprep.mubr.bf16.mxu1 %v6125_v11  ;;  %4677 = vmatprep.subr.bf16.mxu0 %v5506_v28  ;;  %v5521_v11 = vcombine.low %v1520_v40, %v1524_v44  ;;  %v5562_v57 = vcombine.high %v1560_v26, %v1564_v49 }
 0x321   :  { %4841 = vmatprep.subr.bf16.mxu1 %v5508_v29  ;;  %v1557_v29 = vld [vmem:[#allocation8 + $0xdf8] sm:$0xff] }
 0x322   :  { %4678 = vmatpush1.bf16.msra.mxu0 %v5505_v34  ;;  %v5555_v56 = vcombine.low %v1553_v27, %v1557_v29 }
 0x323   :  { %4842 = vmatpush1.bf16.msra.mxu1 %v5507_v36  ;;  %4679 = vmatprep.subr.bf16.mxu0 %v5514_v37 }
 0x324   :  { %4843 = vmatprep.subr.bf16.mxu1 %v5516_v38  ;;  %v5545_v38 = vcombine.low %v1544_v3, %v1548_v7 }
 0x326   :  { %4680 = vmatpush1.bf16.msra.mxu0 %v5513_v2 }
 0x327   :  { %4844 = vmatpush1.bf16.msra.mxu1 %v5515_v8  ;;  %4681 = vmatprep.subr.bf16.mxu0 %v5522_v48  ;;  %v4901_v8 = vrot.slane %v6160_v4, %v6087_v31 }
 0x328   :  { %4845 = vmatprep.subr.bf16.mxu1 %v5524_v24  ;;  %v5556_v24 = vcombine.high %v1553_v27, %v1557_v29  ;;  %v1592_v29 = vld [vmem:[#allocation8 + $0xf10] sm:$0xff] }
 0x32a   :  { %4682 = vmatpush1.bf16.msra.mxu0 %v5521_v11 }
 0x32b   :  { %4846 = vmatpush1.bf16.msra.mxu1 %v5523_v35  ;;  %4683 = vmatprep.subr.bf16.mxu0 %v5530_v52  ;;  %v4905_v52 = vrot.slane %v6160_v4, %v6062_v41  ;;  %v5563_v41 = vcombine.low %v1561_v51, %v1565_v43  ;;  %v1613_v51 = vld [vmem:[#allocation8 + $0xfb8] sm:$0xff] }
 0x32c   :  { %4847 = vmatprep.subr.bf16.mxu1 %v5532_v53  ;;  %v5553_v53 = vcombine.low %v1552_v16, %v1556_v17  ;;  %v1584_v16 = vld [vmem:[#allocation8 + $0xed0] sm:$0xff] }
 0x32d   :  { %v1588_v17 = vld [vmem:[#allocation8 + $0xef0] sm:$0xff] }
 0x32e   :  { %4684 = vmatpush1.bf16.msra.mxu0 %v5529_v58  ;;  %v1568_v58 = vld [vmem:[#allocation8 + $0xe50] sm:$0xff] }
 0x32f   :  { %4848 = vmatpush1.bf16.msra.mxu1 %v5531_v59  ;;  %4685 = vmatprep.subr.bf16.mxu0 %v5538_v61  ;;  %v1572_v59 = vld [vmem:[#allocation8 + $0xe70] sm:$0xff]  ;;  %v1569_v61 = vld [vmem:[#allocation8 + $0xe58] sm:$0xff] }
 0x330   :  { %v4381_v15 = vpop.f32.mrb[8].mxu0  ;;  %v4545_v13 = vpop.f32.mrb[8].mxu1  ;;  %4849 = vmatprep.subr.bf16.mxu1 %v5540_v62  ;;  %v1573_v62 = vld [vmem:[#allocation8 + $0xe78] sm:$0xff] }
 0x331   :  { %v5622_v18 = vadd.f32 %v4381_v15, %v1627_v54  ;;  %v5624_v20 = vadd.f32 %v4545_v13, %v1635_v60  ;;  %v4383_v28 = vpop.f32.mrb[9].mxu0  ;;  %v4547_v21 = vpop.f32.mrb[9].mxu1  ;;  %v5561_v54 = vcombine.low %v1560_v26, %v1564_v49  ;;  %v5570_v60 = vcombine.high %v1568_v58, %v1572_v59  ;;  %v1608_v26 = vld [vmem:[#allocation8 + $0xf90] sm:$0xff] }
 0x332   :  { %v5623_v32 = vadd.f32 %v4383_v28, %v1631_v5  ;;  %v5625_v34 = vadd.f32 %v4547_v21, %v1639_v9  ;;  %v4385_v36 = vpop.f32.mrb[10].mxu0  ;;  %v4549_v37 = vpop.f32.mrb[10].mxu1  ;;  %4686 = vmatpush1.bf16.msra.mxu0 %v5537_v10  ;;  %v5572_v1 = vcombine.high %v1569_v61, %v1573_v62  ;;  %v1576_v5 = vld [vmem:[#allocation8 + $0xe90] sm:$0xff]  ;;  %v1577_v10 = vld [vmem:[#allocation8 + $0xe98] sm:$0xff]  ;;  %v5571_v15 = vcombine.low %v1569_v61, %v1573_v62 }
 0x333   :  { %v4880_v40 = vmax.f32 %v5622_v18, 0.0  ;;  %4850 = vmatpush1.bf16.msra.mxu1 %v5539_v12  ;;  %v4386_v44 = vpop.f32.mrb[11].mxu0  ;;  %v4550_v45 = vpop.f32.mrb[11].mxu1  ;;  %4687 = vmatprep.subr.bf16.mxu0 %v5546_v19  ;;  %v4882_v2 = vmax.f32 %v5624_v20, 0.0  ;;  %v1580_v9 = vld [vmem:[#allocation8 + $0xeb0] sm:$0xff]  ;;  %v1581_v12 = vld [vmem:[#allocation8 + $0xeb8] sm:$0xff]  ;;  %v5569_v19 = vcombine.low %v1568_v58, %v1572_v59  ;;  %v5586_v21 = vcombine.high %v1584_v16, %v1588_v17 }
 0x334   :  { %v4881_v48 = vmax.f32 %v5623_v32, 0.0  ;;  %4851 = vmatprep.subr.bf16.mxu1 %v5548_v42  ;;  %v4883_v35 = vmax.f32 %v5625_v34, 0.0  ;;  %v5578_v13 = vcombine.high %v1576_v5, %v1580_v9  ;;  %v5580_v42 = vcombine.high %v1577_v10, %v1581_v12  ;;  %v1585_v18 = vld [vmem:[#allocation8 + $0xed8] sm:$0xff]  ;;  %v1596_v32 = vld [vmem:[#allocation8 + $0xf30] sm:$0xff] }
 0x335   :  { %v4930_v50 = vmul.f32 %v4893_v22, %v4880_v40  ;;  %v4932_v31 = vmul.f32 %v4901_v8, %v4882_v2  ;;  %v1589_v22 = vld [vmem:[#allocation8 + $0xef8] sm:$0xff]  ;;  %v5577_v20 = vcombine.low %v1576_v5, %v1580_v9  ;;  %v5579_v28 = vcombine.low %v1577_v10, %v1581_v12  ;;  %v1600_v44 = vld [vmem:[#allocation8 + $0xf50] sm:$0xff] }
 0x336   :  { %v4931_v11 = vmul.f32 %v4897_v33, %v4881_v48  ;;  %4688 = vmatpush1.bf16.msra.mxu0 %v5545_v38  ;;  %v4933_v3 = vmul.f32 %v4905_v52, %v4883_v35  ;;  %v5588_v27 = vcombine.high %v1585_v18, %v1589_v22  ;;  %v1593_v33 = vld [vmem:[#allocation8 + $0xf18] sm:$0xff]  ;;  %v5585_v36 = vcombine.low %v1584_v16, %v1588_v17  ;;  %v1604_v45 = vld [vmem:[#allocation8 + $0xf70] sm:$0xff] }
 0x337   :  { %4852 = vmatpush1.bf16.msra.mxu1 %v5547_v23  ;;  %4689 = vmatprep.subr.bf16.mxu0 %v5554_v47  ;;  %v1597_v34 = vld [vmem:[#allocation8 + $0xf38] sm:$0xff]  ;;  %v5587_v37 = vcombine.low %v1585_v18, %v1589_v22  ;;  %v5594_v38 = vcombine.high %v1592_v29, %v1596_v32  ;;  %v5593_v2 = vcombine.low %v1592_v29, %v1596_v32  ;;  %v1612_v49 = vld [vmem:[#allocation8 + $0xfb0] sm:$0xff] }
 0x338   :  { %v4938_v25 = vadd.f32 %v4931_v11, %v4930_v50  ;;  %4853 = vmatprep.subr.bf16.mxu1 %v5556_v24  ;;  %v5596_v40 = vcombine.high %v1593_v33, %v1597_v34  ;;  %v1601_v23 = vld [vmem:[#allocation8 + $0xf58] sm:$0xff]  ;;  %v5595_v8 = vcombine.low %v1593_v33, %v1597_v34  ;;  %v5602_v48 = vcombine.high %v1600_v44, %v1604_v45 }
 0x339   :  { %v1605_v47 = vld [vmem:[#allocation8 + $0xf78] sm:$0xff]  ;;  %v5601_v43 = vcombine.low %v1600_v44, %v1604_v45  ;;  %v5610_v35 = vcombine.high %v1608_v26, %v1612_v49  ;;  %v4909_v5 = vrot.slane %v6160_v4, %v6112_v14 }
 0x33a   :  { %v4939_v7 = vadd.f32 %v4938_v25, %v4932_v31  ;;  %4690 = vmatpush1.bf16.msra.mxu0 %v5553_v53  ;;  %v5604_v24 = vcombine.high %v1601_v23, %v1605_v47  ;;  %v1609_v50 = vld [vmem:[#allocation8 + $0xf98] sm:$0xff]  ;;  %v5603_v11 = vcombine.low %v1601_v23, %v1605_v47  ;;  %v1616_v53 = vld [vmem:[#allocation8 + $0xfd0] sm:$0xff]  ;;  %v5609_v25 = vcombine.low %v1608_v26, %v1612_v49 }
 0x33b   :  { %4854 = vmatpush1.bf16.msra.mxu1 %v5555_v56  ;;  %4691 = vmatprep.subr.bf16.mxu0 %v5562_v57  ;;  %v5612_v52 = vcombine.high %v1609_v50, %v1613_v51  ;;  %v1620_v56 = vld [vmem:[#allocation8 + $0xff0] sm:$0xff]  ;;  %v1617_v57 = vld [vmem:[#allocation8 + $0xfd8] sm:$0xff] }
 0x33c   :  { %v6174_v39 = vadd.f32 %v4939_v7, %v4933_v3  ;;  %4855 = vmatprep.subr.bf16.mxu1 %v5564_v6  ;;  %v1621_v31 = vld [vmem:[#allocation8 + $0xff8] sm:$0xff]  ;;  %v5611_v6 = vcombine.low %v1609_v50, %v1613_v51  ;;  %v5618_v58 = vcombine.high %v1616_v53, %v1620_v56  ;;  %v5617_v61 = vcombine.low %v1616_v53, %v1620_v56 }
 0x33d   :  { %v5620_v59 = vcombine.high %v1617_v57, %v1621_v31  ;;  %v5619_v62 = vcombine.low %v1617_v57, %v1621_v31  ;;  %v1643_v3 = vrot.slane %v6154_v63, %v6112_v14  ;;  %v1651_v7 = vrot.slane %v6154_v63, %v6132_v0 }
 0x33e   :  { %4692 = vmatpush1.bf16.msra.mxu0 %v5561_v54  ;;  %v1647_v54 = vrot.slane %v6154_v63, %v6092_v46  ;;  %v4917_v14 = vrot.slane %v6160_v4, %v6132_v0 }
 0x33f   :  { %4856 = vmatpush1.bf16.msra.mxu1 %v5563_v41  ;;  %4693 = vmatprep.subr.bf16.mxu0 %v5570_v60  ;;  %v1655_v41 = vrot.slane %v6154_v63, %v6115_v30 }
 0x340   :  { %4857 = vmatprep.subr.bf16.mxu1 %v5572_v1 }
 0x342   :  { %4694 = vmatpush1.bf16.msra.mxu0 %v5569_v19  ;;  %v4913_v19 = vrot.slane %v6160_v4, %v6092_v46  ;;  %v4921_v46 = vrot.slane %v6160_v4, %v6115_v30 }
 0x343   :  { %4858 = vmatpush1.bf16.msra.mxu1 %v5571_v15  ;;  %4695 = vmatprep.subr.bf16.mxu0 %v5578_v13 }
 0x344   :  { %4859 = vmatprep.subr.bf16.mxu1 %v5580_v42 }
 0x346   :  { %4696 = vmatpush1.bf16.msra.mxu0 %v5577_v20 }
 0x347   :  { %4860 = vmatpush1.bf16.msra.mxu1 %v5579_v28  ;;  %4697 = vmatprep.subr.bf16.mxu0 %v5586_v21 }
 0x348   :  { %4861 = vmatprep.subr.bf16.mxu1 %v5588_v27 }
 0x34a   :  { %4698 = vmatpush1.bf16.msra.mxu0 %v5585_v36 }
 0x34b   :  { %4862 = vmatpush1.bf16.msra.mxu1 %v5587_v37  ;;  %4699 = vmatprep.subr.bf16.mxu0 %v5594_v38  ;;  %v5621_v38 = vld [vmem:[#allocation13] ss:$0 sm:$0xff] }
 0x34c   :  { %4863 = vmatprep.subr.bf16.mxu1 %v5596_v40 }
 0x34e   :  { %4700 = vmatpush1.bf16.msra.mxu0 %v5593_v2 }
 0x34f   :  { %4864 = vmatpush1.bf16.msra.mxu1 %v5595_v8  ;;  %4701 = vmatprep.subr.bf16.mxu0 %v5602_v48 }
 0x350   :  { %4865 = vmatprep.subr.bf16.mxu1 %v5604_v24 }
 0x352   :  { %4702 = vmatpush1.bf16.msra.mxu0 %v5601_v43 }
 0x353   :  { %4866 = vmatpush1.bf16.msra.mxu1 %v5603_v11  ;;  %4703 = vmatprep.subr.bf16.mxu0 %v5610_v35 }
 0x354   :  { %4867 = vmatprep.subr.bf16.mxu1 %v5612_v52 }
 0x356   :  { %4704 = vmatpush1.bf16.msra.mxu0 %v5609_v25 }
 0x357   :  { %4868 = vmatpush1.bf16.msra.mxu1 %v5611_v6  ;;  %4705 = vmatprep.subr.bf16.mxu0 %v5618_v58 }
 0x358   :  { %4869 = vmatprep.subr.bf16.mxu1 %v5620_v59 }
 0x35a   :  { %4706 = vmatpush1.bf16.msra.mxu0 %v5617_v61 }
 0x35b   :  { %4870 = vmatpush1.bf16.msra.mxu1 %v5619_v62 }
 0x35d   :  { %4708 = vmatmul.mubr.bf16.vlgmr.msra.gmra.mrb[12].mxu0 %v6136_v55 }
 0x35e   :  { %4872 = vmatmul.mubr.bf16.vlgmr.msra.gmra.mrb[12].mxu1 %v6136_v55 }
 0x430   :  { %v4709_v60 = vpop.f32.mrb[12].mxu0 }
 0x431   :  { %v5626_v1 = vadd.f32 %v4709_v60, %v1643_v3  ;;  %v4873_v9 = vpop.f32.mrb[12].mxu1  ;;  %v4711_v10 = vpop.f32.mrb[13].mxu0 }
 0x432   :  { %v5628_v55 = vadd.f32 %v4873_v9, %v1651_v7  ;;  %v5627_v12 = vadd.f32 %v4711_v10, %v1647_v54  ;;  %v4875_v15 = vpop.f32.mrb[13].mxu1  ;;  %v4713_v13 = vpop.f32.mrb[14].mxu0 }
 0x433   :  { %v4884_v42 = vmax.f32 %v5626_v1, 0.0  ;;  %v5629_v16 = vadd.f32 %v4875_v15, %v1655_v41  ;;  %v4877_v17 = vpop.f32.mrb[14].mxu1  ;;  %v4714_v18 = vpop.f32.mrb[15].mxu0 }
 0x434   :  { %v4885_v22 = vmax.f32 %v5627_v12, 0.0  ;;  %v4878_v63 = vpop.f32.mrb[15].mxu1  ;;  %v4886_v28 = vmax.f32 %v5628_v55, 0.0 }
 0x435   :  { %v4934_v20 = vmul.f32 %v4909_v5, %v4884_v42  ;;  %v4887_v29 = vmax.f32 %v5629_v16, 0.0 }
 0x436   :  { %v4935_v21 = vmul.f32 %v4913_v19, %v4885_v22  ;;  %v4936_v32 = vmul.f32 %v4917_v14, %v4886_v28 }
 0x437   :  { %v4941_v27 = vadd.f32 %v6174_v39, %v4934_v20  ;;  %v4937_v34 = vmul.f32 %v4921_v46, %v4887_v29 }
 0x439   :  { %v4942_v33 = vadd.f32 %v4941_v27, %v4935_v21 }
 0x43b   :  { %v4943_v36 = vadd.f32 %v4942_v33, %v4936_v32 }
 0x43d   :  { %v4944_v37 = vadd.f32 %v4943_v36, %v4937_v34 }
 0x43f   :  { %4945 = vadd.xlane.f32.xlu0 %v4944_v37 }
 0x4cc   :  { %v4946_v40 = vpop.xlane.xlu0 %4945 }
 0x4cd   :  { %v4954_v44 = vadd.f32 %v5621_v38, %v4946_v40 }
 0x4cf   :  { %v4955_v45 = vmul.f32 0.5, %v4954_v44 }
 0x4d1   :  { %5690 = vtanh.f32 %v4955_v45 }
 0x4db   :  { %v5691_v23 = vpop.eup %5690 }
 0x4dc   :  { %v4957_v0 = vadd.f32 1.0, %v5691_v23 }
 0x4de   :  { %v4958_v39 = vmul.f32 0.5, %v4957_v0 }
 0x4e0   :  { %v4959_v47 = vpack.c.bf16 %v4958_v39, %v4958_v39 }
 0x4e2   :  { %4960 = vst [vmem:[#allocation14] sm:$0xf] %v4959_v47 }
 0x4e3   :  { %5858 = shalt.err (!%p5855_p4)
}
 0x4e4   :  { %s5859_s14 = scalar_lea.hbm %s6214_s7, 64 }
 0x4e5   :  { %p5860_p5 = scmp.ne.s32.totalorder %s6214_s7, %s5859_s14  ;;  %p5863_p6 = scmp.lt.u32.totalorder %s5859_s14, %s6214_s7 }
 0x4e7   :  { %p5865_p7 = pnand %p5863_p6, %p5860_p5 }
 0x4e9   :  { %5868 = shalt.err (!%p5865_p7)
}
 0x4ea   :  { %4970 = dma.vmem_to_hbm [thread:$0]  %s4968_s9, 64, %s6214_s7, [#allocation4]  }
 0x4eb   :  { %5877 = dma.done.wait [#allocation4], 64  }
 0x4ec   :  { %5878 = vsyncadd [#allocation4], 4294967232 }
 0x4ed   :  { %4974 = vsyncpa [#allocation3], 1 }
 0x4ee   :  { %4975 = vsyncpa [#allocation6], 1 }
 0x4ef   :  { %4976 = vsyncpa [#allocation9], 1 }
 0x4f0   :  { %4977 = vsyncpa [#allocation12], 1 }
 0x4f1   :  { %4978 = vsyncpa [#allocation4], 1 }

</bundles_post_ra>
